<compile_context>
chip_gen: v7x
topology: tpu7x:2x2x1
jax: 0.10.0
libtpu: 0.0.40
codegen_flags: <defaults>
</compile_context>

<pallas_src>
import numpy as np
import jax
import jax.numpy as jnp
from jax.experimental import pallas as pl
from jax.experimental.pallas import tpu as pltpu


# ---------------------------------------------------------------------------
# small helpers
# ---------------------------------------------------------------------------
def _round_up(n, m):
    return ((n + m - 1) // m) * m


def _pad_axis(a, axis, new_size):
    pad = new_size - a.shape[axis]
    if pad <= 0:
        return a
    widths = [(0, 0)] * a.ndim
    widths[axis] = (0, pad)
    return jnp.pad(a, widths)


def _pick_tile(n, target, align):
    """Largest multiple of `align` that divides n and is <= target, else full n."""
    if n <= target:
        return n
    t = (target // align) * align
    while t >= align:
        if n % t == 0:
            return t
        t -= align
    return n


def _vmem_budget_bytes():
    """Generation-aware VMEM budget (v5e/v6e: 128 MiB phys -> 96 MiB, v7x: 64 -> 48)."""
    cap = 128 * 2**20
    try:
        cap = int(getattr(pltpu.get_tpu_info(), "vmem_capacity_bytes", cap))
    except Exception:
        pass
    return max(32 * 2**20, min(cap * 3 // 4, 96 * 2**20))


# ---------------------------------------------------------------------------
# Tiled matmul + bias:  out = a @ b + bias   (bf16 MXU, f32 accumulate)
# ---------------------------------------------------------------------------
def _matmul_bias_kernel_nk1(a_ref, b_ref, bias_ref, o_ref):
    acc = jnp.dot(a_ref[...].astype(jnp.bfloat16),
                  b_ref[...].astype(jnp.bfloat16),
                  preferred_element_type=jnp.float32)
    o_ref[...] = (acc + bias_ref[...]).astype(o_ref.dtype)


def _matmul_bias_kernel_multik(a_ref, b_ref, bias_ref, o_ref, acc_ref):
    @pl.when(pl.program_id(2) == 0)
    def _():
        acc_ref[...] = jnp.zeros_like(acc_ref)

    acc_ref[...] += jnp.dot(a_ref[...].astype(jnp.bfloat16),
                            b_ref[...].astype(jnp.bfloat16),
                            preferred_element_type=jnp.float32)

    @pl.when(pl.program_id(2) == pl.num_programs(2) - 1)
    def _():
        o_ref[...] = (acc_ref[...] + bias_ref[...]).astype(o_ref.dtype)


def _pick_matmul_tiles(M, N, K, a_bytes, b_bytes, o_bytes, budget):
    tm_t, tn_t, tk_t = 512, 1024, 1024
    while True:
        tm = _pick_tile(M, tm_t, 8)
        tn = _pick_tile(N, tn_t, 128)
        tk = _pick_tile(K, tk_t, 128)
        acc = tm * tn * 4 if (K // tk) > 1 else 0
        ws = (2 * tm * tk * a_bytes + 2 * tk * tn * b_bytes
              + 2 * tm * tn * o_bytes + acc)
        if ws <= budget or max(tm_t, tn_t, tk_t) <= 128:
            return tm, tn, tk
        if tn_t >= tm_t and tn_t >= tk_t and tn_t > 128:
            tn_t //= 2
        elif tk_t >= tm_t and tk_t > 128:
            tk_t //= 2
        else:
            tm_t = max(tm_t // 2, 128)


def pl_matmul_bias(a, b, bias, out_dtype=jnp.float32):
    """a:(M,K)  b:(K,N)  bias:(N,).  Cast to bf16 inside the kernel, f32 accum."""
    M, K = a.shape
    K2, N = b.shape
    assert K == K2
    budget = _vmem_budget_bytes()
    tm, tn, tk = _pick_matmul_tiles(
        M, N, K, jnp.dtype(a.dtype).itemsize, jnp.dtype(b.dtype).itemsize,
        jnp.dtype(out_dtype).itemsize, budget)
    bias2d = bias.reshape(1, N).astype(jnp.float32)
    nk = K // tk

    if nk == 1:
        return pl.pallas_call(
            _matmul_bias_kernel_nk1,
            out_shape=jax.ShapeDtypeStruct((M, N), out_dtype),
            grid=(M // tm, N // tn),
            in_specs=[
                pl.BlockSpec((tm, K), lambda i, j: (i, 0)),
                pl.BlockSpec((K, tn), lambda i, j: (0, j)),
                pl.BlockSpec((1, tn), lambda i, j: (0, j)),
            ],
            out_specs=pl.BlockSpec((tm, tn), lambda i, j: (i, j)),
            compiler_params=pltpu.CompilerParams(
                dimension_semantics=("parallel", "parallel"),
                vmem_limit_bytes=budget,
            ),
        )(a, b, bias2d)

    return pl.pallas_call(
        _matmul_bias_kernel_multik,
        out_shape=jax.ShapeDtypeStruct((M, N), out_dtype),
        grid=(M // tm, N // tn, nk),
        in_specs=[
            pl.BlockSpec((tm, tk), lambda i, j, k: (i, k)),
            pl.BlockSpec((tk, tn), lambda i, j, k: (k, j)),
            pl.BlockSpec((1, tn), lambda i, j, k: (0, j)),
        ],
        out_specs=pl.BlockSpec((tm, tn), lambda i, j, k: (i, j)),
        scratch_shapes=[pltpu.VMEM((tm, tn), jnp.float32)],
        compiler_params=pltpu.CompilerParams(
            dimension_semantics=("parallel", "parallel", "arbitrary"),
            vmem_limit_bytes=budget,
        ),
    )(a, b, bias2d)


# ---------------------------------------------------------------------------
# Fused depthwise 3x3 conv (pad=1) + bias + chunk + GELU gate, tiled over
# (batch, channel).  Halo handled in VMEM (no HBM padding pass).
# ---------------------------------------------------------------------------
_PADL = 8  # sublane-aligned interior offset inside the W-padded VMEM scratch


def _dwconv_gate_kernel(H, W):
    def kernel(x1_ref, x2_ref, w1_ref, w2_ref, b1_ref, b2_ref, o_ref,
               xw1_ref, xw2_ref, a1_ref, a2_ref):
        f32 = jnp.float32

        # Zero-fill W-padded scratch, then write the interior at an aligned offset.
        xw1_ref[...] = jnp.zeros_like(xw1_ref)
        xw2_ref[...] = jnp.zeros_like(xw2_ref)
        xw1_ref[:, _PADL:_PADL + W, :] = x1_ref[0].astype(f32)
        xw2_ref[:, _PADL:_PADL + W, :] = x2_ref[0].astype(f32)

        # Only 3 sublane-unaligned slices per half (W-shift hoisted out of taps).
        s1 = [xw1_ref[:, _PADL - 1 + kw:_PADL - 1 + kw + W, :] for kw in range(3)]
        s2 = [xw2_ref[:, _PADL - 1 + kw:_PADL - 1 + kw + W, :] for kw in range(3)]

        # center row (kh = 1) + bias
        a1_ref[...] = (b1_ref[0, :]
                       + s1[0] * w1_ref[3, :] + s1[1] * w1_ref[4, :] + s1[2] * w1_ref[5, :])
        a2_ref[...] = (b2_ref[0, :]
                       + s2[0] * w2_ref[3, :] + s2[1] * w2_ref[4, :] + s2[2] * w2_ref[5, :])

        if H > 1:
            # row above (kh = 0) -> output rows 1..H-1 (aligned row slices)
            a1_ref[1:H, :, :] = a1_ref[1:H, :, :] + (
                s1[0][:H - 1] * w1_ref[0, :] + s1[1][:H - 1] * w1_ref[1, :]
                + s1[2][:H - 1] * w1_ref[2, :])
            a2_ref[1:H, :, :] = a2_ref[1:H, :, :] + (
                s2[0][:H - 1] * w2_ref[0, :] + s2[1][:H - 1] * w2_ref[1, :]
                + s2[2][:H - 1] * w2_ref[2, :])
            # row below (kh = 2) -> output rows 0..H-2
            a1_ref[:H - 1, :, :] = a1_ref[:H - 1, :, :] + (
                s1[0][1:] * w1_ref[6, :] + s1[1][1:] * w1_ref[7, :]
                + s1[2][1:] * w1_ref[8, :])
            a2_ref[:H - 1, :, :] = a2_ref[:H - 1, :, :] + (
                s2[0][1:] * w2_ref[6, :] + s2[1][1:] * w2_ref[7, :]
                + s2[2][1:] * w2_ref[8, :])

        # TODO(synk): exact-erf GELU (PyTorch default) approximated with tanh form.
        o_ref[0] = (jax.nn.gelu(a1_ref[...], approximate=True)
                    * a2_ref[...]).astype(o_ref.dtype)

    return kernel


def _pick_dw_ctile(hp, H, W, budget):
    hw = H * W
    per_tc = (2 * 2 * hw * 2        # 2 bf16 input halves, double-buffered
              + 2 * hw * 2          # bf16 output, double-buffered
              + 2 * H * (W + 2 * _PADL) * 4   # f32 W-padded scratch x2
              + 2 * hw * 4          # f32 accumulators x2
              + 8 * hw * 4)         # headroom for compute temporaries
    best = 128
    for tc in range(128, min(hp, 512) + 1, 128):
        if hp % tc == 0 and tc * per_tc <= budget:
            best = tc
    return best


def pl_dwconv3x3_gate(y, w1, w2, b1, b2):
    """y: (B,H,W,2*hp) bf16 NHWC (lane-dense, halves at [:hp], [hp:]).
    Returns gelu(dwconv1(y1)+b1) * (dwconv2(y2)+b2) as (B,H,W,hp) bf16."""
    B, H, W, C2p = y.shape
    hp = C2p // 2
    budget = _vmem_budget_bytes()
    tc = _pick_dw_ctile(hp, H, W, budget)
    nct = hp // tc

    return pl.pallas_call(
        _dwconv_gate_kernel(H, W),
        out_shape=jax.ShapeDtypeStruct((B, H, W, hp), jnp.bfloat16),
        grid=(B, nct),
        in_specs=[
            pl.BlockSpec((1, H, W, tc), lambda b, c: (b, 0, 0, c)),        # x1 half
            pl.BlockSpec((1, H, W, tc), lambda b, c: (b, 0, 0, c + nct)),  # x2 half
            pl.BlockSpec((9, tc), lambda b, c: (0, c)),
            pl.BlockSpec((9, tc), lambda b, c: (0, c)),
            pl.BlockSpec((1, tc), lambda b, c: (0, c)),
            pl.BlockSpec((1, tc), lambda b, c: (0, c)),
        ],
        out_specs=pl.BlockSpec((1, H, W, tc), lambda b, c: (b, 0, 0, c)),
        scratch_shapes=[
            pltpu.VMEM((H, W + 2 * _PADL, tc), jnp.float32),
            pltpu.VMEM((H, W + 2 * _PADL, tc), jnp.float32),
            pltpu.VMEM((H, W, tc), jnp.float32),
            pltpu.VMEM((H, W, tc), jnp.float32),
        ],
        compiler_params=pltpu.CompilerParams(
            dimension_semantics=("parallel", "parallel"),
            vmem_limit_bytes=budget,
        ),
    )(y, y, w1, w2, b1, b2)


# ---------------------------------------------------------------------------
# FeedForward forward pass (NCHW in / NCHW out, NHWC + lane-padded internally)
# ---------------------------------------------------------------------------
def feed_forward(params, x_nchw):
    w_in, b_in = params["project_in"]["w"], params["project_in"]["b"]
    dw_w, dw_b = params["dwconv"]["w"], params["dwconv"]["b"]
    w_out, b_out = params["project_out"]["w"], params["project_out"]["b"]

    C2 = w_in.shape[0]            # 2 * hidden
    hidden = C2 // 2
    dim_out = w_out.shape[0]
    hp = _round_up(hidden, 128)   # lane-dense hidden width

    # ---- weight prep (tiny arrays; zero-padded channels are numerically inert) ----
    w_in2d = w_in.reshape(C2, -1)                                   # (2*hidden, dim)
    w_in_p = jnp.concatenate([_pad_axis(w_in2d[:hidden], 0, hp),
                              _pad_axis(w_in2d[hidden:], 0, hp)], axis=0)   # (2hp, dim)
    b_in_p = jnp.concatenate([_pad_axis(b_in[:hidden], 0, hp),
                              _pad_axis(b_in[hidden:], 0, hp)])              # (2hp,)

    dw9 = dw_w.reshape(C2, 9)                                       # t = kh*3 + kw
    w1 = _pad_axis(dw9[:hidden].T, 1, hp).astype(jnp.float32)       # (9, hp)
    w2 = _pad_axis(dw9[hidden:].T, 1, hp).astype(jnp.float32)
    b1 = _pad_axis(dw_b[:hidden], 0, hp).reshape(1, hp).astype(jnp.float32)
    b2 = _pad_axis(dw_b[hidden:], 0, hp).reshape(1, hp).astype(jnp.float32)

    w_out_p = _pad_axis(w_out.reshape(dim_out, hidden).T, 0, hp)    # (hp, dim_out)

    # ---- forward: NHWC internally so channels ride the lane axis ----
    x = jnp.transpose(x_nchw, (0, 2, 3, 1))                         # (B,H,W,dim) f32
    B, H, W, C = x.shape
    M = B * H * W

    # project_in: 1x1 conv as lane-dense tiled matmul -> bf16 intermediate
    y = pl_matmul_bias(x.reshape(M, C),
                       jnp.transpose(w_in_p).astype(jnp.bfloat16),
                       b_in_p, out_dtype=jnp.bfloat16)
    y = y.reshape(B, H, W, 2 * hp)

    # fused depthwise 3x3 + bias + chunk + gelu gate -> bf16 (B,H,W,hp)
    g = pl_dwconv3x3_gate(y, w1, w2, b1, b2)

    # project_out: 1x1 conv as tiled matmul -> f32 output
    out = pl_matmul_bias(g.reshape(M, hp),
                         w_out_p.astype(jnp.bfloat16),
                         b_out, out_dtype=jnp.float32)
    out = out.reshape(B, H, W, dim_out)
    return jnp.transpose(out, (0, 3, 1, 2))


# ---------------------------------------------------------------------------
# pure-JAX reference (exact erf GELU, f32 everywhere) for a sanity check
# ---------------------------------------------------------------------------
def feed_forward_ref(params, x_nchw):
    w_in, b_in = params["project_in"]["w"], params["project_in"]["b"]
    dw_w, dw_b = params["dwconv"]["w"], params["dwconv"]["b"]
    w_out, b_out = params["project_out"]["w"], params["project_out"]["b"]
    C2 = w_in.shape[0]
    hidden = C2 // 2
    dim_out = w_out.shape[0]

    x = jnp.transpose(x_nchw, (0, 2, 3, 1)).astype(jnp.float32)
    C = x.shape[-1]
    y = jnp.einsum("bhwc,oc->bhwo", x, w_in.reshape(C2, C)) + b_in
    dw_hwio = jnp.transpose(dw_w.reshape(C2, 1, 3, 3), (2, 3, 1, 0))  # (3,3,1,C2)
    y = jax.lax.conv_general_dilated(
        y, dw_hwio, window_strides=(1, 1), padding="SAME",
        dimension_numbers=("NHWC", "HWIO", "NHWC"),
        feature_group_count=C2) + dw_b
    x1, x2 = y[..., :hidden], y[..., hidden:]
    g = jax.nn.gelu(x1, approximate=False) * x2
    out = jnp.einsum("bhwc,oc->bhwo", g, w_out.reshape(dim_out, hidden)) + b_out
    return jnp.transpose(out, (0, 3, 1, 2))


# ---------------------------------------------------------------------------
# deterministic parameter init (shapes follow the PyTorch __init__)
# ---------------------------------------------------------------------------
def init_feed_forward_params(key, dim, ffn_expansion_factor=2.66, bias=True):
    hidden = int(dim * ffn_expansion_factor)

    def conv_init(k, cout, cin, ksz):
        kw, kb = jax.random.split(k)
        fan_in = cin * ksz * ksz
        w = jax.random.normal(kw, (cout, cin, ksz, ksz), jnp.float32) / np.sqrt(fan_in)
        if bias:
            b = jax.random.normal(kb, (cout,), jnp.float32) * 0.01
        else:
            b = jnp.zeros((cout,), jnp.float32)
        return {"w": w, "b": b}

    k1, k2, k3 = jax.random.split(key, 3)
    return {
        "project_in": conv_init(k1, hidden * 2, dim, 1),
        "dwconv": conv_init(k2, hidden * 2, 1, 3),      # depthwise (2h,1,3,3)
        "project_out": conv_init(k3, dim, hidden, 1),
    }


# ---------------------------------------------------------------------------
if __name__ == "__main__":
    key = jax.random.PRNGKey(0)
    pkey, xkey = jax.random.split(key)
    B, dim, H, W = 2, 16, 16, 16
    params = init_feed_forward_params(pkey, dim, ffn_expansion_factor=2.66, bias=True)
    x = jax.random.normal(xkey, (B, dim, H, W), dtype=jnp.float32)

    fwd = jax.jit(feed_forward)
    out = fwd(params, x)
    jax.block_until_ready(out)

    assert out.shape == (B, dim, H, W), out.shape
    assert bool(jnp.all(jnp.isfinite(out)))

    ref = feed_forward_ref(params, x)
    err = float(jnp.max(jnp.abs(out - ref)))
    scale = float(jnp.max(jnp.abs(ref))) + 1e-6
    assert err / scale < 5e-2, f"relative err {err / scale} (abs {err})"

    print("KERNEL_OK")
</pallas_src>

<mosaic_0001>
module attributes {stable_mosaic.version = 11 : i64} {
  func.func @_matmul_bias_kernel_nk1(%arg0: i32, %arg1: i32, %arg2: memref<512x16xf32, #tpu.memory_space<vmem>>, %arg3: memref<16x256xbf16, #tpu.memory_space<vmem>>, %arg4: memref<1x256xf32, #tpu.memory_space<vmem>>, %arg5: memref<512x256xbf16, #tpu.memory_space<vmem>>) attributes {dimension_semantics = [#tpu.dimension_semantics<parallel>, #tpu.dimension_semantics<parallel>], iteration_bounds = array<i64: 1, 1>, scalar_prefetch = 0 : i64, scratch_operands = 0 : i64, tpu.core_type = #tpu.core_type<tc>, window_params = [{transform_indices = @transform_0, window_bounds = array<i64: 512, 16>}, {transform_indices = @transform_1, window_bounds = array<i64: 16, 256>}, {transform_indices = @transform_2, window_bounds = array<i64: 1, 256>}, {transform_indices = @transform_3, window_bounds = array<i64: 512, 256>}]} {
    %c0 = arith.constant 0 : index
    %c0_0 = arith.constant 0 : index
    %0 = vector.load %arg2[%c0, %c0_0] : memref<512x16xf32, #tpu.memory_space<vmem>>, vector<512x16xf32>
    %1 = arith.truncf %0 : vector<512x16xf32> to vector<512x16xbf16>
    %c0_1 = arith.constant 0 : index
    %c0_2 = arith.constant 0 : index
    %2 = vector.load %arg3[%c0_1, %c0_2] : memref<16x256xbf16, #tpu.memory_space<vmem>>, vector<16x256xbf16>
    %cst = arith.constant dense<0.000000e+00> : vector<512x256xf32>
    %3 = tpu.matmul %1, %2, %cst {dimension_numbers = #tpu.dot_dimension_numbers<[1], [0], [0], [1], [0, 0, 1, 1], [], []>} : vector<512x16xbf16>, vector<16x256xbf16>, vector<512x256xf32> -> vector<512x256xf32>
    %c0_3 = arith.constant 0 : index
    %c0_4 = arith.constant 0 : index
    %4 = vector.load %arg4[%c0_3, %c0_4] : memref<1x256xf32, #tpu.memory_space<vmem>>, vector<1x256xf32>
    %5 = vector.broadcast %4 : vector<1x256xf32> to vector<512x256xf32>
    %6 = arith.addf %3, %5 : vector<512x256xf32>
    %7 = arith.truncf %6 : vector<512x256xf32> to vector<512x256xbf16>
    %c0_5 = arith.constant 0 : index
    %c0_6 = arith.constant 0 : index
    %8 = vector.load %arg5[%c0_5, %c0_6] : memref<512x256xbf16, #tpu.memory_space<vmem>>, vector<512x256xbf16>
    tpu.vector_store %arg5[%c0_5, %c0_6], %7 {strides = array<i32>} : memref<512x256xbf16, #tpu.memory_space<vmem>>, vector<512x256xbf16>,
    return
  }
  func.func @transform_0(%arg0: i32, %arg1: i32) -> (i32, i32) {
    %c0_i32 = arith.constant 0 : i32
    %c0_i32_0 = arith.constant 0 : i32
    return %arg0, %c0_i32 : i32, i32
  }
  func.func @transform_1(%arg0: i32, %arg1: i32) -> (i32, i32) {
    %c0_i32 = arith.constant 0 : i32
    %c0_i32_0 = arith.constant 0 : i32
    return %c0_i32, %arg1 : i32, i32
  }
  func.func @transform_2(%arg0: i32, %arg1: i32) -> (i32, i32) {
    %c0_i32 = arith.constant 0 : i32
    %c0_i32_0 = arith.constant 0 : i32
    return %c0_i32, %arg1 : i32, i32
  }
  func.func @transform_3(%arg0: i32, %arg1: i32) -> (i32, i32) {
    %c0_i32 = arith.constant 0 : i32
    return %arg0, %arg1 : i32, i32
  }
}

module attributes {stable_mosaic.version = 11 : i64} {
  func.func @kernel(%arg0: i32, %arg1: i32, %arg2: memref<1x16x16x128xbf16, #tpu.memory_space<vmem>>, %arg3: memref<1x16x16x128xbf16, #tpu.memory_space<vmem>>, %arg4: memref<9x128xf32, #tpu.memory_space<vmem>>, %arg5: memref<9x128xf32, #tpu.memory_space<vmem>>, %arg6: memref<1x128xf32, #tpu.memory_space<vmem>>, %arg7: memref<1x128xf32, #tpu.memory_space<vmem>>, %arg8: memref<1x16x16x128xbf16, #tpu.memory_space<vmem>>, %arg9: memref<16x32x128xf32, #tpu.memory_space<vmem>>, %arg10: memref<16x32x128xf32, #tpu.memory_space<vmem>>, %arg11: memref<16x16x128xf32, #tpu.memory_space<vmem>>, %arg12: memref<16x16x128xf32, #tpu.memory_space<vmem>>) attributes {dimension_semantics = [#tpu.dimension_semantics<parallel>, #tpu.dimension_semantics<parallel>], iteration_bounds = array<i64: 2, 1>, scalar_prefetch = 0 : i64, scratch_operands = 4 : i64, tpu.core_type = #tpu.core_type<tc>, window_params = [{transform_indices = @transform_0, window_bounds = array<i64: 1, 16, 16, 128>}, {transform_indices = @transform_1, window_bounds = array<i64: 1, 16, 16, 128>}, {transform_indices = @transform_2, window_bounds = array<i64: 9, 128>}, {transform_indices = @transform_3, window_bounds = array<i64: 9, 128>}, {transform_indices = @transform_4, window_bounds = array<i64: 1, 128>}, {transform_indices = @transform_5, window_bounds = array<i64: 1, 128>}, {transform_indices = @transform_6, window_bounds = array<i64: 1, 16, 16, 128>}]} {
    %cst = arith.constant 0.000000e+00 : f32
    %0 = vector.broadcast %cst : f32 to vector<16x32x128xf32>
    %c0 = arith.constant 0 : index
    %c0_0 = arith.constant 0 : index
    %c0_1 = arith.constant 0 : index
    %1 = vector.load %arg9[%c0, %c0_0, %c0_1] : memref<16x32x128xf32, #tpu.memory_space<vmem>>, vector<16x32x128xf32>
    tpu.vector_store %arg9[%c0, %c0_0, %c0_1], %0 {strides = array<i32>} : memref<16x32x128xf32, #tpu.memory_space<vmem>>, vector<16x32x128xf32>,
    %cst_2 = arith.constant 0.000000e+00 : f32
    %2 = vector.broadcast %cst_2 : f32 to vector<16x32x128xf32>
    %c0_3 = arith.constant 0 : index
    %c0_4 = arith.constant 0 : index
    %c0_5 = arith.constant 0 : index
    %3 = vector.load %arg10[%c0_3, %c0_4, %c0_5] : memref<16x32x128xf32, #tpu.memory_space<vmem>>, vector<16x32x128xf32>
    tpu.vector_store %arg10[%c0_3, %c0_4, %c0_5], %2 {strides = array<i32>} : memref<16x32x128xf32, #tpu.memory_space<vmem>>, vector<16x32x128xf32>,
    %c0_6 = arith.constant 0 : index
    %c0_7 = arith.constant 0 : index
    %c0_8 = arith.constant 0 : index
    %c0_9 = arith.constant 0 : index
    %4 = vector.load %arg2[%c0_6, %c0_7, %c0_8, %c0_9] : memref<1x16x16x128xbf16, #tpu.memory_space<vmem>>, vector<1x16x16x128xbf16>
    %5 = vector.shape_cast %4 : vector<1x16x16x128xbf16> to vector<16x16x128xbf16>
    %6 = arith.extf %5 : vector<16x16x128xbf16> to vector<16x16x128xf32>
    %c0_10 = arith.constant 0 : index
    %c8 = arith.constant 8 : index
    %c0_11 = arith.constant 0 : index
    %7 = vector.load %arg9[%c0_10, %c8, %c0_11] : memref<16x32x128xf32, #tpu.memory_space<vmem>>, vector<16x16x128xf32>
    tpu.vector_store %arg9[%c0_10, %c8, %c0_11], %6 {strides = array<i32>} : memref<16x32x128xf32, #tpu.memory_space<vmem>>, vector<16x16x128xf32>,
    %c0_12 = arith.constant 0 : index
    %c0_13 = arith.constant 0 : index
    %c0_14 = arith.constant 0 : index
    %c0_15 = arith.constant 0 : index
    %8 = vector.load %arg3[%c0_12, %c0_13, %c0_14, %c0_15] : memref<1x16x16x128xbf16, #tpu.memory_space<vmem>>, vector<1x16x16x128xbf16>
    %9 = vector.shape_cast %8 : vector<1x16x16x128xbf16> to vector<16x16x128xbf16>
    %10 = arith.extf %9 : vector<16x16x128xbf16> to vector<16x16x128xf32>
    %c0_16 = arith.constant 0 : index
    %c8_17 = arith.constant 8 : index
    %c0_18 = arith.constant 0 : index
    %11 = vector.load %arg10[%c0_16, %c8_17, %c0_18] : memref<16x32x128xf32, #tpu.memory_space<vmem>>, vector<16x16x128xf32>
    tpu.vector_store %arg10[%c0_16, %c8_17, %c0_18], %10 {strides = array<i32>} : memref<16x32x128xf32, #tpu.memory_space<vmem>>, vector<16x16x128xf32>,
    %c0_19 = arith.constant 0 : index
    %c7 = arith.constant 7 : index
    %c0_20 = arith.constant 0 : index
    %12 = vector.load %arg9[%c0_19, %c7, %c0_20] : memref<16x32x128xf32, #tpu.memory_space<vmem>>, vector<16x16x128xf32>
    %c0_21 = arith.constant 0 : index
    %c8_22 = arith.constant 8 : index
    %c0_23 = arith.constant 0 : index
    %13 = vector.load %arg9[%c0_21, %c8_22, %c0_23] : memref<16x32x128xf32, #tpu.memory_space<vmem>>, vector<16x16x128xf32>
    %c0_24 = arith.constant 0 : index
    %c9 = arith.constant 9 : index
    %c0_25 = arith.constant 0 : index
    %14 = vector.load %arg9[%c0_24, %c9, %c0_25] : memref<16x32x128xf32, #tpu.memory_space<vmem>>, vector<16x16x128xf32>
    %c0_26 = arith.constant 0 : index
    %c7_27 = arith.constant 7 : index
    %c0_28 = arith.constant 0 : index
    %15 = vector.load %arg10[%c0_26, %c7_27, %c0_28] : memref<16x32x128xf32, #tpu.memory_space<vmem>>, vector<16x16x128xf32>
    %c0_29 = arith.constant 0 : index
    %c8_30 = arith.constant 8 : index
    %c0_31 = arith.constant 0 : index
    %16 = vector.load %arg10[%c0_29, %c8_30, %c0_31] : memref<16x32x128xf32, #tpu.memory_space<vmem>>, vector<16x16x128xf32>
    %c0_32 = arith.constant 0 : index
    %c9_33 = arith.constant 9 : index
    %c0_34 = arith.constant 0 : index
    %17 = vector.load %arg10[%c0_32, %c9_33, %c0_34] : memref<16x32x128xf32, #tpu.memory_space<vmem>>, vector<16x16x128xf32>
    %c0_35 = arith.constant 0 : index
    %c0_36 = arith.constant 0 : index
    %18 = vector.load %arg6[%c0_35, %c0_36] : memref<1x128xf32, #tpu.memory_space<vmem>>, vector<1x128xf32>
    %19 = vector.shape_cast %18 : vector<1x128xf32> to vector<128xf32>
    %c3 = arith.constant 3 : index
    %c0_37 = arith.constant 0 : index
    %20 = vector.load %arg4[%c3, %c0_37] : memref<9x128xf32, #tpu.memory_space<vmem>>, vector<1x128xf32>
    %21 = vector.shape_cast %20 : vector<1x128xf32> to vector<128xf32>
    %22 = vector.shape_cast %21 : vector<128xf32> to vector<1x1x128xf32>
    %23 = vector.broadcast %22 : vector<1x1x128xf32> to vector<16x16x128xf32>
    %24 = arith.mulf %12, %23 : vector<16x16x128xf32>
    %25 = vector.shape_cast %19 : vector<128xf32> to vector<1x1x128xf32>
    %26 = vector.broadcast %25 : vector<1x1x128xf32> to vector<16x16x128xf32>
    %27 = arith.addf %26, %24 : vector<16x16x128xf32>
    %c4 = arith.constant 4 : index
    %c0_38 = arith.constant 0 : index
    %28 = vector.load %arg4[%c4, %c0_38] : memref<9x128xf32, #tpu.memory_space<vmem>>, vector<1x128xf32>
    %29 = vector.shape_cast %28 : vector<1x128xf32> to vector<128xf32>
    %30 = vector.shape_cast %29 : vector<128xf32> to vector<1x1x128xf32>
    %31 = vector.broadcast %30 : vector<1x1x128xf32> to vector<16x16x128xf32>
    %32 = arith.mulf %13, %31 : vector<16x16x128xf32>
    %33 = arith.addf %27, %32 : vector<16x16x128xf32>
    %c5 = arith.constant 5 : index
    %c0_39 = arith.constant 0 : index
    %34 = vector.load %arg4[%c5, %c0_39] : memref<9x128xf32, #tpu.memory_space<vmem>>, vector<1x128xf32>
    %35 = vector.shape_cast %34 : vector<1x128xf32> to vector<128xf32>
    %36 = vector.shape_cast %35 : vector<128xf32> to vector<1x1x128xf32>
    %37 = vector.broadcast %36 : vector<1x1x128xf32> to vector<16x16x128xf32>
    %38 = arith.mulf %14, %37 : vector<16x16x128xf32>
    %39 = arith.addf %33, %38 : vector<16x16x128xf32>
    %c0_40 = arith.constant 0 : index
    %c0_41 = arith.constant 0 : index
    %c0_42 = arith.constant 0 : index
    %40 = vector.load %arg11[%c0_40, %c0_41, %c0_42] : memref<16x16x128xf32, #tpu.memory_space<vmem>>, vector<16x16x128xf32>
    tpu.vector_store %arg11[%c0_40, %c0_41, %c0_42], %39 {strides = array<i32>} : memref<16x16x128xf32, #tpu.memory_space<vmem>>, vector<16x16x128xf32>,
    %c0_43 = arith.constant 0 : index
    %c0_44 = arith.constant 0 : index
    %41 = vector.load %arg7[%c0_43, %c0_44] : memref<1x128xf32, #tpu.memory_space<vmem>>, vector<1x128xf32>
    %42 = vector.shape_cast %41 : vector<1x128xf32> to vector<128xf32>
    %c3_45 = arith.constant 3 : index
    %c0_46 = arith.constant 0 : index
    %43 = vector.load %arg5[%c3_45, %c0_46] : memref<9x128xf32, #tpu.memory_space<vmem>>, vector<1x128xf32>
    %44 = vector.shape_cast %43 : vector<1x128xf32> to vector<128xf32>
    %45 = vector.shape_cast %44 : vector<128xf32> to vector<1x1x128xf32>
    %46 = vector.broadcast %45 : vector<1x1x128xf32> to vector<16x16x128xf32>
    %47 = arith.mulf %15, %46 : vector<16x16x128xf32>
    %48 = vector.shape_cast %42 : vector<128xf32> to vector<1x1x128xf32>
    %49 = vector.broadcast %48 : vector<1x1x128xf32> to vector<16x16x128xf32>
    %50 = arith.addf %49, %47 : vector<16x16x128xf32>
    %c4_47 = arith.constant 4 : index
    %c0_48 = arith.constant 0 : index
    %51 = vector.load %arg5[%c4_47, %c0_48] : memref<9x128xf32, #tpu.memory_space<vmem>>, vector<1x128xf32>
    %52 = vector.shape_cast %51 : vector<1x128xf32> to vector<128xf32>
    %53 = vector.shape_cast %52 : vector<128xf32> to vector<1x1x128xf32>
    %54 = vector.broadcast %53 : vector<1x1x128xf32> to vector<16x16x128xf32>
    %55 = arith.mulf %16, %54 : vector<16x16x128xf32>
    %56 = arith.addf %50, %55 : vector<16x16x128xf32>
    %c5_49 = arith.constant 5 : index
    %c0_50 = arith.constant 0 : index
    %57 = vector.load %arg5[%c5_49, %c0_50] : memref<9x128xf32, #tpu.memory_space<vmem>>, vector<1x128xf32>
    %58 = vector.shape_cast %57 : vector<1x128xf32> to vector<128xf32>
    %59 = vector.shape_cast %58 : vector<128xf32> to vector<1x1x128xf32>
    %60 = vector.broadcast %59 : vector<1x1x128xf32> to vector<16x16x128xf32>
    %61 = arith.mulf %17, %60 : vector<16x16x128xf32>
    %62 = arith.addf %56, %61 : vector<16x16x128xf32>
    %c0_51 = arith.constant 0 : index
    %c0_52 = arith.constant 0 : index
    %c0_53 = arith.constant 0 : index
    %63 = vector.load %arg12[%c0_51, %c0_52, %c0_53] : memref<16x16x128xf32, #tpu.memory_space<vmem>>, vector<16x16x128xf32>
    tpu.vector_store %arg12[%c0_51, %c0_52, %c0_53], %62 {strides = array<i32>} : memref<16x16x128xf32, #tpu.memory_space<vmem>>, vector<16x16x128xf32>,
    %c1 = arith.constant 1 : index
    %c0_54 = arith.constant 0 : index
    %c0_55 = arith.constant 0 : index
    %64 = vector.load %arg11[%c1, %c0_54, %c0_55] : memref<16x16x128xf32, #tpu.memory_space<vmem>>, vector<15x16x128xf32>
    %65 = vector.extract_strided_slice %12 {offsets = [0, 0, 0], sizes = [15, 16, 128], strides = [1, 1, 1]} : vector<16x16x128xf32> to vector<15x16x128xf32>
    %c0_56 = arith.constant 0 : index
    %c0_57 = arith.constant 0 : index
    %66 = vector.load %arg4[%c0_56, %c0_57] : memref<9x128xf32, #tpu.memory_space<vmem>>, vector<1x128xf32>
    %67 = vector.shape_cast %66 : vector<1x128xf32> to vector<128xf32>
    %68 = vector.shape_cast %67 : vector<128xf32> to vector<1x1x128xf32>
    %69 = vector.broadcast %68 : vector<1x1x128xf32> to vector<15x16x128xf32>
    %70 = arith.mulf %65, %69 : vector<15x16x128xf32>
    %71 = vector.extract_strided_slice %13 {offsets = [0, 0, 0], sizes = [15, 16, 128], strides = [1, 1, 1]} : vector<16x16x128xf32> to vector<15x16x128xf32>
    %c1_58 = arith.constant 1 : index
    %c0_59 = arith.constant 0 : index
    %72 = vector.load %arg4[%c1_58, %c0_59] : memref<9x128xf32, #tpu.memory_space<vmem>>, vector<1x128xf32>
    %73 = vector.shape_cast %72 : vector<1x128xf32> to vector<128xf32>
    %74 = vector.shape_cast %73 : vector<128xf32> to vector<1x1x128xf32>
    %75 = vector.broadcast %74 : vector<1x1x128xf32> to vector<15x16x128xf32>
    %76 = arith.mulf %71, %75 : vector<15x16x128xf32>
    %77 = arith.addf %70, %76 : vector<15x16x128xf32>
    %78 = vector.extract_strided_slice %14 {offsets = [0, 0, 0], sizes = [15, 16, 128], strides = [1, 1, 1]} : vector<16x16x128xf32> to vector<15x16x128xf32>
    %c2 = arith.constant 2 : index
    %c0_60 = arith.constant 0 : index
    %79 = vector.load %arg4[%c2, %c0_60] : memref<9x128xf32, #tpu.memory_space<vmem>>, vector<1x128xf32>
    %80 = vector.shape_cast %79 : vector<1x128xf32> to vector<128xf32>
    %81 = vector.shape_cast %80 : vector<128xf32> to vector<1x1x128xf32>
    %82 = vector.broadcast %81 : vector<1x1x128xf32> to vector<15x16x128xf32>
    %83 = arith.mulf %78, %82 : vector<15x16x128xf32>
    %84 = arith.addf %77, %83 : vector<15x16x128xf32>
    %85 = arith.addf %64, %84 : vector<15x16x128xf32>
    %c1_61 = arith.constant 1 : index
    %c0_62 = arith.constant 0 : index
    %c0_63 = arith.constant 0 : index
    %86 = vector.load %arg11[%c1_61, %c0_62, %c0_63] : memref<16x16x128xf32, #tpu.memory_space<vmem>>, vector<15x16x128xf32>
    tpu.vector_store %arg11[%c1_61, %c0_62, %c0_63], %85 {strides = array<i32>} : memref<16x16x128xf32, #tpu.memory_space<vmem>>, vector<15x16x128xf32>,
    %c1_64 = arith.constant 1 : index
    %c0_65 = arith.constant 0 : index
    %c0_66 = arith.constant 0 : index
    %87 = vector.load %arg12[%c1_64, %c0_65, %c0_66] : memref<16x16x128xf32, #tpu.memory_space<vmem>>, vector<15x16x128xf32>
    %88 = vector.extract_strided_slice %15 {offsets = [0, 0, 0], sizes = [15, 16, 128], strides = [1, 1, 1]} : vector<16x16x128xf32> to vector<15x16x128xf32>
    %c0_67 = arith.constant 0 : index
    %c0_68 = arith.constant 0 : index
    %89 = vector.load %arg5[%c0_67, %c0_68] : memref<9x128xf32, #tpu.memory_space<vmem>>, vector<1x128xf32>
    %90 = vector.shape_cast %89 : vector<1x128xf32> to vector<128xf32>
    %91 = vector.shape_cast %90 : vector<128xf32> to vector<1x1x128xf32>
    %92 = vector.broadcast %91 : vector<1x1x128xf32> to vector<15x16x128xf32>
    %93 = arith.mulf %88, %92 : vector<15x16x128xf32>
    %94 = vector.extract_strided_slice %16 {offsets = [0, 0, 0], sizes = [15, 16, 128], strides = [1, 1, 1]} : vector<16x16x128xf32> to vector<15x16x128xf32>
    %c1_69 = arith.constant 1 : index
    %c0_70 = arith.constant 0 : index
    %95 = vector.load %arg5[%c1_69, %c0_70] : memref<9x128xf32, #tpu.memory_space<vmem>>, vector<1x128xf32>
    %96 = vector.shape_cast %95 : vector<1x128xf32> to vector<128xf32>
    %97 = vector.shape_cast %96 : vector<128xf32> to vector<1x1x128xf32>
    %98 = vector.broadcast %97 : vector<1x1x128xf32> to vector<15x16x128xf32>
    %99 = arith.mulf %94, %98 : vector<15x16x128xf32>
    %100 = arith.addf %93, %99 : vector<15x16x128xf32>
    %101 = vector.extract_strided_slice %17 {offsets = [0, 0, 0], sizes = [15, 16, 128], strides = [1, 1, 1]} : vector<16x16x128xf32> to vector<15x16x128xf32>
    %c2_71 = arith.constant 2 : index
    %c0_72 = arith.constant 0 : index
    %102 = vector.load %arg5[%c2_71, %c0_72] : memref<9x128xf32, #tpu.memory_space<vmem>>, vector<1x128xf32>
    %103 = vector.shape_cast %102 : vector<1x128xf32> to vector<128xf32>
    %104 = vector.shape_cast %103 : vector<128xf32> to vector<1x1x128xf32>
    %105 = vector.broadcast %104 : vector<1x1x128xf32> to vector<15x16x128xf32>
    %106 = arith.mulf %101, %105 : vector<15x16x128xf32>
    %107 = arith.addf %100, %106 : vector<15x16x128xf32>
    %108 = arith.addf %87, %107 : vector<15x16x128xf32>
    %c1_73 = arith.constant 1 : index
    %c0_74 = arith.constant 0 : index
    %c0_75 = arith.constant 0 : index
    %109 = vector.load %arg12[%c1_73, %c0_74, %c0_75] : memref<16x16x128xf32, #tpu.memory_space<vmem>>, vector<15x16x128xf32>
    tpu.vector_store %arg12[%c1_73, %c0_74, %c0_75], %108 {strides = array<i32>} : memref<16x16x128xf32, #tpu.memory_space<vmem>>, vector<15x16x128xf32>,
    %c0_76 = arith.constant 0 : index
    %c0_77 = arith.constant 0 : index
    %c0_78 = arith.constant 0 : index
    %110 = vector.load %arg11[%c0_76, %c0_77, %c0_78] : memref<16x16x128xf32, #tpu.memory_space<vmem>>, vector<15x16x128xf32>
    %111 = vector.extract_strided_slice %12 {offsets = [1, 0, 0], sizes = [15, 16, 128], strides = [1, 1, 1]} : vector<16x16x128xf32> to vector<15x16x128xf32>
    %c6 = arith.constant 6 : index
    %c0_79 = arith.constant 0 : index
    %112 = vector.load %arg4[%c6, %c0_79] : memref<9x128xf32, #tpu.memory_space<vmem>>, vector<1x128xf32>
    %113 = vector.shape_cast %112 : vector<1x128xf32> to vector<128xf32>
    %114 = vector.shape_cast %113 : vector<128xf32> to vector<1x1x128xf32>
    %115 = vector.broadcast %114 : vector<1x1x128xf32> to vector<15x16x128xf32>
    %116 = arith.mulf %111, %115 : vector<15x16x128xf32>
    %117 = vector.extract_strided_slice %13 {offsets = [1, 0, 0], sizes = [15, 16, 128], strides = [1, 1, 1]} : vector<16x16x128xf32> to vector<15x16x128xf32>
    %c7_80 = arith.constant 7 : index
    %c0_81 = arith.constant 0 : index
    %118 = vector.load %arg4[%c7_80, %c0_81] : memref<9x128xf32, #tpu.memory_space<vmem>>, vector<1x128xf32>
    %119 = vector.shape_cast %118 : vector<1x128xf32> to vector<128xf32>
    %120 = vector.shape_cast %119 : vector<128xf32> to vector<1x1x128xf32>
    %121 = vector.broadcast %120 : vector<1x1x128xf32> to vector<15x16x128xf32>
    %122 = arith.mulf %117, %121 : vector<15x16x128xf32>
    %123 = arith.addf %116, %122 : vector<15x16x128xf32>
    %124 = vector.extract_strided_slice %14 {offsets = [1, 0, 0], sizes = [15, 16, 128], strides = [1, 1, 1]} : vector<16x16x128xf32> to vector<15x16x128xf32>
    %c8_82 = arith.constant 8 : index
    %c0_83 = arith.constant 0 : index
    %125 = vector.load %arg4[%c8_82, %c0_83] : memref<9x128xf32, #tpu.memory_space<vmem>>, vector<1x128xf32>
    %126 = vector.shape_cast %125 : vector<1x128xf32> to vector<128xf32>
    %127 = vector.shape_cast %126 : vector<128xf32> to vector<1x1x128xf32>
    %128 = vector.broadcast %127 : vector<1x1x128xf32> to vector<15x16x128xf32>
    %129 = arith.mulf %124, %128 : vector<15x16x128xf32>
    %130 = arith.addf %123, %129 : vector<15x16x128xf32>
    %131 = arith.addf %110, %130 : vector<15x16x128xf32>
    %c0_84 = arith.constant 0 : index
    %c0_85 = arith.constant 0 : index
    %c0_86 = arith.constant 0 : index
    %132 = vector.load %arg11[%c0_84, %c0_85, %c0_86] : memref<16x16x128xf32, #tpu.memory_space<vmem>>, vector<15x16x128xf32>
    tpu.vector_store %arg11[%c0_84, %c0_85, %c0_86], %131 {strides = array<i32>} : memref<16x16x128xf32, #tpu.memory_space<vmem>>, vector<15x16x128xf32>,
    %c0_87 = arith.constant 0 : index
    %c0_88 = arith.constant 0 : index
    %c0_89 = arith.constant 0 : index
    %133 = vector.load %arg12[%c0_87, %c0_88, %c0_89] : memref<16x16x128xf32, #tpu.memory_space<vmem>>, vector<15x16x128xf32>
    %134 = vector.extract_strided_slice %15 {offsets = [1, 0, 0], sizes = [15, 16, 128], strides = [1, 1, 1]} : vector<16x16x128xf32> to vector<15x16x128xf32>
    %c6_90 = arith.constant 6 : index
    %c0_91 = arith.constant 0 : index
    %135 = vector.load %arg5[%c6_90, %c0_91] : memref<9x128xf32, #tpu.memory_space<vmem>>, vector<1x128xf32>
    %136 = vector.shape_cast %135 : vector<1x128xf32> to vector<128xf32>
    %137 = vector.shape_cast %136 : vector<128xf32> to vector<1x1x128xf32>
    %138 = vector.broadcast %137 : vector<1x1x128xf32> to vector<15x16x128xf32>
    %139 = arith.mulf %134, %138 : vector<15x16x128xf32>
    %140 = vector.extract_strided_slice %16 {offsets = [1, 0, 0], sizes = [15, 16, 128], strides = [1, 1, 1]} : vector<16x16x128xf32> to vector<15x16x128xf32>
    %c7_92 = arith.constant 7 : index
    %c0_93 = arith.constant 0 : index
    %141 = vector.load %arg5[%c7_92, %c0_93] : memref<9x128xf32, #tpu.memory_space<vmem>>, vector<1x128xf32>
    %142 = vector.shape_cast %141 : vector<1x128xf32> to vector<128xf32>
    %143 = vector.shape_cast %142 : vector<128xf32> to vector<1x1x128xf32>
    %144 = vector.broadcast %143 : vector<1x1x128xf32> to vector<15x16x128xf32>
    %145 = arith.mulf %140, %144 : vector<15x16x128xf32>
    %146 = arith.addf %139, %145 : vector<15x16x128xf32>
    %147 = vector.extract_strided_slice %17 {offsets = [1, 0, 0], sizes = [15, 16, 128], strides = [1, 1, 1]} : vector<16x16x128xf32> to vector<15x16x128xf32>
    %c8_94 = arith.constant 8 : index
    %c0_95 = arith.constant 0 : index
    %148 = vector.load %arg5[%c8_94, %c0_95] : memref<9x128xf32, #tpu.memory_space<vmem>>, vector<1x128xf32>
    %149 = vector.shape_cast %148 : vector<1x128xf32> to vector<128xf32>
    %150 = vector.shape_cast %149 : vector<128xf32> to vector<1x1x128xf32>
    %151 = vector.broadcast %150 : vector<1x1x128xf32> to vector<15x16x128xf32>
    %152 = arith.mulf %147, %151 : vector<15x16x128xf32>
    %153 = arith.addf %146, %152 : vector<15x16x128xf32>
    %154 = arith.addf %133, %153 : vector<15x16x128xf32>
    %c0_96 = arith.constant 0 : index
    %c0_97 = arith.constant 0 : index
    %c0_98 = arith.constant 0 : index
    %155 = vector.load %arg12[%c0_96, %c0_97, %c0_98] : memref<16x16x128xf32, #tpu.memory_space<vmem>>, vector<15x16x128xf32>
    tpu.vector_store %arg12[%c0_96, %c0_97, %c0_98], %154 {strides = array<i32>} : memref<16x16x128xf32, #tpu.memory_space<vmem>>, vector<15x16x128xf32>,
    %c0_99 = arith.constant 0 : index
    %c0_100 = arith.constant 0 : index
    %c0_101 = arith.constant 0 : index
    %156 = vector.load %arg11[%c0_99, %c0_100, %c0_101] : memref<16x16x128xf32, #tpu.memory_space<vmem>>, vector<16x16x128xf32>
    %157 = arith.mulf %156, %156 : vector<16x16x128xf32>
    %158 = arith.mulf %156, %157 : vector<16x16x128xf32>
    %cst_102 = arith.constant 4.471500e-02 : f32
    %159 = vector.broadcast %cst_102 : f32 to vector<16x16x128xf32>
    %160 = arith.mulf %159, %158 : vector<16x16x128xf32>
    %161 = arith.addf %156, %160 : vector<16x16x128xf32>
    %cst_103 = arith.constant 0.797884583 : f32
    %162 = vector.broadcast %cst_103 : f32 to vector<16x16x128xf32>
    %163 = arith.mulf %162, %161 : vector<16x16x128xf32>
    %164 = math.tanh %163 : vector<16x16x128xf32>
    %cst_104 = arith.constant 1.000000e+00 : f32
    %165 = vector.broadcast %cst_104 : f32 to vector<16x16x128xf32>
    %166 = arith.addf %165, %164 : vector<16x16x128xf32>
    %cst_105 = arith.constant 5.000000e-01 : f32
    %167 = vector.broadcast %cst_105 : f32 to vector<16x16x128xf32>
    %168 = arith.mulf %167, %166 : vector<16x16x128xf32>
    %169 = arith.mulf %156, %168 : vector<16x16x128xf32>
    %c0_106 = arith.constant 0 : index
    %c0_107 = arith.constant 0 : index
    %c0_108 = arith.constant 0 : index
    %170 = vector.load %arg12[%c0_106, %c0_107, %c0_108] : memref<16x16x128xf32, #tpu.memory_space<vmem>>, vector<16x16x128xf32>
    %171 = arith.mulf %169, %170 : vector<16x16x128xf32>
    %172 = arith.truncf %171 : vector<16x16x128xf32> to vector<16x16x128xbf16>
    %c0_109 = arith.constant 0 : index
    %c0_110 = arith.constant 0 : index
    %c0_111 = arith.constant 0 : index
    %c0_112 = arith.constant 0 : index
    %173 = vector.load %arg8[%c0_109, %c0_110, %c0_111, %c0_112] : memref<1x16x16x128xbf16, #tpu.memory_space<vmem>>, vector<1x16x16x128xbf16>
    %174 = vector.shape_cast %173 : vector<1x16x16x128xbf16> to vector<16x16x128xbf16>
    %175 = vector.shape_cast %172 : vector<16x16x128xbf16> to vector<1x16x16x128xbf16>
    tpu.vector_store %arg8[%c0_109, %c0_110, %c0_111, %c0_112], %175 {strides = array<i32>} : memref<1x16x16x128xbf16, #tpu.memory_space<vmem>>, vector<1x16x16x128xbf16>,
    return
  }
  func.func @transform_0(%arg0: i32, %arg1: i32) -> (i32, i32, i32, i32) {
    %c0_i32 = arith.constant 0 : i32
    %c0_i32_0 = arith.constant 0 : i32
    %c0_i32_1 = arith.constant 0 : i32
    return %arg0, %c0_i32, %c0_i32_0, %arg1 : i32, i32, i32, i32
  }
  func.func @transform_1(%arg0: i32, %arg1: i32) -> (i32, i32, i32, i32) {
    %c1_i32 = arith.constant 1 : i32
    %0 = arith.addi %arg1, %c1_i32 : i32
    %c0_i32 = arith.constant 0 : i32
    %c0_i32_0 = arith.constant 0 : i32
    %c0_i32_1 = arith.constant 0 : i32
    return %arg0, %c0_i32, %c0_i32_0, %0 : i32, i32, i32, i32
  }
  func.func @transform_2(%arg0: i32, %arg1: i32) -> (i32, i32) {
    %c0_i32 = arith.constant 0 : i32
    %c0_i32_0 = arith.constant 0 : i32
    return %c0_i32, %arg1 : i32, i32
  }
  func.func @transform_3(%arg0: i32, %arg1: i32) -> (i32, i32) {
    %c0_i32 = arith.constant 0 : i32
    %c0_i32_0 = arith.constant 0 : i32
    return %c0_i32, %arg1 : i32, i32
  }
  func.func @transform_4(%arg0: i32, %arg1: i32) -> (i32, i32) {
    %c0_i32 = arith.constant 0 : i32
    %c0_i32_0 = arith.constant 0 : i32
    return %c0_i32, %arg1 : i32, i32
  }
  func.func @transform_5(%arg0: i32, %arg1: i32) -> (i32, i32) {
    %c0_i32 = arith.constant 0 : i32
    %c0_i32_0 = arith.constant 0 : i32
    return %c0_i32, %arg1 : i32, i32
  }
  func.func @transform_6(%arg0: i32, %arg1: i32) -> (i32, i32, i32, i32) {
    %c0_i32 = arith.constant 0 : i32
    %c0_i32_0 = arith.constant 0 : i32
    %c0_i32_1 = arith.constant 0 : i32
    return %arg0, %c0_i32, %c0_i32_0, %arg1 : i32, i32, i32, i32
  }
}

module attributes {stable_mosaic.version = 11 : i64} {
  func.func @_matmul_bias_kernel_nk1(%arg0: i32, %arg1: i32, %arg2: memref<512x128xbf16, #tpu.memory_space<vmem>>, %arg3: memref<128x16xbf16, #tpu.memory_space<vmem>>, %arg4: memref<1x16xf32, #tpu.memory_space<vmem>>, %arg5: memref<512x16xf32, #tpu.memory_space<vmem>>) attributes {dimension_semantics = [#tpu.dimension_semantics<parallel>, #tpu.dimension_semantics<parallel>], iteration_bounds = array<i64: 1, 1>, scalar_prefetch = 0 : i64, scratch_operands = 0 : i64, tpu.core_type = #tpu.core_type<tc>, window_params = [{transform_indices = @transform_0, window_bounds = array<i64: 512, 128>}, {transform_indices = @transform_1, window_bounds = array<i64: 128, 16>}, {transform_indices = @transform_2, window_bounds = array<i64: 1, 16>}, {transform_indices = @transform_3, window_bounds = array<i64: 512, 16>}]} {
    %c0 = arith.constant 0 : index
    %c0_0 = arith.constant 0 : index
    %0 = vector.load %arg2[%c0, %c0_0] : memref<512x128xbf16, #tpu.memory_space<vmem>>, vector<512x128xbf16>
    %c0_1 = arith.constant 0 : index
    %c0_2 = arith.constant 0 : index
    %1 = vector.load %arg3[%c0_1, %c0_2] : memref<128x16xbf16, #tpu.memory_space<vmem>>, vector<128x16xbf16>
    %cst = arith.constant dense<0.000000e+00> : vector<512x16xf32>
    %2 = tpu.matmul %0, %1, %cst {dimension_numbers = #tpu.dot_dimension_numbers<[1], [0], [0], [1], [0, 0, 1, 1], [], []>} : vector<512x128xbf16>, vector<128x16xbf16>, vector<512x16xf32> -> vector<512x16xf32>
    %c0_3 = arith.constant 0 : index
    %c0_4 = arith.constant 0 : index
    %3 = vector.load %arg4[%c0_3, %c0_4] : memref<1x16xf32, #tpu.memory_space<vmem>>, vector<1x16xf32>
    %4 = vector.broadcast %3 : vector<1x16xf32> to vector<512x16xf32>
    %5 = arith.addf %2, %4 : vector<512x16xf32>
    %c0_5 = arith.constant 0 : index
    %c0_6 = arith.constant 0 : index
    %6 = vector.load %arg5[%c0_5, %c0_6] : memref<512x16xf32, #tpu.memory_space<vmem>>, vector<512x16xf32>
    tpu.vector_store %arg5[%c0_5, %c0_6], %5 {strides = array<i32>} : memref<512x16xf32, #tpu.memory_space<vmem>>, vector<512x16xf32>,
    return
  }
  func.func @transform_0(%arg0: i32, %arg1: i32) -> (i32, i32) {
    %c0_i32 = arith.constant 0 : i32
    %c0_i32_0 = arith.constant 0 : i32
    return %arg0, %c0_i32 : i32, i32
  }
  func.func @transform_1(%arg0: i32, %arg1: i32) -> (i32, i32) {
    %c0_i32 = arith.constant 0 : i32
    %c0_i32_0 = arith.constant 0 : i32
    return %c0_i32, %arg1 : i32, i32
  }
  func.func @transform_2(%arg0: i32, %arg1: i32) -> (i32, i32) {
    %c0_i32 = arith.constant 0 : i32
    %c0_i32_0 = arith.constant 0 : i32
    return %c0_i32, %arg1 : i32, i32
  }
  func.func @transform_3(%arg0: i32, %arg1: i32) -> (i32, i32) {
    %c0_i32 = arith.constant 0 : i32
    return %arg0, %arg1 : i32, i32
  }
}

</mosaic_0001>

<bundles_post_ra>
// kernel: feed_forward.3
= control target key start
LH: loop header
LB: loop body
LE: loop exit
PB: predicated region body
PF: predicated region fallthrough
CT: control target
= control target key end

     0   :  { %8 = vsyncpa [#allocation3], 0  ;;  %s1646_s0 = inlined_call_operand.hbm [shape: f32[512,16], index: 0, kind: input, shape index: {}]   ;;  %s1647_s1 = inlined_call_operand.hbm [shape: bf16[16,256], index: 1, kind: input, shape index: {}]   ;;  %s1648_s2 = inlined_call_operand.hbm [shape: f32[1,256], index: 2, kind: input, shape index: {}]   ;;  %s1649_s3 = inlined_call_operand.hbm [shape: bf16[512,256], index: 3, kind: output, shape index: {}]  }
   0x1   :  { %9 = vsyncpa [#allocation6], 0 }
   0x2   :  { %10 = vsyncpa [#allocation4], 0  ;;  %s1359_s12 = smov [#allocation5]   ;;  %s1360_s14 = smov [#allocation2]  }
   0x3   :  { %s28_s13 = sshll.u32 %s1359_s12, 4  ;;  %s16_s15 = sshll.u32 %s1360_s14, 4  ;;  %s29_s13 = int_to_ptr.vmem [resolvable:$true] %s28_s13  ;;  %s1386_s15 = int_to_ptr.vmem [resolvable:$true] %s16_s15 }
   0x4   :  { %s1265_s18 = scalar_lea.hbm %s1647_s1, 256 }
   0x5   :  { %p1266_p0 = scmp.ne.s32.totalorder %s1647_s1, %s1265_s18  ;;  %p1269_p1 = scmp.lt.u32.totalorder %s1265_s18, %s1647_s1 }
   0x7   :  { %p1271_p2 = pnand %p1269_p1, %p1266_p0 }
   0x9   :  { %1274 = shalt.err (!%p1271_p2)
}
   0xa   :  { %s1275_s23 = scalar_lea.vmem %s29_s13, 256  ;;  %p1280_p4 = scmp.lt.s32.totalorder %s29_s13, %s29_s13 }
   0xb   :  { %p1276_p3 = scmp.ne.s32.totalorder %s29_s13, %s1275_s23  ;;  %p1281_p5 = scmp.lt.s32.totalorder %s1275_s23, %s1275_s23 }
   0xd   :  { %p1282_p6 = por %p1281_p5, %p1280_p4 }
   0xf   :  { %p1283_p7 = pnand %p1282_p6, %p1276_p3 }
  0x11   :  { %1286 = shalt.err (!%p1283_p7)
}
  0x12   :  { %s1361_s24 = smov 128   ;;  %s1362_s25 = smov 8  }
  0x13   :  { %34 = dma.hbm_to_vmem [thread:$0]  %s1647_s1, 256, %s29_s13, [#allocation6], %s1361_s24, %s1361_s24, %s1362_s25  }
  0x14   :  { %s1287_s30 = scalar_lea.hbm %s1646_s0, 8192 }
  0x15   :  { %p1288_p8 = scmp.ne.s32.totalorder %s1646_s0, %s1287_s30  ;;  %p1291_p9 = scmp.lt.u32.totalorder %s1287_s30, %s1646_s0 }
  0x17   :  { %p1293_p10 = pnand %p1291_p9, %p1288_p8 }
  0x19   :  { %1296 = shalt.err (!%p1293_p10)
}
  0x1a   :  { %s1297_s8 = scalar_lea.vmem %s1386_s15, 8192  ;;  %p1302_p12 = scmp.lt.s32.totalorder %s1386_s15, %s1386_s15 }
  0x1b   :  { %p1298_p11 = scmp.ne.s32.totalorder %s1386_s15, %s1297_s8  ;;  %p1303_p13 = scmp.lt.s32.totalorder %s1297_s8, %s1297_s8 }
  0x1d   :  { %p1304_p0 = por %p1303_p13, %p1302_p12 }
  0x1f   :  { %p1305_p1 = pnand %p1304_p0, %p1298_p11 }
  0x21   :  { %1308 = shalt.err (!%p1305_p1)
}
  0x22   :  { %22 = dma.hbm_to_vmem [thread:$0]  %s1646_s0, 8192, %s1386_s15, [#allocation3], %s1361_s24, %s1361_s24, %s1362_s25  }
  0x23   :  { %s1363_s10 = smov [#allocation7]   ;;  %s1309_s14 = scalar_lea.hbm %s1648_s2, 32 }
  0x24   :  { %s41_s11 = sshll.u32 %s1363_s10, 4  ;;  %p1310_p2 = scmp.ne.s32.totalorder %s1648_s2, %s1309_s14  ;;  %s42_s11 = int_to_ptr.vmem [resolvable:$true] %s41_s11 }
  0x25   :  { %p1313_p3 = scmp.lt.u32.totalorder %s1309_s14, %s1648_s2 }
  0x27   :  { %p1315_p4 = pnand %p1313_p3, %p1310_p2 }
  0x29   :  { %1318 = shalt.err (!%p1315_p4)
}
  0x2a   :  { %s1319_s20 = scalar_lea.vmem %s42_s11, 32  ;;  %p1324_p6 = scmp.lt.s32.totalorder %s42_s11, %s42_s11 }
  0x2b   :  { %p1320_p5 = scmp.ne.s32.totalorder %s42_s11, %s1319_s20  ;;  %p1325_p7 = scmp.lt.s32.totalorder %s1319_s20, %s1319_s20 }
  0x2d   :  { %p1326_p8 = por %p1325_p7, %p1324_p6 }
  0x2f   :  { %p1327_p9 = pnand %p1326_p8, %p1320_p5 }
  0x31   :  { %1330 = shalt.err (!%p1327_p9)
}
  0x32   :  { %44 = dma.hbm_to_vmem [thread:$0]  %s1648_s2, 32, %s42_s11, [#allocation6]  }
  0x33   :  { %1353 = dma.done.wait [#allocation3], 8192  }
  0x34   :  { %1354 = vsyncadd [#allocation3], 4294959104 }
  0x35   :  { %1355 = dma.done.wait [#allocation6], 288  }
  0x36   :  { %1356 = vsyncadd [#allocation6], 4294967008  ;;  %v1364_v0 = vmov 0   ;;  %v1262_v1 = vld [vmem:[#allocation5 + $0x4] ss:$8 sps:$4 sm:$0xff]   ;;  %vm175_vm0 = vcmask 130048  }
  0x37   :  { %304 = vmatprep.mubr.bf16.mxu0 %v1364_v0  ;;  %464 = vmatprep.mubr.bf16.mxu1 %v1364_v0  ;;  %v1264_v2 = vld [vmem:[#allocation5] ss:$8 sps:$4 sm:$0xff]   ;;  %v57_v9 = vld [vmem:[#allocation2 + $0x10] sm:$0xff]  ;;  %v58_v10 = vld [vmem:[#allocation2 + $0x18] sm:$0xff]  ;;  %s1365_s2 = smov [#allocation8]  }
  0x38   :  { %v55_v3 = vld [vmem:[#allocation2] sm:$0xff]  ;;  %v56_v4 = vld [vmem:[#allocation2 + $0x8] sm:$0xff]  ;;  %272 = vmatprep.subr.bf16.mxu0 %v1262_v1  ;;  %1253 = vmatprep.subr.bf16.mxu1 %v1262_v1  ;;  %v89_v11 = vld [vmem:[#allocation2 + $0x110] sm:$0xff]  ;;  %v120_v13 = vpack.c.bf16 %v58_v10, %v57_v9  ;;  %s1078_s21 = sshll.u32 %s1365_s2, 4  ;;  %s1079_s21 = int_to_ptr.vmem [resolvable:$true] %s1078_s21 }
  0x39   :  { %v119_v5 = vpack.c.bf16 %v56_v4, %v55_v3  ;;  %v87_v6 = vld [vmem:[#allocation2 + $0x100] sm:$0xff]  ;;  %v88_v7 = vld [vmem:[#allocation2 + $0x108] sm:$0xff]  ;;  %273 = vmatpush1.bf16.msra.mxu0 %v1264_v2  ;;  %1254 = vmatpush1.bf16.msra.mxu1 %v1264_v2  ;;  %v90_v12 = vld [vmem:[#allocation2 + $0x118] sm:$0xff]  ;;  %s1331_s22 = scalar_lea.vmem %s1079_s21, 8192  ;;  %p1336_p11 = scmp.lt.s32.totalorder %s1079_s21, %s1079_s21 }
  0x3a   :  { %v135_v8 = vpack.c.bf16 %v88_v7, %v87_v6  ;;  %v136_v14 = vpack.c.bf16 %v90_v12, %v89_v11  ;;  %v59_v15 = vld [vmem:[#allocation2 + $0x20] sm:$0xff]  ;;  %v60_v16 = vld [vmem:[#allocation2 + $0x28] sm:$0xff]  ;;  %v61_v21 = vld [vmem:[#allocation2 + $0x30] sm:$0xff]  ;;  %p1332_p10 = scmp.ne.s32.totalorder %s1079_s21, %s1331_s22  ;;  %p1337_p12 = scmp.lt.s32.totalorder %s1331_s22, %s1331_s22 }
  0x3b   :  { %v91_v17 = vld [vmem:[#allocation2 + $0x120] sm:$0xff]  ;;  %v92_v18 = vld [vmem:[#allocation2 + $0x128] sm:$0xff]  ;;  %v121_v19 = vpack.c.bf16 %v60_v16, %v59_v15  ;;  %v62_v22 = vld [vmem:[#allocation2 + $0x38] sm:$0xff] }
  0x3c   :  { %1093 = vmatmul.mubr.msk.bf16.vlgmr.msra.gmra.mrb[0].mxu0 %vm175_vm0, %v119_v5  ;;  %1109 = vmatmul.mubr.msk.bf16.vlgmr.msra.gmra.mrb[0].mxu1 %vm175_vm0, %v135_v8  ;;  %v137_v20 = vpack.c.bf16 %v92_v18, %v91_v17  ;;  %v93_v23 = vld [vmem:[#allocation2 + $0x130] sm:$0xff]  ;;  %v94_v24 = vld [vmem:[#allocation2 + $0x138] sm:$0xff]  ;;  %v122_v25 = vpack.c.bf16 %v62_v22, %v61_v21  ;;  %v63_v27 = vld [vmem:[#allocation2 + $0x40] sm:$0xff]  ;;  %p1338_p13 = por %p1337_p12, %p1336_p11 }
  0x3d   :  { %314 = vmatprep.mubr.bf16.mxu0 %v1364_v0  ;;  %474 = vmatprep.mubr.bf16.mxu1 %v1364_v0  ;;  %v138_v26 = vpack.c.bf16 %v94_v24, %v93_v23  ;;  %v64_v28 = vld [vmem:[#allocation2 + $0x48] sm:$0xff]  ;;  %v95_v29 = vld [vmem:[#allocation2 + $0x140] sm:$0xff]  ;;  %v65_v33 = vld [vmem:[#allocation2 + $0x50] sm:$0xff] }
  0x3e   :  { %v96_v30 = vld [vmem:[#allocation2 + $0x148] sm:$0xff]  ;;  %v123_v31 = vpack.c.bf16 %v64_v28, %v63_v27  ;;  %v66_v34 = vld [vmem:[#allocation2 + $0x58] sm:$0xff]  ;;  %v97_v35 = vld [vmem:[#allocation2 + $0x150] sm:$0xff]  ;;  %p1339_p0 = pnand %p1338_p13, %p1332_p10 }
  0x3f   :  { %v139_v32 = vpack.c.bf16 %v96_v30, %v95_v29  ;;  %v98_v36 = vld [vmem:[#allocation2 + $0x158] sm:$0xff]  ;;  %v124_v37 = vpack.c.bf16 %v66_v34, %v65_v33  ;;  %v67_v39 = vld [vmem:[#allocation2 + $0x60] sm:$0xff]  ;;  %v68_v40 = vld [vmem:[#allocation2 + $0x68] sm:$0xff] }
  0x40   :  { %v140_v38 = vpack.c.bf16 %v98_v36, %v97_v35  ;;  %v99_v41 = vld [vmem:[#allocation2 + $0x160] sm:$0xff]  ;;  %v100_v42 = vld [vmem:[#allocation2 + $0x168] sm:$0xff]  ;;  %v125_v43 = vpack.c.bf16 %v68_v40, %v67_v39  ;;  %v69_v45 = vld [vmem:[#allocation2 + $0x70] sm:$0xff]  ;;  %v155_v36 = vlaneseq }
  0x41   :  { %v141_v44 = vpack.c.bf16 %v100_v42, %v99_v41  ;;  %v70_v46 = vld [vmem:[#allocation2 + $0x78] sm:$0xff]  ;;  %v101_v47 = vld [vmem:[#allocation2 + $0x170] sm:$0xff]  ;;  %v71_v51 = vld [vmem:[#allocation2 + $0x80] sm:$0xff] }
  0x42   :  { %v102_v48 = vld [vmem:[#allocation2 + $0x178] sm:$0xff]  ;;  %v126_v49 = vpack.c.bf16 %v70_v46, %v69_v45  ;;  %v72_v52 = vld [vmem:[#allocation2 + $0x88] sm:$0xff]  ;;  %v103_v53 = vld [vmem:[#allocation2 + $0x180] sm:$0xff] }
  0x43   :  { %v142_v50 = vpack.c.bf16 %v102_v48, %v101_v47  ;;  %v104_v54 = vld [vmem:[#allocation2 + $0x188] sm:$0xff]  ;;  %v127_v55 = vpack.c.bf16 %v72_v52, %v71_v51  ;;  %v73_v57 = vld [vmem:[#allocation2 + $0x90] sm:$0xff]  ;;  %v74_v58 = vld [vmem:[#allocation2 + $0x98] sm:$0xff] }
  0x44   :  { %1094 = vmatmul.mubr.msk.bf16.gmra.mrb[4].mxu0 %vm175_vm0, %v120_v13  ;;  %1110 = vmatmul.mubr.msk.bf16.gmra.mrb[4].mxu1 %vm175_vm0, %v136_v14  ;;  %v143_v56 = vpack.c.bf16 %v104_v54, %v103_v53  ;;  %v105_v59 = vld [vmem:[#allocation2 + $0x190] sm:$0xff]  ;;  %v106_v60 = vld [vmem:[#allocation2 + $0x198] sm:$0xff]  ;;  %v128_v61 = vpack.c.bf16 %v74_v58, %v73_v57  ;;  %v75_v63 = vld [vmem:[#allocation2 + $0xa0] sm:$0xff] }
  0x45   :  { %324 = vmatprep.mubr.bf16.mxu0 %v1364_v0  ;;  %484 = vmatprep.mubr.bf16.mxu1 %v1364_v0  ;;  %v144_v62 = vpack.c.bf16 %v106_v60, %v105_v59  ;;  %v76_v1 = vld [vmem:[#allocation2 + $0xa8] sm:$0xff]  ;;  %v107_v2 = vld [vmem:[#allocation2 + $0x1a0] sm:$0xff]  ;;  %v77_v6 = vld [vmem:[#allocation2 + $0xb0] sm:$0xff] }
  0x46   :  { %v108_v3 = vld [vmem:[#allocation2 + $0x1a8] sm:$0xff]  ;;  %v129_v4 = vpack.c.bf16 %v76_v1, %v75_v63  ;;  %v78_v7 = vld [vmem:[#allocation2 + $0xb8] sm:$0xff]  ;;  %v109_v8 = vld [vmem:[#allocation2 + $0x1b0] sm:$0xff] }
  0x47   :  { %v145_v5 = vpack.c.bf16 %v108_v3, %v107_v2  ;;  %v110_v9 = vld [vmem:[#allocation2 + $0x1b8] sm:$0xff]  ;;  %v130_v10 = vpack.c.bf16 %v78_v7, %v77_v6  ;;  %v79_v12 = vld [vmem:[#allocation2 + $0xc0] sm:$0xff]  ;;  %v80_v13 = vld [vmem:[#allocation2 + $0xc8] sm:$0xff] }
  0x48   :  { %v146_v11 = vpack.c.bf16 %v110_v9, %v109_v8  ;;  %v111_v14 = vld [vmem:[#allocation2 + $0x1c0] sm:$0xff]  ;;  %v112_v15 = vld [vmem:[#allocation2 + $0x1c8] sm:$0xff]  ;;  %v131_v16 = vpack.c.bf16 %v80_v13, %v79_v12  ;;  %v81_v18 = vld [vmem:[#allocation2 + $0xd0] sm:$0xff] }
  0x49   :  { %v147_v17 = vpack.c.bf16 %v112_v15, %v111_v14  ;;  %v114_v21 = vld [vmem:[#allocation2 + $0x1d8] sm:$0xff]  ;;  %v83_v24 = vld [vmem:[#allocation2 + $0xe0] sm:$0xff]  ;;  %v116_v27 = vld [vmem:[#allocation2 + $0x1e8] sm:$0xff] }
  0x4a   :  { %v85_v30 = vld [vmem:[#allocation2 + $0xf0] sm:$0xff]  ;;  %v118_v33 = vld [vmem:[#allocation2 + $0x1f8] sm:$0xff] }
  0x4b   :  { %v153_v39 = vld [vmem:[#allocation7] sm:$0x3] }
  0x4c   :  { %1095 = vmatmul.mubr.msk.bf16.gmra.mrb[8].mxu0 %vm175_vm0, %v121_v19  ;;  %1111 = vmatmul.mubr.msk.bf16.gmra.mrb[8].mxu1 %vm175_vm0, %v137_v20  ;;  %v82_v19 = vld [vmem:[#allocation2 + $0xd8] sm:$0xff]  ;;  %v113_v20 = vld [vmem:[#allocation2 + $0x1d0] sm:$0xff] }
  0x4d   :  { %334 = vmatprep.mubr.bf16.mxu0 %v1364_v0  ;;  %494 = vmatprep.mubr.bf16.mxu1 %v1364_v0  ;;  %v132_v22 = vpack.c.bf16 %v82_v19, %v81_v18  ;;  %v148_v23 = vpack.c.bf16 %v114_v21, %v113_v20 }
  0x54   :  { %1096 = vmatmul.mubr.msk.bf16.gmra.mrb[12].mxu0 %vm175_vm0, %v122_v25  ;;  %1112 = vmatmul.mubr.msk.bf16.gmra.mrb[12].mxu1 %vm175_vm0, %v138_v26  ;;  %v84_v25 = vld [vmem:[#allocation2 + $0xe8] sm:$0xff]  ;;  %v115_v26 = vld [vmem:[#allocation2 + $0x1e0] sm:$0xff] }
  0x55   :  { %344 = vmatprep.mubr.bf16.mxu0 %v1364_v0  ;;  %504 = vmatprep.mubr.bf16.mxu1 %v1364_v0  ;;  %v133_v28 = vpack.c.bf16 %v84_v25, %v83_v24  ;;  %v149_v29 = vpack.c.bf16 %v116_v27, %v115_v26 }
  0x5c   :  { %1097 = vmatmul.mubr.msk.bf16.gmra.mrb[16].mxu0 %vm175_vm0, %v123_v31  ;;  %1113 = vmatmul.mubr.msk.bf16.gmra.mrb[16].mxu1 %vm175_vm0, %v139_v32  ;;  %v86_v31 = vld [vmem:[#allocation2 + $0xf8] sm:$0xff]  ;;  %v117_v32 = vld [vmem:[#allocation2 + $0x1f0] sm:$0xff] }
  0x5d   :  { %354 = vmatprep.mubr.bf16.mxu0 %v1364_v0  ;;  %514 = vmatprep.mubr.bf16.mxu1 %v1364_v0  ;;  %v134_v34 = vpack.c.bf16 %v86_v31, %v85_v30  ;;  %v150_v35 = vpack.c.bf16 %v118_v33, %v117_v32 }
  0x64   :  { %1098 = vmatmul.mubr.msk.bf16.gmra.mrb[20].mxu0 %vm175_vm0, %v124_v37  ;;  %1114 = vmatmul.mubr.msk.bf16.gmra.mrb[20].mxu1 %vm175_vm0, %v140_v38  ;;  %v156_v37 = vshrl.u32 %v155_v36, 7 }
  0x65   :  { %364 = vmatprep.mubr.bf16.mxu0 %v1364_v0  ;;  %524 = vmatprep.mubr.bf16.mxu1 %v1364_v0 }
  0x66   :  { %v157_v38 = vsub.s32 0, %v156_v37  ;;  %v161_v40 = vsub.s32 1, %v156_v37 }
  0x68   :  { %v1499_v41 = vrot.slane %v153_v39, %v157_v38  ;;  %v1501_v42 = vrot.slane %v153_v39, %v161_v40 }
  0x6c   :  { %1099 = vmatmul.mubr.msk.bf16.gmra.mrb[24].mxu0 %vm175_vm0, %v125_v43  ;;  %1115 = vmatmul.mubr.msk.bf16.gmra.mrb[24].mxu1 %vm175_vm0, %v141_v44 }
  0x6d   :  { %374 = vmatprep.mubr.bf16.mxu0 %v1364_v0  ;;  %534 = vmatprep.mubr.bf16.mxu1 %v1364_v0 }
  0x74   :  { %1100 = vmatmul.mubr.msk.bf16.gmra.mrb[28].mxu0 %vm175_vm0, %v126_v49  ;;  %1116 = vmatmul.mubr.msk.bf16.gmra.mrb[28].mxu1 %vm175_vm0, %v142_v50 }
  0x75   :  { %384 = vmatprep.mubr.bf16.mxu0 %v1364_v0  ;;  %544 = vmatprep.mubr.bf16.mxu1 %v1364_v0 }
  0x7c   :  { %1101 = vmatmul.mubr.msk.bf16.gmra.mrb[32].mxu0 %vm175_vm0, %v127_v55  ;;  %1117 = vmatmul.mubr.msk.bf16.gmra.mrb[32].mxu1 %vm175_vm0, %v143_v56 }
  0x7d   :  { %394 = vmatprep.mubr.bf16.mxu0 %v1364_v0  ;;  %554 = vmatprep.mubr.bf16.mxu1 %v1364_v0 }
  0x84   :  { %1102 = vmatmul.mubr.msk.bf16.gmra.mrb[36].mxu0 %vm175_vm0, %v128_v61  ;;  %1118 = vmatmul.mubr.msk.bf16.gmra.mrb[36].mxu1 %vm175_vm0, %v144_v62 }
  0x85   :  { %404 = vmatprep.mubr.bf16.mxu0 %v1364_v0  ;;  %564 = vmatprep.mubr.bf16.mxu1 %v1364_v0 }
  0x8c   :  { %1103 = vmatmul.mubr.msk.bf16.gmra.mrb[40].mxu0 %vm175_vm0, %v129_v4  ;;  %1119 = vmatmul.mubr.msk.bf16.gmra.mrb[40].mxu1 %vm175_vm0, %v145_v5 }
  0x8d   :  { %414 = vmatprep.mubr.bf16.mxu0 %v1364_v0  ;;  %574 = vmatprep.mubr.bf16.mxu1 %v1364_v0 }
  0x94   :  { %1104 = vmatmul.mubr.msk.bf16.gmra.mrb[44].mxu0 %vm175_vm0, %v130_v10  ;;  %1120 = vmatmul.mubr.msk.bf16.gmra.mrb[44].mxu1 %vm175_vm0, %v146_v11 }
  0x95   :  { %424 = vmatprep.mubr.bf16.mxu0 %v1364_v0  ;;  %584 = vmatprep.mubr.bf16.mxu1 %v1364_v0 }
  0x9c   :  { %1105 = vmatmul.mubr.msk.bf16.gmra.mrb[48].mxu0 %vm175_vm0, %v131_v16  ;;  %1121 = vmatmul.mubr.msk.bf16.gmra.mrb[48].mxu1 %vm175_vm0, %v147_v17 }
  0x9d   :  { %434 = vmatprep.mubr.bf16.mxu0 %v1364_v0  ;;  %594 = vmatprep.mubr.bf16.mxu1 %v1364_v0 }
  0xa4   :  { %1106 = vmatmul.mubr.msk.bf16.gmra.mrb[52].mxu0 %vm175_vm0, %v132_v22  ;;  %1122 = vmatmul.mubr.msk.bf16.gmra.mrb[52].mxu1 %vm175_vm0, %v148_v23 }
  0xa5   :  { %444 = vmatprep.mubr.bf16.mxu0 %v1364_v0  ;;  %604 = vmatprep.mubr.bf16.mxu1 %v1364_v0 }
  0xac   :  { %1107 = vmatmul.mubr.msk.bf16.gmra.mrb[56].mxu0 %vm175_vm0, %v133_v28  ;;  %1123 = vmatmul.mubr.msk.bf16.gmra.mrb[56].mxu1 %vm175_vm0, %v149_v29 }
  0xad   :  { %454 = vmatprep.mubr.bf16.mxu0 %v1364_v0  ;;  %614 = vmatprep.mubr.bf16.mxu1 %v1364_v0 }
  0xb4   :  { %1108 = vmatmul.mubr.msk.bf16.gmra.mrb[60].mxu0 %vm175_vm0, %v134_v34  ;;  %1124 = vmatmul.mubr.msk.bf16.gmra.mrb[60].mxu1 %vm175_vm0, %v150_v35 }
 0x10f   :  { %v306_v43 = vpop.f32.mrb[0].mxu0  ;;  %v466_v0 = vpop.f32.mrb[0].mxu1 }
 0x110   :  { %v307_v44 = vadd.f32 %v306_v43, %v1499_v41  ;;  %v467_v45 = vadd.f32 %v466_v0, %v1499_v41  ;;  %v308_v46 = vpop.f32.mrb[1].mxu0  ;;  %v468_v47 = vpop.f32.mrb[1].mxu1 }
 0x111   :  { %v309_v48 = vadd.f32 %v308_v46, %v1501_v42  ;;  %v469_v49 = vadd.f32 %v468_v47, %v1501_v42  ;;  %v310_v50 = vpop.f32.mrb[2].mxu0  ;;  %v470_v51 = vpop.f32.mrb[2].mxu1 }
 0x112   :  { %v311_v52 = vadd.f32 %v310_v50, %v1499_v41  ;;  %v471_v53 = vadd.f32 %v470_v51, %v1499_v41  ;;  %v312_v54 = vpop.f32.mrb[3].mxu0  ;;  %v472_v55 = vpop.f32.mrb[3].mxu1 }
 0x113   :  { %v1189_v56 = vpack.c.bf16 %v309_v48, %v307_v44  ;;  %v1221_v57 = vpack.c.bf16 %v469_v49, %v467_v45  ;;  %v313_v58 = vadd.f32 %v312_v54, %v1501_v42  ;;  %v473_v59 = vadd.f32 %v472_v55, %v1501_v42 }
 0x115   :  { %1009 = vst [vmem:[#allocation8] sm:$0xff] %v1189_v56  ;;  %1041 = vst [vmem:[#allocation8 + $0x100] sm:$0xff] %v1221_v57  ;;  %v1190_v60 = vpack.c.bf16 %v313_v58, %v311_v52  ;;  %v1222_v61 = vpack.c.bf16 %v473_v59, %v471_v53 }
 0x117   :  { %1010 = vst [vmem:[#allocation8 + $0x8] sm:$0xff] %v1190_v60  ;;  %1042 = vst [vmem:[#allocation8 + $0x108] sm:$0xff] %v1222_v61  ;;  %v316_v62 = vpop.f32.mrb[4].mxu0  ;;  %v476_v63 = vpop.f32.mrb[4].mxu1 }
 0x118   :  { %v317_v1 = vadd.f32 %v316_v62, %v1499_v41  ;;  %v477_v2 = vadd.f32 %v476_v63, %v1499_v41  ;;  %v318_v3 = vpop.f32.mrb[5].mxu0  ;;  %v478_v4 = vpop.f32.mrb[5].mxu1 }
 0x119   :  { %v319_v5 = vadd.f32 %v318_v3, %v1501_v42  ;;  %v479_v6 = vadd.f32 %v478_v4, %v1501_v42  ;;  %v320_v7 = vpop.f32.mrb[6].mxu0  ;;  %v480_v8 = vpop.f32.mrb[6].mxu1 }
 0x11a   :  { %v321_v9 = vadd.f32 %v320_v7, %v1499_v41  ;;  %v481_v10 = vadd.f32 %v480_v8, %v1499_v41  ;;  %v322_v11 = vpop.f32.mrb[7].mxu0  ;;  %v482_v12 = vpop.f32.mrb[7].mxu1 }
 0x11b   :  { %v1191_v13 = vpack.c.bf16 %v319_v5, %v317_v1  ;;  %v1223_v14 = vpack.c.bf16 %v479_v6, %v477_v2  ;;  %v323_v15 = vadd.f32 %v322_v11, %v1501_v42  ;;  %v483_v16 = vadd.f32 %v482_v12, %v1501_v42 }
 0x11d   :  { %1011 = vst [vmem:[#allocation8 + $0x10] sm:$0xff] %v1191_v13  ;;  %1043 = vst [vmem:[#allocation8 + $0x110] sm:$0xff] %v1223_v14  ;;  %v1192_v17 = vpack.c.bf16 %v323_v15, %v321_v9  ;;  %v1224_v18 = vpack.c.bf16 %v483_v16, %v481_v10 }
 0x11f   :  { %1012 = vst [vmem:[#allocation8 + $0x18] sm:$0xff] %v1192_v17  ;;  %1044 = vst [vmem:[#allocation8 + $0x118] sm:$0xff] %v1224_v18  ;;  %v326_v19 = vpop.f32.mrb[8].mxu0  ;;  %v486_v20 = vpop.f32.mrb[8].mxu1 }
 0x120   :  { %v327_v21 = vadd.f32 %v326_v19, %v1499_v41  ;;  %v487_v22 = vadd.f32 %v486_v20, %v1499_v41  ;;  %v328_v23 = vpop.f32.mrb[9].mxu0  ;;  %v488_v24 = vpop.f32.mrb[9].mxu1 }
 0x121   :  { %v329_v25 = vadd.f32 %v328_v23, %v1501_v42  ;;  %v489_v26 = vadd.f32 %v488_v24, %v1501_v42  ;;  %v330_v27 = vpop.f32.mrb[10].mxu0  ;;  %v490_v28 = vpop.f32.mrb[10].mxu1 }
 0x122   :  { %v331_v29 = vadd.f32 %v330_v27, %v1499_v41  ;;  %v491_v30 = vadd.f32 %v490_v28, %v1499_v41  ;;  %v332_v31 = vpop.f32.mrb[11].mxu0  ;;  %v492_v32 = vpop.f32.mrb[11].mxu1 }
 0x123   :  { %v1193_v33 = vpack.c.bf16 %v329_v25, %v327_v21  ;;  %v1225_v34 = vpack.c.bf16 %v489_v26, %v487_v22  ;;  %v333_v35 = vadd.f32 %v332_v31, %v1501_v42  ;;  %v493_v36 = vadd.f32 %v492_v32, %v1501_v42 }
 0x125   :  { %1013 = vst [vmem:[#allocation8 + $0x20] sm:$0xff] %v1193_v33  ;;  %1045 = vst [vmem:[#allocation8 + $0x120] sm:$0xff] %v1225_v34  ;;  %v1194_v37 = vpack.c.bf16 %v333_v35, %v331_v29  ;;  %v1226_v38 = vpack.c.bf16 %v493_v36, %v491_v30 }
 0x127   :  { %1014 = vst [vmem:[#allocation8 + $0x28] sm:$0xff] %v1194_v37  ;;  %1046 = vst [vmem:[#allocation8 + $0x128] sm:$0xff] %v1226_v38  ;;  %v336_v39 = vpop.f32.mrb[12].mxu0  ;;  %v496_v40 = vpop.f32.mrb[12].mxu1 }
 0x128   :  { %v337_v43 = vadd.f32 %v336_v39, %v1499_v41  ;;  %v497_v0 = vadd.f32 %v496_v40, %v1499_v41  ;;  %v338_v44 = vpop.f32.mrb[13].mxu0  ;;  %v498_v45 = vpop.f32.mrb[13].mxu1 }
 0x129   :  { %v339_v46 = vadd.f32 %v338_v44, %v1501_v42  ;;  %v499_v47 = vadd.f32 %v498_v45, %v1501_v42  ;;  %v340_v48 = vpop.f32.mrb[14].mxu0  ;;  %v500_v49 = vpop.f32.mrb[14].mxu1 }
 0x12a   :  { %v341_v50 = vadd.f32 %v340_v48, %v1499_v41  ;;  %v501_v51 = vadd.f32 %v500_v49, %v1499_v41  ;;  %v342_v52 = vpop.f32.mrb[15].mxu0  ;;  %v502_v53 = vpop.f32.mrb[15].mxu1 }
 0x12b   :  { %v1195_v54 = vpack.c.bf16 %v339_v46, %v337_v43  ;;  %v1227_v55 = vpack.c.bf16 %v499_v47, %v497_v0  ;;  %v343_v56 = vadd.f32 %v342_v52, %v1501_v42  ;;  %v503_v57 = vadd.f32 %v502_v53, %v1501_v42 }
 0x12d   :  { %1015 = vst [vmem:[#allocation8 + $0x30] sm:$0xff] %v1195_v54  ;;  %1047 = vst [vmem:[#allocation8 + $0x130] sm:$0xff] %v1227_v55  ;;  %v1196_v58 = vpack.c.bf16 %v343_v56, %v341_v50  ;;  %v1228_v59 = vpack.c.bf16 %v503_v57, %v501_v51 }
 0x12f   :  { %1016 = vst [vmem:[#allocation8 + $0x38] sm:$0xff] %v1196_v58  ;;  %1048 = vst [vmem:[#allocation8 + $0x138] sm:$0xff] %v1228_v59  ;;  %v346_v60 = vpop.f32.mrb[16].mxu0  ;;  %v506_v61 = vpop.f32.mrb[16].mxu1 }
 0x130   :  { %v347_v62 = vadd.f32 %v346_v60, %v1499_v41  ;;  %v507_v63 = vadd.f32 %v506_v61, %v1499_v41  ;;  %v348_v1 = vpop.f32.mrb[17].mxu0  ;;  %v508_v2 = vpop.f32.mrb[17].mxu1 }
 0x131   :  { %v349_v3 = vadd.f32 %v348_v1, %v1501_v42  ;;  %v509_v4 = vadd.f32 %v508_v2, %v1501_v42  ;;  %v350_v5 = vpop.f32.mrb[18].mxu0  ;;  %v510_v6 = vpop.f32.mrb[18].mxu1 }
 0x132   :  { %v351_v7 = vadd.f32 %v350_v5, %v1499_v41  ;;  %v511_v8 = vadd.f32 %v510_v6, %v1499_v41  ;;  %v352_v9 = vpop.f32.mrb[19].mxu0  ;;  %v512_v10 = vpop.f32.mrb[19].mxu1 }
 0x133   :  { %v1197_v11 = vpack.c.bf16 %v349_v3, %v347_v62  ;;  %v1229_v12 = vpack.c.bf16 %v509_v4, %v507_v63  ;;  %v353_v13 = vadd.f32 %v352_v9, %v1501_v42  ;;  %v513_v14 = vadd.f32 %v512_v10, %v1501_v42 }
 0x135   :  { %1017 = vst [vmem:[#allocation8 + $0x40] sm:$0xff] %v1197_v11  ;;  %1049 = vst [vmem:[#allocation8 + $0x140] sm:$0xff] %v1229_v12  ;;  %v1198_v15 = vpack.c.bf16 %v353_v13, %v351_v7  ;;  %v1230_v16 = vpack.c.bf16 %v513_v14, %v511_v8 }
 0x137   :  { %1018 = vst [vmem:[#allocation8 + $0x48] sm:$0xff] %v1198_v15  ;;  %1050 = vst [vmem:[#allocation8 + $0x148] sm:$0xff] %v1230_v16  ;;  %v356_v17 = vpop.f32.mrb[20].mxu0  ;;  %v516_v18 = vpop.f32.mrb[20].mxu1 }
 0x138   :  { %v357_v19 = vadd.f32 %v356_v17, %v1499_v41  ;;  %v517_v20 = vadd.f32 %v516_v18, %v1499_v41  ;;  %v358_v21 = vpop.f32.mrb[21].mxu0  ;;  %v518_v22 = vpop.f32.mrb[21].mxu1 }
 0x139   :  { %v359_v23 = vadd.f32 %v358_v21, %v1501_v42  ;;  %v519_v24 = vadd.f32 %v518_v22, %v1501_v42  ;;  %v360_v25 = vpop.f32.mrb[22].mxu0  ;;  %v520_v26 = vpop.f32.mrb[22].mxu1 }
 0x13a   :  { %v361_v27 = vadd.f32 %v360_v25, %v1499_v41  ;;  %v521_v28 = vadd.f32 %v520_v26, %v1499_v41  ;;  %v362_v29 = vpop.f32.mrb[23].mxu0  ;;  %v522_v30 = vpop.f32.mrb[23].mxu1 }
 0x13b   :  { %v1199_v31 = vpack.c.bf16 %v359_v23, %v357_v19  ;;  %v1231_v32 = vpack.c.bf16 %v519_v24, %v517_v20  ;;  %v363_v33 = vadd.f32 %v362_v29, %v1501_v42  ;;  %v523_v34 = vadd.f32 %v522_v30, %v1501_v42 }
 0x13d   :  { %1019 = vst [vmem:[#allocation8 + $0x50] sm:$0xff] %v1199_v31  ;;  %1051 = vst [vmem:[#allocation8 + $0x150] sm:$0xff] %v1231_v32  ;;  %v1200_v35 = vpack.c.bf16 %v363_v33, %v361_v27  ;;  %v1232_v36 = vpack.c.bf16 %v523_v34, %v521_v28 }
 0x13f   :  { %1020 = vst [vmem:[#allocation8 + $0x58] sm:$0xff] %v1200_v35  ;;  %1052 = vst [vmem:[#allocation8 + $0x158] sm:$0xff] %v1232_v36  ;;  %v366_v37 = vpop.f32.mrb[24].mxu0  ;;  %v526_v38 = vpop.f32.mrb[24].mxu1 }
 0x140   :  { %v367_v39 = vadd.f32 %v366_v37, %v1499_v41  ;;  %v527_v40 = vadd.f32 %v526_v38, %v1499_v41  ;;  %v368_v43 = vpop.f32.mrb[25].mxu0  ;;  %v528_v0 = vpop.f32.mrb[25].mxu1 }
 0x141   :  { %v369_v44 = vadd.f32 %v368_v43, %v1501_v42  ;;  %v529_v45 = vadd.f32 %v528_v0, %v1501_v42  ;;  %v370_v46 = vpop.f32.mrb[26].mxu0  ;;  %v530_v47 = vpop.f32.mrb[26].mxu1 }
 0x142   :  { %v371_v48 = vadd.f32 %v370_v46, %v1499_v41  ;;  %v531_v49 = vadd.f32 %v530_v47, %v1499_v41  ;;  %v372_v50 = vpop.f32.mrb[27].mxu0  ;;  %v532_v51 = vpop.f32.mrb[27].mxu1 }
 0x143   :  { %v1201_v52 = vpack.c.bf16 %v369_v44, %v367_v39  ;;  %v1233_v53 = vpack.c.bf16 %v529_v45, %v527_v40  ;;  %v373_v54 = vadd.f32 %v372_v50, %v1501_v42  ;;  %v533_v55 = vadd.f32 %v532_v51, %v1501_v42 }
 0x145   :  { %1021 = vst [vmem:[#allocation8 + $0x60] sm:$0xff] %v1201_v52  ;;  %1053 = vst [vmem:[#allocation8 + $0x160] sm:$0xff] %v1233_v53  ;;  %v1202_v56 = vpack.c.bf16 %v373_v54, %v371_v48  ;;  %v1234_v57 = vpack.c.bf16 %v533_v55, %v531_v49 }
 0x147   :  { %1022 = vst [vmem:[#allocation8 + $0x68] sm:$0xff] %v1202_v56  ;;  %1054 = vst [vmem:[#allocation8 + $0x168] sm:$0xff] %v1234_v57  ;;  %v376_v58 = vpop.f32.mrb[28].mxu0  ;;  %v536_v59 = vpop.f32.mrb[28].mxu1 }
 0x148   :  { %v377_v60 = vadd.f32 %v376_v58, %v1499_v41  ;;  %v537_v61 = vadd.f32 %v536_v59, %v1499_v41  ;;  %v378_v62 = vpop.f32.mrb[29].mxu0  ;;  %v538_v63 = vpop.f32.mrb[29].mxu1 }
 0x149   :  { %v379_v1 = vadd.f32 %v378_v62, %v1501_v42  ;;  %v539_v2 = vadd.f32 %v538_v63, %v1501_v42  ;;  %v380_v3 = vpop.f32.mrb[30].mxu0  ;;  %v540_v4 = vpop.f32.mrb[30].mxu1 }
 0x14a   :  { %v381_v5 = vadd.f32 %v380_v3, %v1499_v41  ;;  %v541_v6 = vadd.f32 %v540_v4, %v1499_v41  ;;  %v382_v7 = vpop.f32.mrb[31].mxu0  ;;  %v542_v8 = vpop.f32.mrb[31].mxu1 }
 0x14b   :  { %v1203_v9 = vpack.c.bf16 %v379_v1, %v377_v60  ;;  %v1235_v10 = vpack.c.bf16 %v539_v2, %v537_v61  ;;  %v383_v11 = vadd.f32 %v382_v7, %v1501_v42  ;;  %v543_v12 = vadd.f32 %v542_v8, %v1501_v42 }
 0x14d   :  { %1023 = vst [vmem:[#allocation8 + $0x70] sm:$0xff] %v1203_v9  ;;  %1055 = vst [vmem:[#allocation8 + $0x170] sm:$0xff] %v1235_v10  ;;  %v1204_v13 = vpack.c.bf16 %v383_v11, %v381_v5  ;;  %v1236_v14 = vpack.c.bf16 %v543_v12, %v541_v6 }
 0x14f   :  { %1024 = vst [vmem:[#allocation8 + $0x78] sm:$0xff] %v1204_v13  ;;  %1056 = vst [vmem:[#allocation8 + $0x178] sm:$0xff] %v1236_v14  ;;  %v386_v15 = vpop.f32.mrb[32].mxu0  ;;  %v546_v16 = vpop.f32.mrb[32].mxu1 }
 0x150   :  { %v387_v17 = vadd.f32 %v386_v15, %v1499_v41  ;;  %v547_v18 = vadd.f32 %v546_v16, %v1499_v41  ;;  %v388_v19 = vpop.f32.mrb[33].mxu0  ;;  %v548_v20 = vpop.f32.mrb[33].mxu1 }
 0x151   :  { %v389_v21 = vadd.f32 %v388_v19, %v1501_v42  ;;  %v549_v22 = vadd.f32 %v548_v20, %v1501_v42  ;;  %v390_v23 = vpop.f32.mrb[34].mxu0  ;;  %v550_v24 = vpop.f32.mrb[34].mxu1 }
 0x152   :  { %v391_v25 = vadd.f32 %v390_v23, %v1499_v41  ;;  %v551_v26 = vadd.f32 %v550_v24, %v1499_v41  ;;  %v392_v27 = vpop.f32.mrb[35].mxu0  ;;  %v552_v28 = vpop.f32.mrb[35].mxu1 }
 0x153   :  { %v1205_v29 = vpack.c.bf16 %v389_v21, %v387_v17  ;;  %v1237_v30 = vpack.c.bf16 %v549_v22, %v547_v18  ;;  %v393_v31 = vadd.f32 %v392_v27, %v1501_v42  ;;  %v553_v32 = vadd.f32 %v552_v28, %v1501_v42 }
 0x155   :  { %1025 = vst [vmem:[#allocation8 + $0x80] sm:$0xff] %v1205_v29  ;;  %1057 = vst [vmem:[#allocation8 + $0x180] sm:$0xff] %v1237_v30  ;;  %v1206_v33 = vpack.c.bf16 %v393_v31, %v391_v25  ;;  %v1238_v34 = vpack.c.bf16 %v553_v32, %v551_v26 }
 0x157   :  { %1026 = vst [vmem:[#allocation8 + $0x88] sm:$0xff] %v1206_v33  ;;  %1058 = vst [vmem:[#allocation8 + $0x188] sm:$0xff] %v1238_v34  ;;  %v396_v35 = vpop.f32.mrb[36].mxu0  ;;  %v556_v36 = vpop.f32.mrb[36].mxu1 }
 0x158   :  { %v397_v37 = vadd.f32 %v396_v35, %v1499_v41  ;;  %v557_v38 = vadd.f32 %v556_v36, %v1499_v41  ;;  %v398_v39 = vpop.f32.mrb[37].mxu0  ;;  %v558_v40 = vpop.f32.mrb[37].mxu1 }
 0x159   :  { %v399_v43 = vadd.f32 %v398_v39, %v1501_v42  ;;  %v559_v0 = vadd.f32 %v558_v40, %v1501_v42  ;;  %v400_v44 = vpop.f32.mrb[38].mxu0  ;;  %v560_v45 = vpop.f32.mrb[38].mxu1 }
 0x15a   :  { %v401_v46 = vadd.f32 %v400_v44, %v1499_v41  ;;  %v561_v47 = vadd.f32 %v560_v45, %v1499_v41  ;;  %v402_v48 = vpop.f32.mrb[39].mxu0  ;;  %v562_v49 = vpop.f32.mrb[39].mxu1 }
 0x15b   :  { %v1207_v50 = vpack.c.bf16 %v399_v43, %v397_v37  ;;  %v1239_v51 = vpack.c.bf16 %v559_v0, %v557_v38  ;;  %v403_v52 = vadd.f32 %v402_v48, %v1501_v42  ;;  %v563_v53 = vadd.f32 %v562_v49, %v1501_v42 }
 0x15d   :  { %1027 = vst [vmem:[#allocation8 + $0x90] sm:$0xff] %v1207_v50  ;;  %1059 = vst [vmem:[#allocation8 + $0x190] sm:$0xff] %v1239_v51  ;;  %v1208_v54 = vpack.c.bf16 %v403_v52, %v401_v46  ;;  %v1240_v55 = vpack.c.bf16 %v563_v53, %v561_v47 }
 0x15f   :  { %1028 = vst [vmem:[#allocation8 + $0x98] sm:$0xff] %v1208_v54  ;;  %1060 = vst [vmem:[#allocation8 + $0x198] sm:$0xff] %v1240_v55  ;;  %v406_v56 = vpop.f32.mrb[40].mxu0  ;;  %v566_v57 = vpop.f32.mrb[40].mxu1 }
 0x160   :  { %v407_v58 = vadd.f32 %v406_v56, %v1499_v41  ;;  %v567_v59 = vadd.f32 %v566_v57, %v1499_v41  ;;  %v408_v60 = vpop.f32.mrb[41].mxu0  ;;  %v568_v61 = vpop.f32.mrb[41].mxu1 }
 0x161   :  { %v409_v62 = vadd.f32 %v408_v60, %v1501_v42  ;;  %v569_v63 = vadd.f32 %v568_v61, %v1501_v42  ;;  %v410_v1 = vpop.f32.mrb[42].mxu0  ;;  %v570_v2 = vpop.f32.mrb[42].mxu1 }
 0x162   :  { %v411_v3 = vadd.f32 %v410_v1, %v1499_v41  ;;  %v571_v4 = vadd.f32 %v570_v2, %v1499_v41  ;;  %v412_v5 = vpop.f32.mrb[43].mxu0  ;;  %v572_v6 = vpop.f32.mrb[43].mxu1 }
 0x163   :  { %v1209_v7 = vpack.c.bf16 %v409_v62, %v407_v58  ;;  %v1241_v8 = vpack.c.bf16 %v569_v63, %v567_v59  ;;  %v413_v9 = vadd.f32 %v412_v5, %v1501_v42  ;;  %v573_v10 = vadd.f32 %v572_v6, %v1501_v42 }
 0x165   :  { %1029 = vst [vmem:[#allocation8 + $0xa0] sm:$0xff] %v1209_v7  ;;  %1061 = vst [vmem:[#allocation8 + $0x1a0] sm:$0xff] %v1241_v8  ;;  %v1210_v11 = vpack.c.bf16 %v413_v9, %v411_v3  ;;  %v1242_v12 = vpack.c.bf16 %v573_v10, %v571_v4 }
 0x167   :  { %1030 = vst [vmem:[#allocation8 + $0xa8] sm:$0xff] %v1210_v11  ;;  %1062 = vst [vmem:[#allocation8 + $0x1a8] sm:$0xff] %v1242_v12  ;;  %v416_v13 = vpop.f32.mrb[44].mxu0  ;;  %v576_v14 = vpop.f32.mrb[44].mxu1 }
 0x168   :  { %v417_v15 = vadd.f32 %v416_v13, %v1499_v41  ;;  %v577_v16 = vadd.f32 %v576_v14, %v1499_v41  ;;  %v418_v17 = vpop.f32.mrb[45].mxu0  ;;  %v578_v18 = vpop.f32.mrb[45].mxu1 }
 0x169   :  { %v419_v19 = vadd.f32 %v418_v17, %v1501_v42  ;;  %v579_v20 = vadd.f32 %v578_v18, %v1501_v42  ;;  %v420_v21 = vpop.f32.mrb[46].mxu0  ;;  %v580_v22 = vpop.f32.mrb[46].mxu1 }
 0x16a   :  { %v421_v23 = vadd.f32 %v420_v21, %v1499_v41  ;;  %v581_v24 = vadd.f32 %v580_v22, %v1499_v41  ;;  %v422_v25 = vpop.f32.mrb[47].mxu0  ;;  %v582_v26 = vpop.f32.mrb[47].mxu1 }
 0x16b   :  { %v1211_v27 = vpack.c.bf16 %v419_v19, %v417_v15  ;;  %v1243_v28 = vpack.c.bf16 %v579_v20, %v577_v16  ;;  %v423_v29 = vadd.f32 %v422_v25, %v1501_v42  ;;  %v583_v30 = vadd.f32 %v582_v26, %v1501_v42 }
 0x16d   :  { %1031 = vst [vmem:[#allocation8 + $0xb0] sm:$0xff] %v1211_v27  ;;  %1063 = vst [vmem:[#allocation8 + $0x1b0] sm:$0xff] %v1243_v28  ;;  %v1212_v31 = vpack.c.bf16 %v423_v29, %v421_v23  ;;  %v1244_v32 = vpack.c.bf16 %v583_v30, %v581_v24 }
 0x16f   :  { %1032 = vst [vmem:[#allocation8 + $0xb8] sm:$0xff] %v1212_v31  ;;  %1064 = vst [vmem:[#allocation8 + $0x1b8] sm:$0xff] %v1244_v32  ;;  %v426_v33 = vpop.f32.mrb[48].mxu0  ;;  %v586_v34 = vpop.f32.mrb[48].mxu1 }
 0x170   :  { %v427_v35 = vadd.f32 %v426_v33, %v1499_v41  ;;  %v587_v36 = vadd.f32 %v586_v34, %v1499_v41  ;;  %v428_v37 = vpop.f32.mrb[49].mxu0  ;;  %v588_v38 = vpop.f32.mrb[49].mxu1 }
 0x171   :  { %v429_v39 = vadd.f32 %v428_v37, %v1501_v42  ;;  %v589_v40 = vadd.f32 %v588_v38, %v1501_v42  ;;  %v430_v43 = vpop.f32.mrb[50].mxu0  ;;  %v590_v0 = vpop.f32.mrb[50].mxu1 }
 0x172   :  { %v431_v44 = vadd.f32 %v430_v43, %v1499_v41  ;;  %v591_v45 = vadd.f32 %v590_v0, %v1499_v41  ;;  %v432_v46 = vpop.f32.mrb[51].mxu0  ;;  %v592_v47 = vpop.f32.mrb[51].mxu1 }
 0x173   :  { %v1213_v48 = vpack.c.bf16 %v429_v39, %v427_v35  ;;  %v1245_v49 = vpack.c.bf16 %v589_v40, %v587_v36  ;;  %v433_v50 = vadd.f32 %v432_v46, %v1501_v42  ;;  %v593_v51 = vadd.f32 %v592_v47, %v1501_v42 }
 0x175   :  { %1033 = vst [vmem:[#allocation8 + $0xc0] sm:$0xff] %v1213_v48  ;;  %1065 = vst [vmem:[#allocation8 + $0x1c0] sm:$0xff] %v1245_v49  ;;  %v1214_v52 = vpack.c.bf16 %v433_v50, %v431_v44  ;;  %v1246_v53 = vpack.c.bf16 %v593_v51, %v591_v45 }
 0x177   :  { %1034 = vst [vmem:[#allocation8 + $0xc8] sm:$0xff] %v1214_v52  ;;  %1066 = vst [vmem:[#allocation8 + $0x1c8] sm:$0xff] %v1246_v53  ;;  %v436_v54 = vpop.f32.mrb[52].mxu0  ;;  %v596_v55 = vpop.f32.mrb[52].mxu1 }
 0x178   :  { %v437_v56 = vadd.f32 %v436_v54, %v1499_v41  ;;  %v597_v57 = vadd.f32 %v596_v55, %v1499_v41  ;;  %v438_v58 = vpop.f32.mrb[53].mxu0  ;;  %v598_v59 = vpop.f32.mrb[53].mxu1 }
 0x179   :  { %v439_v60 = vadd.f32 %v438_v58, %v1501_v42  ;;  %v599_v61 = vadd.f32 %v598_v59, %v1501_v42  ;;  %v440_v62 = vpop.f32.mrb[54].mxu0  ;;  %v600_v63 = vpop.f32.mrb[54].mxu1 }
 0x17a   :  { %v441_v1 = vadd.f32 %v440_v62, %v1499_v41  ;;  %v601_v2 = vadd.f32 %v600_v63, %v1499_v41  ;;  %v442_v3 = vpop.f32.mrb[55].mxu0  ;;  %v602_v4 = vpop.f32.mrb[55].mxu1 }
 0x17b   :  { %v1215_v5 = vpack.c.bf16 %v439_v60, %v437_v56  ;;  %v1247_v6 = vpack.c.bf16 %v599_v61, %v597_v57  ;;  %v443_v7 = vadd.f32 %v442_v3, %v1501_v42  ;;  %v603_v8 = vadd.f32 %v602_v4, %v1501_v42 }
 0x17d   :  { %1035 = vst [vmem:[#allocation8 + $0xd0] sm:$0xff] %v1215_v5  ;;  %1067 = vst [vmem:[#allocation8 + $0x1d0] sm:$0xff] %v1247_v6  ;;  %v1216_v9 = vpack.c.bf16 %v443_v7, %v441_v1  ;;  %v1248_v10 = vpack.c.bf16 %v603_v8, %v601_v2 }
 0x17f   :  { %1036 = vst [vmem:[#allocation8 + $0xd8] sm:$0xff] %v1216_v9  ;;  %1068 = vst [vmem:[#allocation8 + $0x1d8] sm:$0xff] %v1248_v10  ;;  %v446_v11 = vpop.f32.mrb[56].mxu0  ;;  %v606_v12 = vpop.f32.mrb[56].mxu1 }
 0x180   :  { %v447_v13 = vadd.f32 %v446_v11, %v1499_v41  ;;  %v607_v14 = vadd.f32 %v606_v12, %v1499_v41  ;;  %v448_v15 = vpop.f32.mrb[57].mxu0  ;;  %v608_v16 = vpop.f32.mrb[57].mxu1 }
 0x181   :  { %v449_v17 = vadd.f32 %v448_v15, %v1501_v42  ;;  %v609_v18 = vadd.f32 %v608_v16, %v1501_v42  ;;  %v450_v19 = vpop.f32.mrb[58].mxu0  ;;  %v610_v20 = vpop.f32.mrb[58].mxu1 }
 0x182   :  { %v451_v21 = vadd.f32 %v450_v19, %v1499_v41  ;;  %v611_v22 = vadd.f32 %v610_v20, %v1499_v41  ;;  %v452_v23 = vpop.f32.mrb[59].mxu0  ;;  %v612_v24 = vpop.f32.mrb[59].mxu1 }
 0x183   :  { %v1217_v25 = vpack.c.bf16 %v449_v17, %v447_v13  ;;  %v1249_v26 = vpack.c.bf16 %v609_v18, %v607_v14  ;;  %v453_v27 = vadd.f32 %v452_v23, %v1501_v42  ;;  %v613_v28 = vadd.f32 %v612_v24, %v1501_v42 }
 0x185   :  { %1037 = vst [vmem:[#allocation8 + $0xe0] sm:$0xff] %v1217_v25  ;;  %1069 = vst [vmem:[#allocation8 + $0x1e0] sm:$0xff] %v1249_v26  ;;  %v1218_v29 = vpack.c.bf16 %v453_v27, %v451_v21  ;;  %v1250_v30 = vpack.c.bf16 %v613_v28, %v611_v22 }
 0x187   :  { %1038 = vst [vmem:[#allocation8 + $0xe8] sm:$0xff] %v1218_v29  ;;  %1070 = vst [vmem:[#allocation8 + $0x1e8] sm:$0xff] %v1250_v30  ;;  %v456_v31 = vpop.f32.mrb[60].mxu0  ;;  %v616_v32 = vpop.f32.mrb[60].mxu1 }
 0x188   :  { %v457_v33 = vadd.f32 %v456_v31, %v1499_v41  ;;  %v617_v34 = vadd.f32 %v616_v32, %v1499_v41  ;;  %v458_v35 = vpop.f32.mrb[61].mxu0  ;;  %v618_v36 = vpop.f32.mrb[61].mxu1 }
 0x189   :  { %v459_v37 = vadd.f32 %v458_v35, %v1501_v42  ;;  %v619_v38 = vadd.f32 %v618_v36, %v1501_v42  ;;  %v460_v39 = vpop.f32.mrb[62].mxu0  ;;  %v620_v40 = vpop.f32.mrb[62].mxu1 }
 0x18a   :  { %v461_v43 = vadd.f32 %v460_v39, %v1499_v41  ;;  %v621_v0 = vadd.f32 %v620_v40, %v1499_v41  ;;  %v462_v44 = vpop.f32.mrb[63].mxu0  ;;  %v622_v45 = vpop.f32.mrb[63].mxu1 }
 0x18b   :  { %v1219_v46 = vpack.c.bf16 %v459_v37, %v457_v33  ;;  %v1251_v47 = vpack.c.bf16 %v619_v38, %v617_v34  ;;  %v463_v48 = vadd.f32 %v462_v44, %v1501_v42  ;;  %v623_v49 = vadd.f32 %v622_v45, %v1501_v42 }
 0x18d   :  { %1039 = vst [vmem:[#allocation8 + $0xf0] sm:$0xff] %v1219_v46  ;;  %1071 = vst [vmem:[#allocation8 + $0x1f0] sm:$0xff] %v1251_v47  ;;  %v1220_v50 = vpack.c.bf16 %v463_v48, %v461_v43  ;;  %v1252_v51 = vpack.c.bf16 %v623_v49, %v621_v0 }
 0x18f   :  { %1040 = vst [vmem:[#allocation8 + $0xf8] sm:$0xff] %v1220_v50  ;;  %1072 = vst [vmem:[#allocation8 + $0x1f8] sm:$0xff] %v1252_v51 }
 0x190   :  { %1342 = shalt.err (!%p1339_p0)
}
 0x191   :  { %s1343_s27 = scalar_lea.hbm %s1649_s3, 8192 }
 0x192   :  { %p1344_p1 = scmp.ne.s32.totalorder %s1649_s3, %s1343_s27  ;;  %p1347_p2 = scmp.lt.u32.totalorder %s1343_s27, %s1649_s3 }
 0x194   :  { %p1349_p3 = pnand %p1347_p2, %p1344_p1 }
 0x196   :  { %1352 = shalt.err (!%p1349_p3)
}
 0x197   :  { %1084 = dma.vmem_to_hbm [thread:$0]  %s1079_s21, 8192, %s1649_s3, [#allocation4], %s1361_s24, %s1361_s24, %s1362_s25  }
 0x198   :  { %1357 = dma.done.wait [#allocation4], 8192  }
 0x199   :  { %1358 = vsyncadd [#allocation4], 4294959104 }
 0x19a   :  { %1088 = vsyncpa [#allocation3], 1 }
 0x19b   :  { %1089 = vsyncpa [#allocation6], 1 }
 0x19c   :  { %1090 = vsyncpa [#allocation4], 1 }

// kernel: feed_forward.5
= control target key start
LH: loop header
LB: loop body
LE: loop exit
PB: predicated region body
PF: predicated region fallthrough
CT: control target
= control target key end

     0   :  { %8 = vsyncpa [#allocation3], 0  ;;  %s1286_s0 = inlined_call_operand.hbm [shape: bf16[512,128], index: 0, kind: input, shape index: {}]   ;;  %s1287_s1 = inlined_call_operand.hbm [shape: bf16[128,16], index: 1, kind: input, shape index: {}]   ;;  %s1288_s2 = inlined_call_operand.hbm [shape: f32[1,16], index: 2, kind: input, shape index: {}]   ;;  %s1289_s3 = inlined_call_operand.hbm [shape: f32[512,16], index: 3, kind: output, shape index: {}]  }
   0x1   :  { %9 = vsyncpa [#allocation6], 0 }
   0x2   :  { %10 = vsyncpa [#allocation4], 0  ;;  %s1073_s12 = smov [#allocation5]   ;;  %s1074_s14 = smov [#allocation2]  }
   0x3   :  { %s28_s13 = sshll.u32 %s1073_s12, 4  ;;  %s16_s15 = sshll.u32 %s1074_s14, 4  ;;  %s29_s13 = int_to_ptr.vmem [resolvable:$true] %s28_s13  ;;  %s1101_s15 = int_to_ptr.vmem [resolvable:$true] %s16_s15 }
   0x4   :  { %s979_s18 = scalar_lea.hbm %s1287_s1, 1024 }
   0x5   :  { %p980_p0 = scmp.ne.s32.totalorder %s1287_s1, %s979_s18  ;;  %p983_p1 = scmp.lt.u32.totalorder %s979_s18, %s1287_s1 }
   0x7   :  { %p985_p2 = pnand %p983_p1, %p980_p0 }
   0x9   :  { %988 = shalt.err (!%p985_p2)
}
   0xa   :  { %s989_s23 = scalar_lea.vmem %s29_s13, 1024  ;;  %p994_p4 = scmp.lt.s32.totalorder %s29_s13, %s29_s13 }
   0xb   :  { %p990_p3 = scmp.ne.s32.totalorder %s29_s13, %s989_s23  ;;  %p995_p5 = scmp.lt.s32.totalorder %s989_s23, %s989_s23 }
   0xd   :  { %p996_p6 = por %p995_p5, %p994_p4 }
   0xf   :  { %p997_p7 = pnand %p996_p6, %p990_p3 }
  0x11   :  { %1000 = shalt.err (!%p997_p7)
}
  0x12   :  { %s1075_s24 = smov 64   ;;  %s1076_s25 = smov 4  }
  0x13   :  { %34 = dma.hbm_to_vmem [thread:$0]  %s1287_s1, 1024, %s29_s13, [#allocation6], %s1075_s24, %s1075_s24, %s1076_s25  }
  0x14   :  { %s1001_s30 = scalar_lea.hbm %s1286_s0, 4096 }
  0x15   :  { %p1002_p8 = scmp.ne.s32.totalorder %s1286_s0, %s1001_s30  ;;  %p1005_p9 = scmp.lt.u32.totalorder %s1001_s30, %s1286_s0 }
  0x17   :  { %p1007_p10 = pnand %p1005_p9, %p1002_p8 }
  0x19   :  { %1010 = shalt.err (!%p1007_p10)
}
  0x1a   :  { %s1011_s8 = scalar_lea.vmem %s1101_s15, 4096  ;;  %p1016_p12 = scmp.lt.s32.totalorder %s1101_s15, %s1101_s15 }
  0x1b   :  { %p1012_p11 = scmp.ne.s32.totalorder %s1101_s15, %s1011_s8  ;;  %p1017_p13 = scmp.lt.s32.totalorder %s1011_s8, %s1011_s8 }
  0x1d   :  { %p1018_p0 = por %p1017_p13, %p1016_p12 }
  0x1f   :  { %p1019_p1 = pnand %p1018_p0, %p1012_p11 }
  0x21   :  { %1022 = shalt.err (!%p1019_p1)
}
  0x22   :  { %22 = dma.hbm_to_vmem [thread:$0]  %s1286_s0, 4096, %s1101_s15, [#allocation3], %s1075_s24, %s1075_s24, %s1076_s25  }
  0x23   :  { %s1077_s10 = smov [#allocation7]   ;;  %s1023_s14 = scalar_lea.hbm %s1288_s2, 16 }
  0x24   :  { %s41_s11 = sshll.u32 %s1077_s10, 4  ;;  %p1024_p2 = scmp.ne.s32.totalorder %s1288_s2, %s1023_s14  ;;  %s42_s11 = int_to_ptr.vmem [resolvable:$true] %s41_s11 }
  0x25   :  { %p1027_p3 = scmp.lt.u32.totalorder %s1023_s14, %s1288_s2 }
  0x27   :  { %p1029_p4 = pnand %p1027_p3, %p1024_p2 }
  0x29   :  { %1032 = shalt.err (!%p1029_p4)
}
  0x2a   :  { %s1033_s20 = scalar_lea.vmem %s42_s11, 16  ;;  %s1037_s0 = scalar_lea.vmem %s42_s11, 32 }
  0x2b   :  { %p1034_p5 = scmp.ne.s32.totalorder %s42_s11, %s1033_s20  ;;  %p1038_p6 = scmp.lt.s32.totalorder %s42_s11, %s42_s11 }
  0x2c   :  { %p1039_p7 = scmp.lt.s32.totalorder %s1037_s0, %s1033_s20 }
  0x2e   :  { %p1040_p8 = por %p1039_p7, %p1038_p6 }
  0x30   :  { %p1041_p9 = pnand %p1040_p8, %p1034_p5 }
  0x32   :  { %1044 = shalt.err (!%p1041_p9)
}
  0x33   :  { %44 = dma.hbm_to_vmem [thread:$0]  %s1288_s2, 16, %s42_s11, [#allocation6]  }
  0x34   :  { %1067 = dma.done.wait [#allocation3], 4096  }
  0x35   :  { %1068 = vsyncadd [#allocation3], 4294963200 }
  0x36   :  { %1069 = dma.done.wait [#allocation6], 1040  }
  0x37   :  { %1070 = vsyncadd [#allocation6], 4294966256  ;;  %v939_v0 = vld [vmem:[#allocation5] sm:$0xff]   ;;  %v940_v1 = vld [vmem:[#allocation5 + $0x8] sm:$0xff]   ;;  %vm671_vm0 = vcmask 130048   ;;  %s1078_s2 = smov [#allocation8]  }
  0x38   :  { %835 = vmatprep.subr.bf16.mxu0 %v939_v0  ;;  %915 = vmatprep.subr.bf16.mxu1 %v939_v0  ;;  %v941_v2 = vld [vmem:[#allocation5 + $0x10] sm:$0xff]   ;;  %v942_v3 = vld [vmem:[#allocation5 + $0x18] sm:$0xff]   ;;  %v947_v4 = vld [vmem:[#allocation2] sm:$0xff]   ;;  %s741_s22 = sshll.u32 %s1078_s2, 4  ;;  %s742_s22 = int_to_ptr.vmem [resolvable:$true] %s741_s22 }
  0x39   :  { %836 = vmatpush3.bf16.msra.mxu0 %v939_v0  ;;  %923 = vmatpush3.bf16.msra.mxu1 %v939_v0  ;;  %v948_v5 = vld [vmem:[#allocation2 + $0x80] sm:$0xff]   ;;  %v944_v7 = vld [vmem:[#allocation5 + $0x28] sm:$0xff]   ;;  %v945_v8 = vld [vmem:[#allocation5 + $0x30] sm:$0xff]   ;;  %s1045_s23 = scalar_lea.vmem %s742_s22, 8192  ;;  %p1050_p11 = scmp.lt.s32.totalorder %s742_s22, %s742_s22 }
  0x3a   :  { %837 = vmatprep.subr.bf16.mxu0 %v940_v1  ;;  %916 = vmatprep.subr.bf16.mxu1 %v940_v1  ;;  %v943_v6 = vld [vmem:[#allocation5 + $0x20] sm:$0xff]   ;;  %v946_v9 = vld [vmem:[#allocation5 + $0x38] sm:$0xff]   ;;  %v949_v10 = vld [vmem:[#allocation2 + $0x8] sm:$0xff]   ;;  %p1046_p10 = scmp.ne.s32.totalorder %s742_s22, %s1045_s23  ;;  %p1051_p12 = scmp.lt.s32.totalorder %s1045_s23, %s1045_s23 }
  0x3b   :  { %851 = vmatprep.mubr.bf16.mxu0 %v947_v4  ;;  %883 = vmatprep.mubr.bf16.mxu1 %v948_v5  ;;  %v950_v11 = vld [vmem:[#allocation2 + $0x88] sm:$0xff]   ;;  %v951_v12 = vld [vmem:[#allocation2 + $0x10] sm:$0xff]   ;;  %v953_v14 = vld [vmem:[#allocation2 + $0x18] sm:$0xff]  }
  0x3c   :  { %v952_v13 = vld [vmem:[#allocation2 + $0x90] sm:$0xff]   ;;  %v954_v15 = vld [vmem:[#allocation2 + $0x98] sm:$0xff]   ;;  %v955_v16 = vld [vmem:[#allocation2 + $0x20] sm:$0xff]   ;;  %p1052_p13 = por %p1051_p12, %p1050_p11 }
  0x3d   :  { %838 = vmatpush3.bf16.msra.mxu0 %v940_v1  ;;  %924 = vmatpush3.bf16.msra.mxu1 %v940_v1  ;;  %v956_v17 = vld [vmem:[#allocation2 + $0xa0] sm:$0xff]   ;;  %v957_v18 = vld [vmem:[#allocation2 + $0x28] sm:$0xff]   ;;  %v959_v20 = vld [vmem:[#allocation2 + $0x30] sm:$0xff]  }
  0x3e   :  { %839 = vmatprep.subr.bf16.mxu0 %v941_v2  ;;  %917 = vmatprep.subr.bf16.mxu1 %v941_v2  ;;  %v958_v19 = vld [vmem:[#allocation2 + $0xa8] sm:$0xff]   ;;  %v960_v21 = vld [vmem:[#allocation2 + $0xb0] sm:$0xff]   ;;  %v961_v22 = vld [vmem:[#allocation2 + $0x38] sm:$0xff]   ;;  %p1053_p0 = pnand %p1052_p13, %p1046_p10 }
  0x3f   :  { %v962_v23 = vld [vmem:[#allocation2 + $0xb8] sm:$0xff]   ;;  %v963_v24 = vld [vmem:[#allocation2 + $0x40] sm:$0xff]   ;;  %v965_v26 = vld [vmem:[#allocation2 + $0x48] sm:$0xff]  }
  0x40   :  { %v964_v25 = vld [vmem:[#allocation2 + $0xc0] sm:$0xff]   ;;  %v966_v27 = vld [vmem:[#allocation2 + $0xc8] sm:$0xff]   ;;  %v967_v28 = vld [vmem:[#allocation2 + $0x50] sm:$0xff]  }
  0x41   :  { %840 = vmatpush3.bf16.msra.mxu0 %v941_v2  ;;  %925 = vmatpush3.bf16.msra.mxu1 %v941_v2  ;;  %v968_v29 = vld [vmem:[#allocation2 + $0xd0] sm:$0xff]   ;;  %v969_v30 = vld [vmem:[#allocation2 + $0x58] sm:$0xff]   ;;  %v971_v32 = vld [vmem:[#allocation2 + $0x60] sm:$0xff]  }
  0x42   :  { %841 = vmatprep.subr.bf16.mxu0 %v942_v3  ;;  %918 = vmatprep.subr.bf16.mxu1 %v942_v3  ;;  %v970_v31 = vld [vmem:[#allocation2 + $0xd8] sm:$0xff]   ;;  %v972_v33 = vld [vmem:[#allocation2 + $0xe0] sm:$0xff]   ;;  %v973_v34 = vld [vmem:[#allocation2 + $0x68] sm:$0xff]  }
  0x43   :  { %v974_v35 = vld [vmem:[#allocation2 + $0xe8] sm:$0xff]   ;;  %v975_v36 = vld [vmem:[#allocation2 + $0x70] sm:$0xff]   ;;  %v977_v38 = vld [vmem:[#allocation2 + $0x78] sm:$0xff]  }
  0x44   :  { %v976_v37 = vld [vmem:[#allocation2 + $0xf0] sm:$0xff]   ;;  %v978_v39 = vld [vmem:[#allocation2 + $0xf8] sm:$0xff]   ;;  %v1144_v40 = vld [vmem:[#allocation7] ss:$0 sm:$0xff] }
  0x45   :  { %842 = vmatpush3.bf16.msra.mxu0 %v942_v3  ;;  %926 = vmatpush3.bf16.msra.mxu1 %v942_v3 }
  0x46   :  { %843 = vmatprep.subr.bf16.mxu0 %v943_v6  ;;  %919 = vmatprep.subr.bf16.mxu1 %v943_v6 }
  0x49   :  { %844 = vmatpush3.bf16.msra.mxu0 %v943_v6  ;;  %927 = vmatpush3.bf16.msra.mxu1 %v943_v6 }
  0x4a   :  { %845 = vmatprep.subr.bf16.mxu0 %v944_v7  ;;  %920 = vmatprep.subr.bf16.mxu1 %v944_v7 }
  0x4d   :  { %846 = vmatpush3.bf16.msra.mxu0 %v944_v7  ;;  %928 = vmatpush3.bf16.msra.mxu1 %v944_v7 }
  0x4e   :  { %847 = vmatprep.subr.bf16.mxu0 %v945_v8  ;;  %921 = vmatprep.subr.bf16.mxu1 %v945_v8 }
  0x51   :  { %848 = vmatpush3.bf16.msra.mxu0 %v945_v8  ;;  %929 = vmatpush3.bf16.msra.mxu1 %v945_v8 }
  0x52   :  { %849 = vmatprep.subr.bf16.mxu0 %v946_v9  ;;  %922 = vmatprep.subr.bf16.mxu1 %v946_v9 }
  0x55   :  { %850 = vmatpush3.bf16.msra.mxu0 %v946_v9  ;;  %930 = vmatpush3.bf16.msra.mxu1 %v946_v9 }
  0x58   :  { %852 = vmatmul.mubr.bf16.vlgmr.msra.gmra.mrb[0].mxu0 %v949_v10  ;;  %884 = vmatmul.mubr.bf16.vlgmr.msra.gmra.mrb[0].mxu1 %v950_v11 }
  0x59   :  { %855 = vmatprep.mubr.bf16.mxu0 %v951_v12  ;;  %887 = vmatprep.mubr.bf16.mxu1 %v952_v13 }
  0x60   :  { %856 = vmatmul.mubr.bf16.gmra.mrb[4].mxu0 %v953_v14  ;;  %888 = vmatmul.mubr.bf16.gmra.mrb[4].mxu1 %v954_v15 }
  0x61   :  { %859 = vmatprep.mubr.bf16.mxu0 %v955_v16  ;;  %891 = vmatprep.mubr.bf16.mxu1 %v956_v17 }
  0x68   :  { %860 = vmatmul.mubr.bf16.gmra.mrb[8].mxu0 %v957_v18  ;;  %892 = vmatmul.mubr.bf16.gmra.mrb[8].mxu1 %v958_v19 }
  0x69   :  { %863 = vmatprep.mubr.bf16.mxu0 %v959_v20  ;;  %895 = vmatprep.mubr.bf16.mxu1 %v960_v21 }
  0x70   :  { %864 = vmatmul.mubr.bf16.gmra.mrb[12].mxu0 %v961_v22  ;;  %896 = vmatmul.mubr.bf16.gmra.mrb[12].mxu1 %v962_v23 }
  0x71   :  { %867 = vmatprep.mubr.bf16.mxu0 %v963_v24  ;;  %899 = vmatprep.mubr.bf16.mxu1 %v964_v25 }
  0x78   :  { %868 = vmatmul.mubr.bf16.gmra.mrb[16].mxu0 %v965_v26  ;;  %900 = vmatmul.mubr.bf16.gmra.mrb[16].mxu1 %v966_v27 }
  0x79   :  { %871 = vmatprep.mubr.bf16.mxu0 %v967_v28  ;;  %903 = vmatprep.mubr.bf16.mxu1 %v968_v29 }
  0x80   :  { %872 = vmatmul.mubr.bf16.gmra.mrb[20].mxu0 %v969_v30  ;;  %904 = vmatmul.mubr.bf16.gmra.mrb[20].mxu1 %v970_v31 }
  0x81   :  { %875 = vmatprep.mubr.bf16.mxu0 %v971_v32  ;;  %907 = vmatprep.mubr.bf16.mxu1 %v972_v33 }
  0x88   :  { %876 = vmatmul.mubr.bf16.gmra.mrb[24].mxu0 %v973_v34  ;;  %908 = vmatmul.mubr.bf16.gmra.mrb[24].mxu1 %v974_v35 }
  0x89   :  { %879 = vmatprep.mubr.bf16.mxu0 %v975_v36  ;;  %911 = vmatprep.mubr.bf16.mxu1 %v976_v37 }
  0x90   :  { %880 = vmatmul.mubr.bf16.gmra.mrb[28].mxu0 %v977_v38  ;;  %912 = vmatmul.mubr.bf16.gmra.mrb[28].mxu1 %v978_v39 }
 0x12b   :  { %v853_v41 = vpop.f32.mrb[0].mxu0  ;;  %v885_v42 = vpop.f32.mrb[0].mxu1 }
 0x12c   :  { %v425_v43 = vadd.f32 %v853_v41, %v1144_v40  ;;  %v553_v44 = vadd.f32 %v885_v42, %v1144_v40  ;;  %v416_v45 = vpop.f32.mrb[1].mxu0  ;;  %v544_v46 = vpop.f32.mrb[1].mxu1 }
 0x12d   :  { %v417_v47 = vadd.f32 %v1144_v40, %v416_v45  ;;  %v545_v48 = vadd.f32 %v1144_v40, %v544_v46  ;;  %v854_v49 = vpop.f32.mrb[2].mxu0  ;;  %v886_v50 = vpop.f32.mrb[2].mxu1 }
 0x12e   :  { %674 = vst.msk [vmem:[#allocation8 + $0x10] sm:$0xff] %vm671_vm0, %v425_v43  ;;  %706 = vst.msk [vmem:[#allocation8 + $0x110] sm:$0xff] %vm671_vm0, %v553_v44  ;;  %v428_v51 = vadd.f32 %v854_v49, %v1144_v40  ;;  %v556_v52 = vadd.f32 %v886_v50, %v1144_v40  ;;  %v419_v53 = vpop.f32.mrb[3].mxu0  ;;  %v547_v54 = vpop.f32.mrb[3].mxu1 }
 0x12f   :  { %672 = vst.msk [vmem:[#allocation8] sm:$0xff] %vm671_vm0, %v417_v47  ;;  %704 = vst.msk [vmem:[#allocation8 + $0x100] sm:$0xff] %vm671_vm0, %v545_v48  ;;  %v420_v55 = vadd.f32 %v1144_v40, %v419_v53  ;;  %v548_v56 = vadd.f32 %v1144_v40, %v547_v54 }
 0x130   :  { %675 = vst.msk [vmem:[#allocation8 + $0x18] sm:$0xff] %vm671_vm0, %v428_v51  ;;  %707 = vst.msk [vmem:[#allocation8 + $0x118] sm:$0xff] %vm671_vm0, %v556_v52 }
 0x131   :  { %673 = vst.msk [vmem:[#allocation8 + $0x8] sm:$0xff] %vm671_vm0, %v420_v55  ;;  %705 = vst.msk [vmem:[#allocation8 + $0x108] sm:$0xff] %vm671_vm0, %v548_v56 }
 0x133   :  { %v857_v57 = vpop.f32.mrb[4].mxu0  ;;  %v889_v58 = vpop.f32.mrb[4].mxu1 }
 0x134   :  { %v441_v59 = vadd.f32 %v857_v57, %v1144_v40  ;;  %v569_v60 = vadd.f32 %v889_v58, %v1144_v40  ;;  %v432_v61 = vpop.f32.mrb[5].mxu0  ;;  %v560_v62 = vpop.f32.mrb[5].mxu1 }
 0x135   :  { %v433_v63 = vadd.f32 %v1144_v40, %v432_v61  ;;  %v561_v0 = vadd.f32 %v1144_v40, %v560_v62  ;;  %v858_v1 = vpop.f32.mrb[6].mxu0  ;;  %v890_v2 = vpop.f32.mrb[6].mxu1 }
 0x136   :  { %678 = vst.msk [vmem:[#allocation8 + $0x30] sm:$0xff] %vm671_vm0, %v441_v59  ;;  %710 = vst.msk [vmem:[#allocation8 + $0x130] sm:$0xff] %vm671_vm0, %v569_v60  ;;  %v444_v3 = vadd.f32 %v858_v1, %v1144_v40  ;;  %v572_v4 = vadd.f32 %v890_v2, %v1144_v40  ;;  %v435_v5 = vpop.f32.mrb[7].mxu0  ;;  %v563_v6 = vpop.f32.mrb[7].mxu1 }
 0x137   :  { %676 = vst.msk [vmem:[#allocation8 + $0x20] sm:$0xff] %vm671_vm0, %v433_v63  ;;  %708 = vst.msk [vmem:[#allocation8 + $0x120] sm:$0xff] %vm671_vm0, %v561_v0  ;;  %v436_v7 = vadd.f32 %v1144_v40, %v435_v5  ;;  %v564_v8 = vadd.f32 %v1144_v40, %v563_v6 }
 0x138   :  { %679 = vst.msk [vmem:[#allocation8 + $0x38] sm:$0xff] %vm671_vm0, %v444_v3  ;;  %711 = vst.msk [vmem:[#allocation8 + $0x138] sm:$0xff] %vm671_vm0, %v572_v4 }
 0x139   :  { %677 = vst.msk [vmem:[#allocation8 + $0x28] sm:$0xff] %vm671_vm0, %v436_v7  ;;  %709 = vst.msk [vmem:[#allocation8 + $0x128] sm:$0xff] %vm671_vm0, %v564_v8 }
 0x13b   :  { %v861_v9 = vpop.f32.mrb[8].mxu0  ;;  %v893_v10 = vpop.f32.mrb[8].mxu1 }
 0x13c   :  { %v457_v11 = vadd.f32 %v861_v9, %v1144_v40  ;;  %v585_v12 = vadd.f32 %v893_v10, %v1144_v40  ;;  %v448_v13 = vpop.f32.mrb[9].mxu0  ;;  %v576_v14 = vpop.f32.mrb[9].mxu1 }
 0x13d   :  { %v449_v15 = vadd.f32 %v1144_v40, %v448_v13  ;;  %v577_v16 = vadd.f32 %v1144_v40, %v576_v14  ;;  %v862_v17 = vpop.f32.mrb[10].mxu0  ;;  %v894_v18 = vpop.f32.mrb[10].mxu1 }
 0x13e   :  { %682 = vst.msk [vmem:[#allocation8 + $0x50] sm:$0xff] %vm671_vm0, %v457_v11  ;;  %714 = vst.msk [vmem:[#allocation8 + $0x150] sm:$0xff] %vm671_vm0, %v585_v12  ;;  %v460_v19 = vadd.f32 %v862_v17, %v1144_v40  ;;  %v588_v20 = vadd.f32 %v894_v18, %v1144_v40  ;;  %v451_v21 = vpop.f32.mrb[11].mxu0  ;;  %v579_v22 = vpop.f32.mrb[11].mxu1 }
 0x13f   :  { %680 = vst.msk [vmem:[#allocation8 + $0x40] sm:$0xff] %vm671_vm0, %v449_v15  ;;  %712 = vst.msk [vmem:[#allocation8 + $0x140] sm:$0xff] %vm671_vm0, %v577_v16  ;;  %v452_v23 = vadd.f32 %v1144_v40, %v451_v21  ;;  %v580_v24 = vadd.f32 %v1144_v40, %v579_v22 }
 0x140   :  { %683 = vst.msk [vmem:[#allocation8 + $0x58] sm:$0xff] %vm671_vm0, %v460_v19  ;;  %715 = vst.msk [vmem:[#allocation8 + $0x158] sm:$0xff] %vm671_vm0, %v588_v20 }
 0x141   :  { %681 = vst.msk [vmem:[#allocation8 + $0x48] sm:$0xff] %vm671_vm0, %v452_v23  ;;  %713 = vst.msk [vmem:[#allocation8 + $0x148] sm:$0xff] %vm671_vm0, %v580_v24 }
 0x143   :  { %v865_v25 = vpop.f32.mrb[12].mxu0  ;;  %v897_v26 = vpop.f32.mrb[12].mxu1 }
 0x144   :  { %v473_v27 = vadd.f32 %v865_v25, %v1144_v40  ;;  %v601_v28 = vadd.f32 %v897_v26, %v1144_v40  ;;  %v464_v29 = vpop.f32.mrb[13].mxu0  ;;  %v592_v30 = vpop.f32.mrb[13].mxu1 }
 0x145   :  { %v465_v31 = vadd.f32 %v1144_v40, %v464_v29  ;;  %v593_v32 = vadd.f32 %v1144_v40, %v592_v30  ;;  %v866_v33 = vpop.f32.mrb[14].mxu0  ;;  %v898_v34 = vpop.f32.mrb[14].mxu1 }
 0x146   :  { %686 = vst.msk [vmem:[#allocation8 + $0x70] sm:$0xff] %vm671_vm0, %v473_v27  ;;  %718 = vst.msk [vmem:[#allocation8 + $0x170] sm:$0xff] %vm671_vm0, %v601_v28  ;;  %v476_v35 = vadd.f32 %v866_v33, %v1144_v40  ;;  %v604_v36 = vadd.f32 %v898_v34, %v1144_v40  ;;  %v467_v37 = vpop.f32.mrb[15].mxu0  ;;  %v595_v38 = vpop.f32.mrb[15].mxu1 }
 0x147   :  { %684 = vst.msk [vmem:[#allocation8 + $0x60] sm:$0xff] %vm671_vm0, %v465_v31  ;;  %716 = vst.msk [vmem:[#allocation8 + $0x160] sm:$0xff] %vm671_vm0, %v593_v32  ;;  %v468_v39 = vadd.f32 %v1144_v40, %v467_v37  ;;  %v596_v41 = vadd.f32 %v1144_v40, %v595_v38 }
 0x148   :  { %687 = vst.msk [vmem:[#allocation8 + $0x78] sm:$0xff] %vm671_vm0, %v476_v35  ;;  %719 = vst.msk [vmem:[#allocation8 + $0x178] sm:$0xff] %vm671_vm0, %v604_v36 }
 0x149   :  { %685 = vst.msk [vmem:[#allocation8 + $0x68] sm:$0xff] %vm671_vm0, %v468_v39  ;;  %717 = vst.msk [vmem:[#allocation8 + $0x168] sm:$0xff] %vm671_vm0, %v596_v41 }
 0x14b   :  { %v869_v42 = vpop.f32.mrb[16].mxu0  ;;  %v901_v43 = vpop.f32.mrb[16].mxu1 }
 0x14c   :  { %v489_v44 = vadd.f32 %v869_v42, %v1144_v40  ;;  %v617_v45 = vadd.f32 %v901_v43, %v1144_v40  ;;  %v480_v46 = vpop.f32.mrb[17].mxu0  ;;  %v608_v47 = vpop.f32.mrb[17].mxu1 }
 0x14d   :  { %v481_v48 = vadd.f32 %v1144_v40, %v480_v46  ;;  %v609_v49 = vadd.f32 %v1144_v40, %v608_v47  ;;  %v870_v50 = vpop.f32.mrb[18].mxu0  ;;  %v902_v51 = vpop.f32.mrb[18].mxu1 }
 0x14e   :  { %690 = vst.msk [vmem:[#allocation8 + $0x90] sm:$0xff] %vm671_vm0, %v489_v44  ;;  %722 = vst.msk [vmem:[#allocation8 + $0x190] sm:$0xff] %vm671_vm0, %v617_v45  ;;  %v492_v52 = vadd.f32 %v870_v50, %v1144_v40  ;;  %v620_v53 = vadd.f32 %v902_v51, %v1144_v40  ;;  %v483_v54 = vpop.f32.mrb[19].mxu0  ;;  %v611_v55 = vpop.f32.mrb[19].mxu1 }
 0x14f   :  { %688 = vst.msk [vmem:[#allocation8 + $0x80] sm:$0xff] %vm671_vm0, %v481_v48  ;;  %720 = vst.msk [vmem:[#allocation8 + $0x180] sm:$0xff] %vm671_vm0, %v609_v49  ;;  %v484_v56 = vadd.f32 %v1144_v40, %v483_v54  ;;  %v612_v57 = vadd.f32 %v1144_v40, %v611_v55 }
 0x150   :  { %691 = vst.msk [vmem:[#allocation8 + $0x98] sm:$0xff] %vm671_vm0, %v492_v52  ;;  %723 = vst.msk [vmem:[#allocation8 + $0x198] sm:$0xff] %vm671_vm0, %v620_v53 }
 0x151   :  { %689 = vst.msk [vmem:[#allocation8 + $0x88] sm:$0xff] %vm671_vm0, %v484_v56  ;;  %721 = vst.msk [vmem:[#allocation8 + $0x188] sm:$0xff] %vm671_vm0, %v612_v57 }
 0x153   :  { %v873_v58 = vpop.f32.mrb[20].mxu0  ;;  %v905_v59 = vpop.f32.mrb[20].mxu1 }
 0x154   :  { %v505_v60 = vadd.f32 %v873_v58, %v1144_v40  ;;  %v633_v61 = vadd.f32 %v905_v59, %v1144_v40  ;;  %v496_v62 = vpop.f32.mrb[21].mxu0  ;;  %v624_v63 = vpop.f32.mrb[21].mxu1 }
 0x155   :  { %v497_v0 = vadd.f32 %v1144_v40, %v496_v62  ;;  %v625_v1 = vadd.f32 %v1144_v40, %v624_v63  ;;  %v874_v2 = vpop.f32.mrb[22].mxu0  ;;  %v906_v3 = vpop.f32.mrb[22].mxu1 }
 0x156   :  { %694 = vst.msk [vmem:[#allocation8 + $0xb0] sm:$0xff] %vm671_vm0, %v505_v60  ;;  %726 = vst.msk [vmem:[#allocation8 + $0x1b0] sm:$0xff] %vm671_vm0, %v633_v61  ;;  %v508_v4 = vadd.f32 %v874_v2, %v1144_v40  ;;  %v636_v5 = vadd.f32 %v906_v3, %v1144_v40  ;;  %v499_v6 = vpop.f32.mrb[23].mxu0  ;;  %v627_v7 = vpop.f32.mrb[23].mxu1 }
 0x157   :  { %692 = vst.msk [vmem:[#allocation8 + $0xa0] sm:$0xff] %vm671_vm0, %v497_v0  ;;  %724 = vst.msk [vmem:[#allocation8 + $0x1a0] sm:$0xff] %vm671_vm0, %v625_v1  ;;  %v500_v8 = vadd.f32 %v1144_v40, %v499_v6  ;;  %v628_v9 = vadd.f32 %v1144_v40, %v627_v7 }
 0x158   :  { %695 = vst.msk [vmem:[#allocation8 + $0xb8] sm:$0xff] %vm671_vm0, %v508_v4  ;;  %727 = vst.msk [vmem:[#allocation8 + $0x1b8] sm:$0xff] %vm671_vm0, %v636_v5 }
 0x159   :  { %693 = vst.msk [vmem:[#allocation8 + $0xa8] sm:$0xff] %vm671_vm0, %v500_v8  ;;  %725 = vst.msk [vmem:[#allocation8 + $0x1a8] sm:$0xff] %vm671_vm0, %v628_v9 }
 0x15b   :  { %v877_v10 = vpop.f32.mrb[24].mxu0  ;;  %v909_v11 = vpop.f32.mrb[24].mxu1 }
 0x15c   :  { %v521_v12 = vadd.f32 %v877_v10, %v1144_v40  ;;  %v649_v13 = vadd.f32 %v909_v11, %v1144_v40  ;;  %v512_v14 = vpop.f32.mrb[25].mxu0  ;;  %v640_v15 = vpop.f32.mrb[25].mxu1 }
 0x15d   :  { %v513_v16 = vadd.f32 %v1144_v40, %v512_v14  ;;  %v641_v17 = vadd.f32 %v1144_v40, %v640_v15  ;;  %v878_v18 = vpop.f32.mrb[26].mxu0  ;;  %v910_v19 = vpop.f32.mrb[26].mxu1 }
 0x15e   :  { %698 = vst.msk [vmem:[#allocation8 + $0xd0] sm:$0xff] %vm671_vm0, %v521_v12  ;;  %730 = vst.msk [vmem:[#allocation8 + $0x1d0] sm:$0xff] %vm671_vm0, %v649_v13  ;;  %v524_v20 = vadd.f32 %v878_v18, %v1144_v40  ;;  %v652_v21 = vadd.f32 %v910_v19, %v1144_v40  ;;  %v515_v22 = vpop.f32.mrb[27].mxu0  ;;  %v643_v23 = vpop.f32.mrb[27].mxu1 }
 0x15f   :  { %696 = vst.msk [vmem:[#allocation8 + $0xc0] sm:$0xff] %vm671_vm0, %v513_v16  ;;  %728 = vst.msk [vmem:[#allocation8 + $0x1c0] sm:$0xff] %vm671_vm0, %v641_v17  ;;  %v516_v24 = vadd.f32 %v1144_v40, %v515_v22  ;;  %v644_v25 = vadd.f32 %v1144_v40, %v643_v23 }
 0x160   :  { %699 = vst.msk [vmem:[#allocation8 + $0xd8] sm:$0xff] %vm671_vm0, %v524_v20  ;;  %731 = vst.msk [vmem:[#allocation8 + $0x1d8] sm:$0xff] %vm671_vm0, %v652_v21 }
 0x161   :  { %697 = vst.msk [vmem:[#allocation8 + $0xc8] sm:$0xff] %vm671_vm0, %v516_v24  ;;  %729 = vst.msk [vmem:[#allocation8 + $0x1c8] sm:$0xff] %vm671_vm0, %v644_v25 }
 0x163   :  { %v881_v26 = vpop.f32.mrb[28].mxu0  ;;  %v913_v27 = vpop.f32.mrb[28].mxu1 }
 0x164   :  { %v537_v28 = vadd.f32 %v881_v26, %v1144_v40  ;;  %v665_v29 = vadd.f32 %v913_v27, %v1144_v40  ;;  %v528_v30 = vpop.f32.mrb[29].mxu0  ;;  %v656_v31 = vpop.f32.mrb[29].mxu1 }
 0x165   :  { %v529_v32 = vadd.f32 %v1144_v40, %v528_v30  ;;  %v657_v33 = vadd.f32 %v1144_v40, %v656_v31  ;;  %v882_v34 = vpop.f32.mrb[30].mxu0  ;;  %v914_v35 = vpop.f32.mrb[30].mxu1 }
 0x166   :  { %702 = vst.msk [vmem:[#allocation8 + $0xf0] sm:$0xff] %vm671_vm0, %v537_v28  ;;  %734 = vst.msk [vmem:[#allocation8 + $0x1f0] sm:$0xff] %vm671_vm0, %v665_v29  ;;  %v540_v36 = vadd.f32 %v882_v34, %v1144_v40  ;;  %v668_v37 = vadd.f32 %v914_v35, %v1144_v40  ;;  %v531_v38 = vpop.f32.mrb[31].mxu0  ;;  %v659_v39 = vpop.f32.mrb[31].mxu1 }
 0x167   :  { %700 = vst.msk [vmem:[#allocation8 + $0xe0] sm:$0xff] %vm671_vm0, %v529_v32  ;;  %732 = vst.msk [vmem:[#allocation8 + $0x1e0] sm:$0xff] %vm671_vm0, %v657_v33  ;;  %v532_v41 = vadd.f32 %v1144_v40, %v531_v38  ;;  %v660_v42 = vadd.f32 %v1144_v40, %v659_v39 }
 0x168   :  { %703 = vst.msk [vmem:[#allocation8 + $0xf8] sm:$0xff] %vm671_vm0, %v540_v36  ;;  %735 = vst.msk [vmem:[#allocation8 + $0x1f8] sm:$0xff] %vm671_vm0, %v668_v37 }
 0x169   :  { %701 = vst.msk [vmem:[#allocation8 + $0xe8] sm:$0xff] %vm671_vm0, %v532_v41  ;;  %733 = vst.msk [vmem:[#allocation8 + $0x1e8] sm:$0xff] %vm671_vm0, %v660_v42 }
 0x16a   :  { %1056 = shalt.err (!%p1053_p0)
}
 0x16b   :  { %s1057_s26 = scalar_lea.hbm %s1289_s3, 8192 }
 0x16c   :  { %p1058_p1 = scmp.ne.s32.totalorder %s1289_s3, %s1057_s26  ;;  %p1061_p2 = scmp.lt.u32.totalorder %s1057_s26, %s1289_s3 }
 0x16e   :  { %p1063_p3 = pnand %p1061_p2, %p1058_p1 }
 0x170   :  { %1066 = shalt.err (!%p1063_p3)
}
 0x171   :  { %s1079_s4 = smov 128   ;;  %s1080_s5 = smov 8  }
 0x172   :  { %747 = dma.vmem_to_hbm [thread:$0]  %s742_s22, 8192, %s1289_s3, [#allocation4], %s1079_s4, %s1079_s4, %s1080_s5  }
 0x173   :  { %1071 = dma.done.wait [#allocation4], 8192  }
 0x174   :  { %1072 = vsyncadd [#allocation4], 4294959104 }
 0x175   :  { %751 = vsyncpa [#allocation3], 1 }
 0x176   :  { %752 = vsyncpa [#allocation6], 1 }
 0x177   :  { %753 = vsyncpa [#allocation4], 1 }

// kernel: feed_forward.4
= control target key start
LH: loop header
LB: loop body
LE: loop exit
PB: predicated region body
PF: predicated region fallthrough
CT: control target
= control target key end

     0   :  { %s6509_s0 = inlined_call_operand.hbm [shape: bf16[2,16,16,256], index: 0, kind: input, shape index: {}, may-alias: {0,1}]   ;;  %s6510_s1 = inlined_call_operand.hbm [shape: bf16[2,16,16,256], index: 1, kind: input, shape index: {}, may-alias: {0,1}]   ;;  %s6511_s2 = inlined_call_operand.hbm [shape: f32[9,128], index: 2, kind: input, shape index: {}]   ;;  %s6512_s3 = inlined_call_operand.hbm [shape: f32[9,128], index: 3, kind: input, shape index: {}]   ;;  %s6513_s4 = inlined_call_operand.hbm [shape: f32[1,128], index: 4, kind: input, shape index: {}]   ;;  %s6514_s5 = inlined_call_operand.hbm [shape: f32[1,128], index: 5, kind: input, shape index: {}]   ;;  %s6515_s6 = inlined_call_operand.hbm [shape: bf16[2,16,16,128], index: 6, kind: output, shape index: {}]  }
   0x1   :  { %6683 = sst [smem:[#allocation56_spill]] %s6509_s0 }
   0x2   :  { %6684 = sst [smem:[#allocation57_spill]] %s6511_s2 }
   0x3   :  { %6685 = sst [smem:[#allocation58_spill]] %s6512_s3 }
   0x4   :  { %6686 = sst [smem:[#allocation59_spill]] %s6513_s4 }
   0x5   :  { %6687 = sst [smem:[#allocation60_spill]] %s6514_s5 }
   0x6   :  { %11 = vsyncpa [#allocation7], 0 }
   0x7   :  { %13 = vsyncpa [#allocation7 + $0x1], 0 }
   0x8   :  { %14 = vsyncpa [#allocation10], 0 }
   0x9   :  { %16 = vsyncpa [#allocation10 + $0x1], 0 }
   0xa   :  { %17 = vsyncpa [#allocation13], 0 }
   0xb   :  { %18 = vsyncpa [#allocation16], 0 }
   0xc   :  { %19 = vsyncpa [#allocation8], 0 }
   0xd   :  { %21 = vsyncpa [#allocation8 + $0x1], 0  ;;  %s4101_s21 = smov 0   ;;  %s4103_s22 = smov 0  }
   0xe   :  { %s4105_s23 = smov 0   ;;  %s4107_s24 = smov 0  }
   0xf   :  { %s4109_s25 = smov 0   ;;  %s4111_s26 = smov 0  }
  0x10 LB: > { %6688 = sst [smem:[#allocation24_spill]] %s4030_s21  ;;  %s4132_s27 = sadd.s32 4294967295, %s4050_s26   ;;  %s4050_s26 = sphi %s4111_s26, %s27_s26   ;;  %s4046_s25 = sphi %s4109_s25, %s6939_s25   ;;  %s4042_s24 = sphi %s4107_s24, %s6938_s24   ;;  %s4038_s23 = sphi %s4105_s23, %s6937_s23   ;;  %s4034_s22 = sphi %s4103_s22, %s6936_s22   ;;  %s4030_s21 = sphi %s4101_s21, %s6935_s21  }
  0x11   : > { %s3159_s28 = sadd.s32 4294967294, %s4050_s26   ;;  %p61_p0 = scmp.ne.s32.totalorder %s4034_s22, %s4030_s21 }
  0x12   : > { %p6516_p1 = scmp.eq.s32.totalorder %s4132_s27, 0  ;;  %p227_p3 = scmp.eq.s32.totalorder %s3159_s28, 1 }
  0x13   : > { %p3160_p5 = scmp.ge.s32.totalorder %s4050_s26, 1  ;;  %p234_p7 = scmp.lt.s32.totalorder %s4050_s26, 3 }
  0x14   : > { %p4141_p4 = por %p6516_p1, %p61_p0  ;;  %p4146_p6 = por %p227_p3, %p61_p0 }
  0x15   : > { %p4151_p8 = pnand %p3160_p5, %p234_p7  ;;  %s4052_s8 = smov [#allocation11]  }
  0x16   : > { %s6689_s29 = scalar_select %p4141_p4, 1, 0 }
  0x17   : > { %s6690_s30 = scalar_select %p4146_p6, 1, 0 }
  0x18   : > { %s6692_s7 = scalar_select %p4151_p8, 1, 0 }
  0x19   : > { %6691 = sst [smem:[#allocation25_spill]] %s6690_s30  ;;  %s248_s9 = sshll.u32 %s4052_s8, 4  ;;  %s4155_s9 = int_to_ptr.vmem [resolvable:$true] %s248_s9 }
  0x1a   : > { %p3547_p9 = pneg %p4151_p8  ;;  %s4053_s11 = smov [#allocation12]  }
  0x1b   : > { %s263_s12 = sshll.u32 %s4053_s11, 4  ;;  %s4054_s13 = smov [#allocation14]   ;;  %s4166_s12 = int_to_ptr.vmem [resolvable:$true] %s263_s12 }
  0x1c   : > { %p4162_p11 = pnand %p3547_p9, %p6516_p1  ;;  %s4168_s14 = sshll.u32 %s4054_s13, 4  ;;  %s280_s14 = int_to_ptr.vmem [resolvable:$true] %s4168_s14 }
  0x1d   : > { %s6694_s2 = sld [smem:[#allocation57_spill]] }
  0x1e   : > { %p4178_p13 = pneg %p4162_p11 }
  0x23   : > { %s3779_s17 = scalar_lea.hbm %s6694_s2, 256 }
  0x24   : > { %p3780_p12 = scmp.ne.s32.totalorder %s6694_s2, %s3779_s17  ;;  %p3786_p5 = scmp.lt.u32.totalorder %s3779_s17, %s6694_s2 }
  0x26   : > { %p3782_p0 = pnand %p4178_p13, %p3780_p12 }
  0x28   : > { %p3783_p3 = pneg %p3782_p0 }
  0x2a   : > { %p3788_p7 = pnand %p3786_p5, %p3783_p3 }
  0x2c   : > { %3791 = shalt.err (!%p3788_p7)
}
  0x2d   : > { %s3792_s11 = scalar_lea.vmem %s4155_s9, 256  ;;  %p3800_p2 = scmp.lt.s32.totalorder %s4155_s9, %s4155_s9 }
  0x2e   : > { %p3793_p9 = scmp.ne.s32.totalorder %s4155_s9, %s3792_s11  ;;  %p3801_p6 = scmp.lt.s32.totalorder %s3792_s11, %s3792_s11 }
  0x30   : > { %p3795_p10 = pnand %p3793_p9, %p4178_p13  ;;  %p3802_p12 = por %p3801_p6, %p3800_p2 }
  0x32   : > { %p3796_p1 = pneg %p3795_p10 }
  0x34   : > { %p3803_p0 = pnand %p3802_p12, %p3796_p1 }
  0x36   : > { %3806 = shalt.err (!%p3803_p0)
}
  0x37   : > { %s4055_s13 = smov 128   ;;  %s4056_s15 = smov 8  }
  0x38   : > { %3550 = dma.hbm_to_vmem [thread:$0]  (!%p4162_p11), %s6694_s2, 256, %s4155_s9, [#allocation10], %s4055_s13, %s4055_s13, %s4056_s15  }
  0x39   : > { %s6696_s3 = sld [smem:[#allocation58_spill]] }
  0x3f   : > { %s3807_s28 = scalar_lea.hbm %s6696_s3, 256 }
  0x40   : > { %p3808_p1 = scmp.ne.s32.totalorder %s6696_s3, %s3807_s28  ;;  %p3814_p10 = scmp.lt.u32.totalorder %s3807_s28, %s6696_s3 }
  0x42   : > { %p3810_p2 = pnand %p3808_p1, %p4178_p13 }
  0x44   : > { %p3811_p6 = pneg %p3810_p2 }
  0x46   : > { %p3816_p3 = pnand %p3814_p10, %p3811_p6 }
  0x48   : > { %3819 = shalt.err (!%p3816_p3)
}
  0x49   : > { %s3820_s9 = scalar_lea.vmem %s4166_s12, 256  ;;  %p3828_p12 = scmp.lt.s32.totalorder %s4166_s12, %s4166_s12 }
  0x4a   : > { %p3821_p5 = scmp.ne.s32.totalorder %s4166_s12, %s3820_s9  ;;  %p3829_p0 = scmp.lt.s32.totalorder %s3820_s9, %s3820_s9 }
  0x4c   : > { %p3823_p7 = pnand %p3821_p5, %p4178_p13  ;;  %p3830_p1 = por %p3829_p0, %p3828_p12 }
  0x4e   : > { %p3824_p9 = pneg %p3823_p7 }
  0x50   : > { %p3831_p2 = pnand %p3830_p1, %p3824_p9 }
  0x52   : > { %3834 = shalt.err (!%p3831_p2)
}
  0x53   : > { %3553 = dma.hbm_to_vmem [thread:$0]  (!%p4162_p11), %s6696_s3, 256, %s4166_s12, [#allocation13], %s4055_s13, %s4055_s13, %s4056_s15  }
  0x54   : > { %s6697_s4 = sld [smem:[#allocation59_spill]] }
  0x5a   : > { %s3835_s18 = scalar_lea.hbm %s6697_s4, 16 }
  0x5b   : > { %p3836_p6 = scmp.ne.s32.totalorder %s6697_s4, %s3835_s18  ;;  %p3842_p5 = scmp.lt.u32.totalorder %s3835_s18, %s6697_s4 }
  0x5d   : > { %p3838_p10 = pnand %p3836_p6, %p4178_p13 }
  0x5f   : > { %p3839_p3 = pneg %p3838_p10 }
  0x61   : > { %p3844_p7 = pnand %p3842_p5, %p3839_p3 }
  0x63   : > { %3847 = shalt.err (!%p3844_p7)
}
  0x64   : > { %s3848_s9 = scalar_lea.vmem %s280_s14, 16  ;;  %s3855_s12 = scalar_lea.vmem %s280_s14, 32 }
  0x65   : > { %p3849_p9 = scmp.ne.s32.totalorder %s280_s14, %s3848_s9  ;;  %p3856_p1 = scmp.lt.s32.totalorder %s280_s14, %s280_s14 }
  0x66   : > { %p3857_p2 = scmp.lt.s32.totalorder %s3855_s12, %s3848_s9 }
  0x67   : > { %p3851_p12 = pnand %p3849_p9, %p4178_p13 }
  0x68   : > { %p3858_p4 = por %p3857_p2, %p3856_p1 }
  0x69   : > { %p3852_p0 = pneg %p3851_p12 }
  0x6b   : > { %p3859_p8 = pnand %p3858_p4, %p3852_p0 }
  0x6d   : > { %3862 = shalt.err (!%p3859_p8)
}
  0x6e   : > { %3556 = dma.hbm_to_vmem [thread:$0]  (!%p4162_p11), %s6697_s4, 16, %s280_s14, [#allocation13]  }
  0x6f   : > { %s4057_s30 = smov [#allocation15]   ;;  %s6698_s5 = sld [smem:[#allocation60_spill]] }
  0x70   : > { %s292_s16 = sshll.u32 %s4057_s30, 4  ;;  %s293_s16 = int_to_ptr.vmem [resolvable:$true] %s292_s16 }
  0x75   : > { %s3863_s19 = scalar_lea.hbm %s6698_s5, 16 }
  0x76   : > { %p3864_p6 = scmp.ne.s32.totalorder %s6698_s5, %s3863_s19  ;;  %p3870_p10 = scmp.lt.u32.totalorder %s3863_s19, %s6698_s5 }
  0x78   : > { %p3866_p4 = pnand %p3864_p6, %p4178_p13 }
  0x7a   : > { %p3867_p8 = pneg %p3866_p4 }
  0x7c   : > { %p3872_p3 = pnand %p3870_p10, %p3867_p8 }
  0x7e   : > { %3875 = shalt.err (!%p3872_p3)
}
  0x7f   : > { %s3876_s14 = scalar_lea.vmem %s293_s16, 16  ;;  %s3883_s12 = scalar_lea.vmem %s293_s16, 32 }
  0x80   : > { %p3877_p5 = scmp.ne.s32.totalorder %s293_s16, %s3876_s14  ;;  %p3884_p12 = scmp.lt.s32.totalorder %s293_s16, %s293_s16 }
  0x81   : > { %p3885_p0 = scmp.lt.s32.totalorder %s3883_s12, %s3876_s14 }
  0x82   : > { %p3879_p7 = pnand %p3877_p5, %p4178_p13 }
  0x83   : > { %p3886_p1 = por %p3885_p0, %p3884_p12 }
  0x84   : > { %p3880_p9 = pneg %p3879_p7 }
  0x86   : > { %p3887_p2 = pnand %p3886_p1, %p3880_p9 }
  0x88   : > { %3890 = shalt.err (!%p3887_p2)
}
  0x89   : > { %3559 = dma.hbm_to_vmem [thread:$0]  (!%p4162_p11), %s6698_s5, 16, %s293_s16, [#allocation16]  }
  0x8a   : > { %s39_s20 = sadd.s32 1, %s4046_s25  ;;  %s48_s30 = sadd.s32 1, %s4038_s23 }
  0x8b   : > { %p41_p13 = scmp.ge.s32.totalorder %s39_s20, 2  ;;  %p55_p6 = scmp.ne.s32.totalorder %s4038_s23, %s4034_s22 }
  0x8c   : > { %p56_p4 = scmp.eq.s32.totalorder %s4050_s26, 0  ;;  %p3575_p8 = scmp.lt.s32.totalorder %s4050_s26, 2 }
  0x8d   : > { %s6941_s20 = smov (%p41_p13, %s39_s20), 0  ;;  %p6699_p3 = scmp.eq.s32.totalorder %s4132_s27, 1 }
  0x8e   : > { %p57_p10 = por %p56_p4, %p55_p6  ;;  %s43_s17 = ssub.s32 %s4046_s25, %s6941_s20 }
  0x8f   : > { %p4273_p5 = por %p6699_p3, %p55_p6  ;;  %s303_s18 = sand.u32 1, %s4038_s23  }
  0x90   : > { %p46_p11 = scmp.eq.s32.totalorder %s43_s17, 0  ;;  %s4280_s16 = sshll.u32 %s303_s18, 7 }
  0x91   : > { %s6521_s19 = sshll.u32 %s4046_s25, 12  ;;  %s6701_s0 = sld [smem:[#allocation56_spill]] }
  0x92   : > { %s4284_s28 = scalar_select %p46_p11, %s4038_s23, %s48_s30  }
  0x93   : > { %s307_s14 = scalar_lea.vmem [#allocation6], %s4280_s16  ;;  %p4296_p7 = pnand %p3575_p8, %p57_p10 }
  0x94   : > { %s315_s12 = sshll.u32 %s307_s14, 4  ;;  %s4302_s21 = scalar_lea.sflag [#allocation7], %s303_s18  ;;  %s4300_s12 = int_to_ptr.vmem [resolvable:$true] %s315_s12 }
  0x95   : > { %p3893_p12 = pneg %p4296_p7 }
  0x97   : > { %s4291_s9 = scalar_lea.hbm %s6701_s0, %s6521_s19  ;;  %s3896_s11 = scalar_lea.hbm %s6701_s0, 8192 }
  0x98   : > { %s3891_s30 = scalar_lea.hbm %s4291_s9, 2048  ;;  %p3897_p2 = scmp.lt.u32.totalorder %s4291_s9, %s6701_s0 }
  0x99   : > { %p3892_p9 = scmp.ne.s32.totalorder %s4291_s9, %s3891_s30  ;;  %p3898_p13 = scmp.lt.u32.totalorder %s3896_s11, %s3891_s30 }
  0x9a   : > { %p3900_p4 = scmp.lt.u32.totalorder %s3891_s30, %s4291_s9 }
  0x9b   : > { %p3894_p0 = pnand %p3893_p12, %p3892_p9  ;;  %p3899_p6 = por %p3898_p13, %p3897_p2 }
  0x9d   : > { %p3895_p1 = pneg %p3894_p0  ;;  %p3901_p8 = por %p3900_p4, %p3899_p6 }
  0x9f   : > { %p3902_p10 = pnand %p3901_p8, %p3895_p1 }
  0xa1   : > { %3905 = shalt.err (!%p3902_p10)
}
  0xa2   : > { %s3906_s18 = scalar_lea.vmem %s4300_s12, 2048  ;;  %s4058_s17 = smov [#allocation6]  }
  0xa3   : > { %p3907_p3 = scmp.ne.s32.totalorder %s4300_s12, %s3906_s18  ;;  %s3911_s8 = sshll.u32 %s4058_s17, 4  ;;  %s3912_s8 = int_to_ptr.vmem [resolvable:$false] %s3911_s8 }
  0xa4   : > { %s3913_s19 = scalar_lea.vmem %s3912_s8, 4096  ;;  %p3914_p0 = scmp.lt.s32.totalorder %s4300_s12, %s3912_s8 }
  0xa5   : > { %p3909_p11 = pnand %p3907_p3, %p3893_p12  ;;  %p3915_p2 = scmp.lt.s32.totalorder %s3913_s19, %s3906_s18 }
  0xa7   : > { %p3910_p9 = pneg %p3909_p11  ;;  %p3916_p13 = por %p3915_p2, %p3914_p0 }
  0xa9   : > { %p3917_p6 = pnand %p3916_p13, %p3910_p9 }
  0xab   : > { %3920 = shalt.err (!%p3917_p6)
}
  0xac   : > { %s4059_s30 = smov 64   ;;  %s4060_s11 = smov 4  }
  0xad   : > { %3563 = dma.hbm_to_vmem [thread:$0]  (!%p4296_p7), %s4291_s9, 2048, %s4300_s12, %s4302_s21, %s4055_s13, %s4059_s30, %s4060_s11  }
  0xae   : > { %s6703_s14 = sshll.u32 %s4046_s25, 12  ;;  %s329_s0 = scalar_lea.vmem [#allocation9], %s4280_s16 }
  0xaf   : > { %s3054_s8 = scalar_lea.hbm %s6510_s1, %s6703_s14  ;;  %s338_s2 = sshll.u32 %s329_s0, 4  ;;  %s4341_s2 = int_to_ptr.vmem [resolvable:$true] %s338_s2 }
  0xb0   : > { %s4338_s19 = scalar_lea.hbm %s3054_s8, 64  ;;  %s325_s3 = sand.u32 1, %s4050_s26  }
  0xb1   : > { %s4344_s4 = scalar_lea.sflag [#allocation10], %s325_s3  ;;  %s3951_s5 = scalar_lea.hbm %s3054_s8, 2112 }
  0xb2   : > { %p3922_p1 = scmp.ne.s32.totalorder %s4338_s19, %s3951_s5  ;;  %s3926_s21 = scalar_lea.hbm %s6510_s1, 8192 }
  0xb3   : > { %p3927_p10 = scmp.lt.u32.totalorder %s4338_s19, %s6510_s1  ;;  %p3928_p3 = scmp.lt.u32.totalorder %s3926_s21, %s3951_s5 }
  0xb4   : > { %p3924_p4 = pnand %p3922_p1, %p3893_p12  ;;  %p3930_p9 = scmp.lt.u32.totalorder %s3951_s5, %s4338_s19 }
  0xb5   : > { %p3929_p11 = por %p3928_p3, %p3927_p10 }
  0xb6   : > { %p3925_p8 = pneg %p3924_p4 }
  0xb7   : > { %p3931_p0 = por %p3930_p9, %p3929_p11 }
  0xb9   : > { %p3932_p2 = pnand %p3931_p0, %p3925_p8 }
  0xbb   : > { %3935 = shalt.err (!%p3932_p2)
}
  0xbc   : > { %s3936_s0 = scalar_lea.vmem %s4341_s2, 2048  ;;  %s4061_s3 = smov [#allocation9]  }
  0xbd   : > { %p3937_p13 = scmp.ne.s32.totalorder %s4341_s2, %s3936_s0  ;;  %s3941_s16 = sshll.u32 %s4061_s3, 4  ;;  %s3942_s16 = int_to_ptr.vmem [resolvable:$false] %s3941_s16 }
  0xbe   : > { %s3943_s17 = scalar_lea.vmem %s3942_s16, 4096  ;;  %p3944_p4 = scmp.lt.s32.totalorder %s4341_s2, %s3942_s16 }
  0xbf   : > { %p3939_p6 = pnand %p3937_p13, %p3893_p12  ;;  %p3945_p10 = scmp.lt.s32.totalorder %s3943_s17, %s3936_s0 }
  0xc1   : > { %p3940_p1 = pneg %p3939_p6  ;;  %p3946_p3 = por %p3945_p10, %p3944_p4 }
  0xc3   : > { %p3947_p11 = pnand %p3946_p3, %p3940_p1 }
  0xc5   : > { %3950 = shalt.err (!%p3947_p11)
}
  0xc6   : > { %3566 = dma.hbm_to_vmem [thread:$0]  (!%p4296_p7), %s4338_s19, 2048, %s4341_s2, %s4344_s4, %s4055_s13, %s4059_s30, %s4060_s11  }
  0xc7   : > { %p6704_p12 = scmp.ne.s32.totalorder %s6692_s7, 0 }
  0xc9   : > { %350 = sbr.rel (%p6704_p12) target bundleno = 683 (0x2ab), region = 44 }
  0xd0   : > { %s4375_s5 = sand.u32 1, %s4034_s22   ;;  %p6705_p8 = scmp.ne.s32.totalorder %s6689_s29, 0 }
  0xd1   : > { %s4378_s8 = sshll.u32 %s4375_s5, 7  ;;  %s353_s15 = scalar_lea.sflag [#allocation7], %s4375_s5 }
  0xd2   : > { %s4382_s9 = scalar_lea.vmem [#allocation6], %s4378_s8 }
  0xd3   : > { %4005 = dma.done.wait (%p6705_p8), %s353_s15, 2048  }
  0xd4   : > { %4007 = vsyncadd (%p6705_p8), %s353_s15, 4294965248  ;;  %s361_s2 = sand.u32 1, %s4132_s27   ;;  %s4390_s7 = scalar_lea.vmem [#allocation9], %s4378_s8 }
  0xd5   : > { %s362_s4 = scalar_lea.sflag [#allocation10], %s361_s2 }
  0xd6   : > { %4009 = dma.done.wait (%p6705_p8), %s362_s4, 2048  }
  0xd7   : > { %4011 = vsyncadd (%p6705_p8), %s362_s4, 4294965248  ;;  %p6706_p7 = scmp.eq.s32.totalorder %s4132_s27, 0 }
  0xd9   : > { %4013 = dma.done.wait (%p6706_p7), [#allocation10], 256   ;;  %p6707_p9 = pmov %p6706_p7 }
  0xda   : > { %p6708_p0 = pmov %p6706_p7 }
  0xdb   : > { %4015 = vsyncadd (%p6707_p9), [#allocation10], 4294967040 }
  0xdc   : > { %4017 = dma.done.wait (%p6708_p0), [#allocation13], 272   ;;  %p6709_p2 = pmov %p6708_p0 }
  0xdd   : > { %p6710_p13 = pmov %p6708_p0 }
  0xde   : > { %4019 = vsyncadd (%p6709_p2), [#allocation13], 4294967024 }
  0xdf   : > { %4021 = dma.done.wait (%p6710_p13), [#allocation16], 16   ;;  %p6711_p6 = pmov %p6708_p0 }
  0xe0   : > { %v4062_v0 = vmov 0.0   ;;  %v3273_v1 = vld [vmem:[%s4382_s9] sm:$0xff]   ;;  %v3480_v2 = vld [vmem:[%s4382_s9 + $0x8] sm:$0xff]   ;;  %v3481_v3 = vld [vmem:[%s4382_s9 + $0x10] sm:$0xff]   ;;  %s4831_s27 = scalar_lea.vmem [#allocation17], %s4378_s8  ;;  %s3271_s29 = sshll.u32 %s4042_s24, 11 }
  0xe1   : > { %4023 = vsyncadd (%p6711_p6), [#allocation16], 4294967280  ;;  %416 = vst [vmem:[#allocation2] sm:$0xff] %v4062_v0  ;;  %v4475_v4 = vunpack.c.l.bf16 %v3273_v1  ;;  %v4477_v5 = vunpack.c.h.bf16 %v3273_v1  ;;  %v4479_v6 = vunpack.c.l.bf16 %v3480_v2  ;;  %v4481_v7 = vunpack.c.h.bf16 %v3480_v2  ;;  %v3482_v8 = vld [vmem:[%s4382_s9 + $0x18] sm:$0xff]   ;;  %v3483_v9 = vld [vmem:[%s4382_s9 + $0x20] sm:$0xff]   ;;  %s3001_s13 = sshll.u32 %s4831_s27, 4  ;;  %s6457_s19 = scalar_lea.hbm %s6515_s6, %s3271_s29  ;;  %s6459_s13 = int_to_ptr.vmem [resolvable:$true] %s3001_s13 }
  0xe2   : > { %419 = vst [vmem:[#allocation2 + $0x18] sm:$0xff] %v4062_v0  ;;  %420 = vst [vmem:[#allocation2 + $0x20] sm:$0xff] %v4062_v0  ;;  %v3484_v10 = vld [vmem:[%s4382_s9 + $0x28] sm:$0xff]   ;;  %v4486_v11 = vunpack.c.l.bf16 %v3481_v3  ;;  %v4488_v12 = vunpack.c.h.bf16 %v3481_v3  ;;  %v4490_v13 = vunpack.c.l.bf16 %v3482_v8  ;;  %v4492_v14 = vunpack.c.h.bf16 %v3482_v8  ;;  %v3485_v15 = vld [vmem:[%s4382_s9 + $0x30] sm:$0xff]   ;;  %s2987_s12 = scalar_lea.sflag [#allocation8], %s4375_s5  ;;  %s3952_s21 = scalar_lea.vmem %s6459_s13, 2048 }
  0xe3   : > { %423 = vst [vmem:[#allocation2 + $0x38] sm:$0xff] %v4062_v0  ;;  %424 = vst [vmem:[#allocation2 + $0x40] sm:$0xff] %v4062_v0  ;;  %v3486_v16 = vld [vmem:[%s4382_s9 + $0x38] sm:$0xff]   ;;  %v3487_v17 = vld [vmem:[%s4382_s9 + $0x40] sm:$0xff]   ;;  %v3290_v18 = vunpack.c.l.bf16 %v3483_v9  ;;  %v3291_v19 = vunpack.c.h.bf16 %v3483_v9  ;;  %v3294_v20 = vunpack.c.l.bf16 %v3484_v10  ;;  %v3295_v21 = vunpack.c.h.bf16 %v3484_v10  ;;  %p3953_p1 = scmp.ne.s32.totalorder %s6459_s13, %s3952_s21  ;;  %s4063_s24 = smov [#allocation17]  }
  0xe4   : > { %427 = vst [vmem:[#allocation2 + $0x58] sm:$0xff] %v4062_v0  ;;  %428 = vst [vmem:[#allocation2 + $0x60] sm:$0xff] %v4062_v0  ;;  %v3488_v22 = vld [vmem:[%s4382_s9 + $0x48] sm:$0xff]   ;;  %v3489_v23 = vld [vmem:[%s4382_s9 + $0x50] sm:$0xff]   ;;  %v3298_v25 = vunpack.c.l.bf16 %v3485_v15  ;;  %v3299_v26 = vunpack.c.h.bf16 %v3485_v15  ;;  %v3302_v27 = vunpack.c.l.bf16 %v3486_v16  ;;  %v3303_v28 = vunpack.c.h.bf16 %v3486_v16  ;;  %s3956_s14 = sshll.u32 %s4063_s24, 4  ;;  %s3957_s14 = int_to_ptr.vmem [resolvable:$false] %s3956_s14 }
  0xe5   : > { %431 = vst [vmem:[#allocation2 + $0x78] sm:$0xff] %v4062_v0  ;;  %432 = vst [vmem:[#allocation2 + $0x80] sm:$0xff] %v4062_v0  ;;  %v3490_v24 = vld [vmem:[%s4382_s9 + $0x58] sm:$0xff]   ;;  %v3491_v29 = vld [vmem:[%s4382_s9 + $0x60] sm:$0xff]   ;;  %v3306_v31 = vunpack.c.l.bf16 %v3487_v17  ;;  %v3307_v32 = vunpack.c.h.bf16 %v3487_v17  ;;  %v3310_v33 = vunpack.c.l.bf16 %v3488_v22  ;;  %v3311_v34 = vunpack.c.h.bf16 %v3488_v22  ;;  %p3954_p4 = pnand %p3953_p1, %p4273_p5  ;;  %s3958_s18 = scalar_lea.vmem %s3957_s14, 4096 }
  0xe6   : > { %435 = vst [vmem:[#allocation2 + $0x98] sm:$0xff] %v4062_v0  ;;  %436 = vst [vmem:[#allocation2 + $0xa0] sm:$0xff] %v4062_v0  ;;  %v3492_v30 = vld [vmem:[%s4382_s9 + $0x68] sm:$0xff]   ;;  %v4511_v35 = vld [vmem:[%s4382_s9 + $0x70] sm:$0xff]   ;;  %v3314_v37 = vunpack.c.l.bf16 %v3489_v23  ;;  %v3315_v38 = vunpack.c.h.bf16 %v3489_v23  ;;  %v3318_v39 = vunpack.c.l.bf16 %v3490_v24  ;;  %v3319_v40 = vunpack.c.h.bf16 %v3490_v24  ;;  %p3959_p3 = scmp.lt.s32.totalorder %s6459_s13, %s3957_s14  ;;  %p3960_p11 = scmp.lt.s32.totalorder %s3958_s18, %s3952_s21 }
  0xe7   : > { %439 = vst [vmem:[#allocation2 + $0xb8] sm:$0xff] %v4062_v0  ;;  %440 = vst [vmem:[#allocation2 + $0xc0] sm:$0xff] %v4062_v0  ;;  %v4514_v36 = vld [vmem:[%s4382_s9 + $0x78] sm:$0xff]   ;;  %v3495_v41 = vld [vmem:[%s4390_s7 + $0x8] sm:$0xff]   ;;  %v3322_v43 = vunpack.c.l.bf16 %v3491_v29  ;;  %v3323_v44 = vunpack.c.h.bf16 %v3491_v29  ;;  %v3326_v45 = vunpack.c.l.bf16 %v3492_v30  ;;  %v3327_v46 = vunpack.c.h.bf16 %v3492_v30  ;;  %p3955_p10 = pneg %p3954_p4 }
  0xe8   : > { %443 = vst [vmem:[#allocation2 + $0xd8] sm:$0xff] %v4062_v0  ;;  %444 = vst [vmem:[#allocation2 + $0xe0] sm:$0xff] %v4062_v0  ;;  %v3496_v42 = vld [vmem:[%s4390_s7 + $0x10] sm:$0xff]   ;;  %v3497_v47 = vld [vmem:[%s4390_s7 + $0x18] sm:$0xff]   ;;  %v6527_v49 = vunpack.c.l.bf16 %v4511_v35  ;;  %v6526_v50 = vunpack.c.h.bf16 %v4511_v35  ;;  %v3334_v51 = vunpack.c.l.bf16 %v4514_v36  ;;  %v3335_v52 = vunpack.c.h.bf16 %v4514_v36  ;;  %p3961_p12 = por %p3960_p11, %p3959_p3 }
  0xe9   : > { %447 = vst [vmem:[#allocation2 + $0xf8] sm:$0xff] %v4062_v0  ;;  %448 = vst [vmem:[#allocation2 + $0x100] sm:$0xff] %v4062_v0  ;;  %v3498_v48 = vld [vmem:[%s4390_s7 + $0x20] sm:$0xff]   ;;  %v3499_v53 = vld [vmem:[%s4390_s7 + $0x28] sm:$0xff]   ;;  %v4526_v55 = vunpack.c.l.bf16 %v3495_v41  ;;  %v4528_v56 = vunpack.c.h.bf16 %v3495_v41  ;;  %v4530_v57 = vunpack.c.l.bf16 %v3496_v42  ;;  %v4532_v58 = vunpack.c.h.bf16 %v3496_v42 }
  0xea   : > { %451 = vst [vmem:[#allocation2 + $0x118] sm:$0xff] %v4062_v0  ;;  %452 = vst [vmem:[#allocation2 + $0x120] sm:$0xff] %v4062_v0  ;;  %v3500_v54 = vld [vmem:[%s4390_s7 + $0x30] sm:$0xff]   ;;  %v3501_v59 = vld [vmem:[%s4390_s7 + $0x38] sm:$0xff]   ;;  %v4544_v61 = vunpack.c.l.bf16 %v3497_v47  ;;  %v4546_v62 = vunpack.c.h.bf16 %v3497_v47  ;;  %v3354_v63 = vunpack.c.l.bf16 %v3498_v48  ;;  %v3358_v3 = vunpack.c.l.bf16 %v3499_v53  ;;  %p3962_p8 = pnand %p3961_p12, %p3955_p10 }
  0xeb   : > { %455 = vst [vmem:[#allocation2 + $0x138] sm:$0xff] %v4062_v0  ;;  %456 = vst [vmem:[#allocation2 + $0x140] sm:$0xff] %v4062_v0  ;;  %v3502_v60 = vld [vmem:[%s4390_s7 + $0x40] sm:$0xff]   ;;  %v3503_v1 = vld [vmem:[%s4390_s7 + $0x48] sm:$0xff]   ;;  %v3359_v8 = vunpack.c.h.bf16 %v3499_v53  ;;  %v3362_v9 = vunpack.c.l.bf16 %v3500_v54  ;;  %v3363_v10 = vunpack.c.h.bf16 %v3500_v54  ;;  %v3366_v17 = vunpack.c.l.bf16 %v3501_v59 }
  0xec   : > { %459 = vst [vmem:[#allocation2 + $0x158] sm:$0xff] %v4062_v0  ;;  %460 = vst [vmem:[#allocation2 + $0x160] sm:$0xff] %v4062_v0  ;;  %v3504_v2 = vld [vmem:[%s4390_s7 + $0x50] sm:$0xff]   ;;  %v3505_v15 = vld [vmem:[%s4390_s7 + $0x58] sm:$0xff]   ;;  %v3374_v23 = vunpack.c.l.bf16 %v3503_v1  ;;  %v3375_v24 = vunpack.c.h.bf16 %v3503_v1 }
  0xed   : > { %463 = vst [vmem:[#allocation2 + $0x178] sm:$0xff] %v4062_v0  ;;  %464 = vst [vmem:[#allocation2 + $0x180] sm:$0xff] %v4062_v0  ;;  %v3506_v16 = vld [vmem:[%s4390_s7 + $0x60] sm:$0xff]   ;;  %v3382_v29 = vunpack.c.l.bf16 %v3505_v15  ;;  %v3383_v30 = vunpack.c.h.bf16 %v3505_v15 }
  0xee   : > { %467 = vst [vmem:[#allocation2 + $0x198] sm:$0xff] %v4062_v0  ;;  %468 = vst [vmem:[#allocation2 + $0x1a0] sm:$0xff] %v4062_v0  ;;  %v3337_v22 = vld [vmem:[%s4390_s7] sm:$0xff]  }
  0xef   : > { %471 = vst [vmem:[#allocation2 + $0x1b8] sm:$0xff] %v4062_v0  ;;  %472 = vst [vmem:[#allocation2 + $0x1c0] sm:$0xff] %v4062_v0  ;;  %v4574_v41 = vunpack.c.h.bf16 %v3337_v22  ;;  %v4586_v53 = vld [vmem:[#allocation11 + $0x4] ss:$0 sm:$0xff]  ;;  %v4588_v54 = vld [vmem:[#allocation11 + $0x6] ss:$0 sm:$0xff] }
  0xf0   : > { %475 = vst [vmem:[#allocation2 + $0x1d8] sm:$0xff] %v4062_v0  ;;  %476 = vst [vmem:[#allocation2 + $0x1e0] sm:$0xff] %v4062_v0  ;;  %v4600_v1 = vld [vmem:[#allocation11 + $0x7] ss:$0 sm:$0xff] }
  0xf1   : > { %479 = vst [vmem:[#allocation2 + $0x1f8] sm:$0xff] %v4062_v0  ;;  %480 = vst [vmem:[#allocation3] sm:$0xff] %v4062_v0 }
  0xf2   : > { %483 = vst [vmem:[#allocation3 + $0x18] sm:$0xff] %v4062_v0  ;;  %484 = vst [vmem:[#allocation3 + $0x20] sm:$0xff] %v4062_v0 }
  0xf3   : > { %487 = vst [vmem:[#allocation3 + $0x38] sm:$0xff] %v4062_v0  ;;  %488 = vst [vmem:[#allocation3 + $0x40] sm:$0xff] %v4062_v0 }
  0xf4   : > { %491 = vst [vmem:[#allocation3 + $0x58] sm:$0xff] %v4062_v0  ;;  %492 = vst [vmem:[#allocation3 + $0x60] sm:$0xff] %v4062_v0 }
  0xf5   : > { %495 = vst [vmem:[#allocation3 + $0x78] sm:$0xff] %v4062_v0  ;;  %496 = vst [vmem:[#allocation3 + $0x80] sm:$0xff] %v4062_v0 }
  0xf6   : > { %499 = vst [vmem:[#allocation3 + $0x98] sm:$0xff] %v4062_v0  ;;  %500 = vst [vmem:[#allocation3 + $0xa0] sm:$0xff] %v4062_v0 }
  0xf7   : > { %503 = vst [vmem:[#allocation3 + $0xb8] sm:$0xff] %v4062_v0  ;;  %504 = vst [vmem:[#allocation3 + $0xc0] sm:$0xff] %v4062_v0 }
  0xf8   : > { %507 = vst [vmem:[#allocation3 + $0xd8] sm:$0xff] %v4062_v0  ;;  %508 = vst [vmem:[#allocation3 + $0xe0] sm:$0xff] %v4062_v0 }
  0xf9   : > { %511 = vst [vmem:[#allocation3 + $0xf8] sm:$0xff] %v4062_v0  ;;  %512 = vst [vmem:[#allocation3 + $0x100] sm:$0xff] %v4062_v0 }
  0xfa   : > { %515 = vst [vmem:[#allocation3 + $0x118] sm:$0xff] %v4062_v0  ;;  %516 = vst [vmem:[#allocation3 + $0x120] sm:$0xff] %v4062_v0 }
  0xfb   : > { %519 = vst [vmem:[#allocation3 + $0x138] sm:$0xff] %v4062_v0  ;;  %520 = vst [vmem:[#allocation3 + $0x140] sm:$0xff] %v4062_v0 }
  0xfc   : > { %523 = vst [vmem:[#allocation3 + $0x158] sm:$0xff] %v4062_v0  ;;  %524 = vst [vmem:[#allocation3 + $0x160] sm:$0xff] %v4062_v0 }
  0xfd   : > { %527 = vst [vmem:[#allocation3 + $0x178] sm:$0xff] %v4062_v0  ;;  %528 = vst [vmem:[#allocation3 + $0x180] sm:$0xff] %v4062_v0 }
  0xfe   : > { %531 = vst [vmem:[#allocation3 + $0x198] sm:$0xff] %v4062_v0  ;;  %532 = vst [vmem:[#allocation3 + $0x1a0] sm:$0xff] %v4062_v0 }
  0xff   : > { %535 = vst [vmem:[#allocation3 + $0x1b8] sm:$0xff] %v4062_v0  ;;  %536 = vst [vmem:[#allocation3 + $0x1c0] sm:$0xff] %v4062_v0 }
 0x100   : > { %539 = vst [vmem:[#allocation3 + $0x1d8] sm:$0xff] %v4062_v0  ;;  %540 = vst [vmem:[#allocation3 + $0x1e0] sm:$0xff] %v4062_v0 }
 0x101   : > { %543 = vst [vmem:[#allocation3 + $0x1f8] sm:$0xff] %v4062_v0  ;;  %6712 = vst [vmem:[#allocation26_spill] sm:$0xff] %v4486_v11  ;;  %v3355_v0 = vunpack.c.h.bf16 %v3498_v48  ;;  %v4584_v48 = vld [vmem:[#allocation14] ss:$0 sm:$0xff] }
 0x102   : > { %6713 = vst [vmem:[#allocation27_spill] sm:$0xff] %v4488_v12  ;;  %6714 = vst [vmem:[#allocation28_spill] sm:$0xff] %v4490_v13 }
 0x103   : > { %6715 = vst [vmem:[#allocation29_spill] sm:$0xff] %v4492_v14  ;;  %608 = vst [vmem:[#allocation2 + $0x8] sm:$0xff] %v4475_v4 }
 0x104   : > { %609 = vst [vmem:[#allocation2 + $0x10] sm:$0xff] %v4477_v5  ;;  %610 = vst [vmem:[#allocation2 + $0x28] sm:$0xff] %v4479_v6 }
 0x105   : > { %611 = vst [vmem:[#allocation2 + $0x30] sm:$0xff] %v4481_v7  ;;  %612 = vst [vmem:[#allocation2 + $0x48] sm:$0xff] %v4486_v11 }
 0x106   : > { %613 = vst [vmem:[#allocation2 + $0x50] sm:$0xff] %v4488_v12  ;;  %614 = vst [vmem:[#allocation2 + $0x68] sm:$0xff] %v4490_v13 }
 0x107   : > { %615 = vst [vmem:[#allocation2 + $0x70] sm:$0xff] %v4492_v14  ;;  %616 = vst [vmem:[#allocation2 + $0x88] sm:$0xff] %v3290_v18  ;;  %v3367_v18 = vunpack.c.h.bf16 %v3501_v59 }
 0x108   : > { %617 = vst [vmem:[#allocation2 + $0x90] sm:$0xff] %v3291_v19  ;;  %618 = vst [vmem:[#allocation2 + $0xa8] sm:$0xff] %v3294_v20  ;;  %v3370_v19 = vunpack.c.l.bf16 %v3502_v60  ;;  %v3371_v20 = vunpack.c.h.bf16 %v3502_v60 }
 0x109   : > { %619 = vst [vmem:[#allocation2 + $0xb0] sm:$0xff] %v3295_v21  ;;  %620 = vst [vmem:[#allocation2 + $0xc8] sm:$0xff] %v3298_v25  ;;  %v3507_v21 = vld [vmem:[%s4390_s7 + $0x68] sm:$0xff]   ;;  %v3378_v25 = vunpack.c.l.bf16 %v3504_v2 }
 0x10a   : > { %621 = vst [vmem:[#allocation2 + $0xd0] sm:$0xff] %v3299_v26  ;;  %622 = vst [vmem:[#allocation2 + $0xe8] sm:$0xff] %v3302_v27  ;;  %v3379_v26 = vunpack.c.h.bf16 %v3504_v2  ;;  %v4561_v27 = vld [vmem:[%s4390_s7 + $0x70] sm:$0xff]  }
 0x10b   : > { %623 = vst [vmem:[#allocation2 + $0xf0] sm:$0xff] %v3303_v28  ;;  %624 = vst [vmem:[#allocation2 + $0x108] sm:$0xff] %v3306_v31  ;;  %v4564_v28 = vld [vmem:[%s4390_s7 + $0x78] sm:$0xff]   ;;  %v3386_v31 = vunpack.c.l.bf16 %v3506_v16  ;;  %v4576_v42 = vld [vmem:[#allocation2 + $0x27] sm:$0xff] }
 0x10c   : > { %625 = vst [vmem:[#allocation2 + $0x110] sm:$0xff] %v3307_v32  ;;  %626 = vst [vmem:[#allocation2 + $0x128] sm:$0xff] %v3310_v33  ;;  %v3387_v32 = vunpack.c.h.bf16 %v3506_v16  ;;  %v4566_v33 = vld [vmem:[#allocation2 + $0x7] sm:$0xff]  ;;  %v6524_v47 = vunpack.c.h.bf16 %v4564_v28  ;;  %v1967_v16 = vmul.f32 %v4588_v54, %v4576_v42 }
 0x10d   : > { %627 = vst [vmem:[#allocation2 + $0x130] sm:$0xff] %v3311_v34  ;;  %628 = vst [vmem:[#allocation2 + $0x148] sm:$0xff] %v3314_v37  ;;  %v4568_v34 = vld [vmem:[#allocation2 + $0xf] sm:$0xff]  ;;  %v4570_v37 = vld [vmem:[#allocation11 + $0x3] ss:$0 sm:$0xff] }
 0x10e   : > { %629 = vst [vmem:[#allocation2 + $0x150] sm:$0xff] %v3315_v38  ;;  %630 = vst [vmem:[#allocation2 + $0x168] sm:$0xff] %v3318_v39  ;;  %v3390_v38 = vunpack.c.l.bf16 %v3507_v21  ;;  %v3391_v39 = vunpack.c.h.bf16 %v3507_v21  ;;  %v934_v59 = vmul.f32 %v4570_v37, %v4566_v33  ;;  %v935_v60 = vmul.f32 %v4570_v37, %v4568_v34  ;;  %v4610_v2 = vld [vmem:[#allocation2 + $0x9] sm:$0xff] }
 0x10f   : > { %631 = vst [vmem:[#allocation2 + $0x170] sm:$0xff] %v3319_v40  ;;  %632 = vst [vmem:[#allocation2 + $0x188] sm:$0xff] %v3322_v43  ;;  %v4572_v40 = vunpack.c.l.bf16 %v3337_v22  ;;  %v4578_v43 = vld [vmem:[#allocation2 + $0x2f] sm:$0xff]  ;;  %v2003_v21 = vmul.f32 %v4481_v7, %v4600_v1 }
 0x110   : > { %633 = vst [vmem:[#allocation2 + $0x190] sm:$0xff] %v3323_v44  ;;  %634 = vst [vmem:[#allocation2 + $0x1a8] sm:$0xff] %v3326_v45  ;;  %v6523_v44 = vunpack.c.l.bf16 %v4561_v27  ;;  %v6522_v45 = vunpack.c.h.bf16 %v4561_v27  ;;  %v973_v15 = vadd.f32 %v4584_v48, %v935_v60  ;;  %v4642_v60 = vld [vmem:[#allocation12 + $0x7] ss:$0 sm:$0xff] }
 0x111   : > { %635 = vst [vmem:[#allocation2 + $0x1b0] sm:$0xff] %v3327_v46  ;;  %6716 = vst [vmem:[#allocation30_spill] sm:$0xff] %v4526_v55  ;;  %v6525_v46 = vunpack.c.l.bf16 %v4564_v28 }
 0x112   : > { %6717 = vst [vmem:[#allocation31_spill] sm:$0xff] %v4528_v56  ;;  %6718 = vst [vmem:[#allocation32_spill] sm:$0xff] %v4530_v57 }
 0x113   : > { %6719 = vst [vmem:[#allocation33_spill] sm:$0xff] %v4532_v58  ;;  %636 = vst [vmem:[#allocation2 + $0x1c8] sm:$0xff] %v6527_v49 }
 0x114   : > { %637 = vst [vmem:[#allocation2 + $0x1d0] sm:$0xff] %v6526_v50  ;;  %638 = vst [vmem:[#allocation2 + $0x1e8] sm:$0xff] %v3334_v51 }
 0x115   : > { %639 = vst [vmem:[#allocation2 + $0x1f0] sm:$0xff] %v3335_v52  ;;  %6720 = vst [vmem:[#allocation34_spill] sm:$0xff] %v4544_v61 }
 0x116   : > { %6721 = vst [vmem:[#allocation35_spill] sm:$0xff] %v4546_v62  ;;  %706 = vst [vmem:[#allocation3 + $0x28] sm:$0xff] %v4526_v55 }
 0x117   : > { %707 = vst [vmem:[#allocation3 + $0x30] sm:$0xff] %v4528_v56  ;;  %708 = vst [vmem:[#allocation3 + $0x48] sm:$0xff] %v4530_v57 }
 0x118   : > { %709 = vst [vmem:[#allocation3 + $0x50] sm:$0xff] %v4532_v58  ;;  %710 = vst [vmem:[#allocation3 + $0x68] sm:$0xff] %v4544_v61 }
 0x119   : > { %711 = vst [vmem:[#allocation3 + $0x70] sm:$0xff] %v4546_v62  ;;  %712 = vst [vmem:[#allocation3 + $0x88] sm:$0xff] %v3354_v63  ;;  %v1009_v63 = vmul.f32 %v4475_v4, %v4586_v53  ;;  %v4696_v62 = vld [vmem:[#allocation12 + $0x5] ss:$0 sm:$0xff] }
 0x11a   : > { %713 = vst [vmem:[#allocation3 + $0x90] sm:$0xff] %v3355_v0  ;;  %714 = vst [vmem:[#allocation3 + $0xa8] sm:$0xff] %v3358_v3  ;;  %v1010_v0 = vmul.f32 %v4477_v5, %v4586_v53  ;;  %v4612_v3 = vld [vmem:[#allocation2 + $0x11] sm:$0xff]  ;;  %v764_v57 = vld [vmem:[#allocation2 + $0x1c7] sm:$0xff] }
 0x11b   : > { %715 = vst [vmem:[#allocation3 + $0xb0] sm:$0xff] %v3359_v8  ;;  %716 = vst [vmem:[#allocation3 + $0xc8] sm:$0xff] %v3362_v9  ;;  %v4614_v8 = vld [vmem:[#allocation2 + $0x29] sm:$0xff]  ;;  %v4616_v9 = vld [vmem:[#allocation2 + $0x31] sm:$0xff] }
 0x11c   : > { %717 = vst [vmem:[#allocation3 + $0xd0] sm:$0xff] %v3363_v10  ;;  %718 = vst [vmem:[#allocation3 + $0xe8] sm:$0xff] %v3366_v17  ;;  %v972_v10 = vadd.f32 %v4584_v48, %v934_v59  ;;  %v1968_v17 = vmul.f32 %v4588_v54, %v4578_v43  ;;  %v4640_v59 = vld [vmem:[#allocation12 + $0x6] ss:$0 sm:$0xff]  ;;  %v830_v13 = vld [vmem:[#allocation2 + $0x1e9] sm:$0xff] }
 0x11d   : > { %719 = vst [vmem:[#allocation3 + $0xf0] sm:$0xff] %v3367_v18  ;;  %720 = vst [vmem:[#allocation3 + $0x108] sm:$0xff] %v3370_v19  ;;  %v4624_v18 = vld [vmem:[#allocation11 + $0x8] ss:$0 sm:$0xff]  ;;  %v4626_v19 = vld [vmem:[#allocation11 + $0x5] ss:$0 sm:$0xff] }
 0x11e   : > { %721 = vst [vmem:[#allocation3 + $0x110] sm:$0xff] %v3371_v20  ;;  %722 = vst [vmem:[#allocation3 + $0x128] sm:$0xff] %v3374_v23  ;;  %v2002_v20 = vmul.f32 %v4479_v6, %v4600_v1  ;;  %v1041_v22 = vadd.f32 %v1009_v63, %v972_v10  ;;  %v1042_v23 = vadd.f32 %v1010_v0, %v973_v15  ;;  %v4690_v50 = vld [vmem:[#allocation3 + $0x29] sm:$0xff] }
 0x11f   : > { %723 = vst [vmem:[#allocation3 + $0x130] sm:$0xff] %v3375_v24  ;;  %724 = vst [vmem:[#allocation3 + $0x148] sm:$0xff] %v3378_v25  ;;  %v1078_v24 = vmul.f32 %v4626_v19, %v4610_v2  ;;  %v1079_v25 = vmul.f32 %v4626_v19, %v4612_v3 }
 0x120   : > { %725 = vst [vmem:[#allocation3 + $0x150] sm:$0xff] %v3379_v26  ;;  %6722 = vst [vmem:[#allocation36_spill] sm:$0xff] %v4572_v40  ;;  %v2032_v26 = vadd.f32 %v2002_v20, %v1967_v16  ;;  %v767_v16 = vld [vmem:[#allocation2 + $0x1ef] sm:$0xff] }
 0x121   : > { %6723 = vst [vmem:[#allocation37_spill] sm:$0xff] %v4574_v41  ;;  %726 = vst [vmem:[#allocation3 + $0x168] sm:$0xff] %v3382_v29  ;;  %v2033_v29 = vadd.f32 %v2003_v21, %v1968_v17  ;;  %v4648_v17 = vld [vmem:[#allocation3 + $0x27] sm:$0xff]  ;;  %v4651_v21 = vld [vmem:[#allocation12 + $0x3] ss:$0 sm:$0xff] }
 0x122   : > { %727 = vst [vmem:[#allocation3 + $0x170] sm:$0xff] %v3383_v30  ;;  %728 = vst [vmem:[#allocation3 + $0x188] sm:$0xff] %v3386_v31  ;;  %v2067_v30 = vmul.f32 %v4624_v18, %v4614_v8  ;;  %v2068_v31 = vmul.f32 %v4624_v18, %v4616_v9 }
 0x123   : > { %729 = vst [vmem:[#allocation3 + $0x190] sm:$0xff] %v3387_v32  ;;  %6724 = vst [vmem:[#allocation38_spill] sm:$0xff] %v4588_v54  ;;  %v766_v32 = vld [vmem:[#allocation2 + $0x1e7] sm:$0xff] }
 0x124   : > { %730 = vst [vmem:[#allocation3 + $0x1a8] sm:$0xff] %v3390_v38  ;;  %731 = vst [vmem:[#allocation3 + $0x1b0] sm:$0xff] %v3391_v39  ;;  %v1110_v38 = vadd.f32 %v1078_v24, %v1041_v22  ;;  %v1111_v39 = vadd.f32 %v1079_v25, %v1042_v23  ;;  %v2097_v10 = vadd.f32 %v2067_v30, %v2032_v26  ;;  %v4666_v30 = vld [vmem:[#allocation3 + $0x2f] sm:$0xff] }
 0x125   : > { %704 = vst [vmem:[#allocation3 + $0x8] sm:$0xff] %v4572_v40  ;;  %705 = vst [vmem:[#allocation3 + $0x10] sm:$0xff] %v4574_v41  ;;  %v2098_v15 = vadd.f32 %v2068_v31, %v2033_v29  ;;  %v964_v20 = vmul.f32 %v4570_v37, %v766_v32  ;;  %v2222_v23 = vmul.f32 %v4640_v59, %v4648_v17  ;;  %v4668_v31 = vld [vmem:[#allocation12 + $0x8] ss:$0 sm:$0xff] }
 0x126   : > { %6725 = vst [vmem:[#allocation39_spill] sm:$0xff] %v4600_v1  ;;  %732 = vst [vmem:[#allocation3 + $0x1c8] sm:$0xff] %v6523_v44  ;;  %v2257_v26 = vmul.f32 %v4526_v55, %v4642_v60  ;;  %v965_v29 = vmul.f32 %v4570_v37, %v767_v16  ;;  %v4680_v44 = vld [vmem:[#allocation12 + $0x4] ss:$0 sm:$0xff]  ;;  %v2223_v16 = vmul.f32 %v4640_v59, %v4666_v30 }
 0x127   : > { %733 = vst [vmem:[#allocation3 + $0x1d0] sm:$0xff] %v6522_v45  ;;  %734 = vst [vmem:[#allocation3 + $0x1e8] sm:$0xff] %v6525_v46  ;;  %v4653_v45 = vadd.f32 %v2097_v10, %v1110_v38  ;;  %v4655_v22 = vadd.f32 %v2098_v15, %v1111_v39  ;;  %v1002_v39 = vadd.f32 %v4584_v48, %v964_v20  ;;  %v4678_v15 = vld [vmem:[#allocation15] ss:$0 sm:$0xff] }
 0x128   : > { %735 = vst [vmem:[#allocation3 + $0x1f0] sm:$0xff] %v6524_v47  ;;  %6726 = vst [vmem:[#allocation40_spill] sm:$0xff] %v4624_v18  ;;  %v1039_v10 = vmul.f32 %v3334_v51, %v4586_v53  ;;  %v2258_v47 = vmul.f32 %v4528_v56, %v4642_v60  ;;  %v1003_v46 = vadd.f32 %v4584_v48, %v965_v29  ;;  %v4700_v29 = vld [vmem:[#allocation3 + $0x31] sm:$0xff] }
 0x129   : > { %6727 = vst [vmem:[#allocation41_spill] sm:$0xff] %v4640_v59  ;;  %6728 = vst [vmem:[#allocation42_spill] sm:$0xff] %v4642_v60  ;;  %v2474_v32 = vmul.f32 %v4653_v45, %v4653_v45  ;;  %v2475_v38 = vmul.f32 %v4655_v22, %v4655_v22  ;;  %v1040_v20 = vmul.f32 %v3335_v52, %v4586_v53 }
 0x12a   : > { %6731 = vst [vmem:[#allocation45_spill] sm:$0xff] %v4648_v17  ;;  %6732 = vst [vmem:[#allocation46_spill] sm:$0xff] %v4666_v30  ;;  %v1255_v51 = vmul.f32 %v4572_v40, %v4680_v44  ;;  %v1256_v49 = vmul.f32 %v4574_v41, %v4680_v44  ;;  %v2322_v58 = vmul.f32 %v4668_v31, %v4690_v50  ;;  %v831_v40 = vld [vmem:[#allocation2 + $0x1f1] sm:$0xff] }
 0x12b   : > { %6733 = vst [vmem:[#allocation47_spill] sm:$0xff] %v4668_v31  ;;  %6734 = vst [vmem:[#allocation48_spill] sm:$0xff] %v4678_v15  ;;  %v2506_v61 = vmul.f32 %v2474_v32, %v4653_v45  ;;  %v2507_v14 = vmul.f32 %v2475_v38, %v4655_v22  ;;  %v1071_v59 = vadd.f32 %v1039_v10, %v1002_v39  ;;  %v4715_v39 = vld [vmem:[#allocation11] ss:$0 sm:$0xff] }
 0x12c   : > { %v4644_v63 = vld [vmem:[#allocation3 + $0x7] sm:$0xff]  ;;  %v4646_v0 = vld [vmem:[#allocation3 + $0xf] sm:$0xff]  ;;  %6735 = vst [vmem:[#allocation49_spill] sm:$0xff] %v4690_v50  ;;  %6736 = vst [vmem:[#allocation50_spill] sm:$0xff] %v4700_v29  ;;  %v2287_v12 = vadd.f32 %v2257_v26, %v2222_v23  ;;  %v2323_v32 = vmul.f32 %v4668_v31, %v4700_v29  ;;  %v1072_v50 = vadd.f32 %v1040_v20, %v1003_v46 }
 0x12d   : > { %6729 = vst [vmem:[#allocation43_spill] sm:$0xff] %v4644_v63  ;;  %6730 = vst [vmem:[#allocation44_spill] sm:$0xff] %v4646_v0  ;;  %v1180_v24 = vmul.f32 %v4651_v21, %v4644_v63  ;;  %v1181_v25 = vmul.f32 %v4651_v21, %v4646_v0  ;;  %v4706_v18 = vld [vmem:[#allocation3 + $0x9] sm:$0xff]  ;;  %v2538_v38 = vmul.f32 0.044715, %v2506_v61  ;;  %v4710_v11 = vld [vmem:[#allocation3 + $0x11] sm:$0xff]  ;;  %v1108_v0 = vmul.f32 %v4626_v19, %v830_v13 }
 0x12e   : > { %v862_v60 = vld [vmem:[#allocation3 + $0x1e7] sm:$0xff]  ;;  %6737 = vst [vmem:[#allocation51_spill] sm:$0xff] %v4706_v18  ;;  %v2539_v41 = vmul.f32 0.044715, %v2507_v14  ;;  %6738 = vst [vmem:[#allocation52_spill] sm:$0xff] %v4710_v11  ;;  %v1325_v23 = vmul.f32 %v4696_v62, %v4710_v11  ;;  %v765_v61 = vld [vmem:[#allocation2 + $0x1cf] sm:$0xff]  ;;  %v1109_v46 = vmul.f32 %v4626_v19, %v831_v40  ;;  %v6741_v40 = vunpack.c.h.bf16 %v4511_v35 }
 0x12f   : > { %v1218_v36 = vadd.f32 %v4678_v15, %v1180_v24  ;;  %v1219_v52 = vadd.f32 %v4678_v15, %v1181_v25  ;;  %v1324_v24 = vmul.f32 %v4696_v62, %v4706_v18  ;;  %v2288_v25 = vadd.f32 %v2258_v47, %v2223_v16  ;;  %v863_v1 = vld [vmem:[#allocation3 + $0x1ef] sm:$0xff]  ;;  %v4722_v31 = vld [vmem:[#allocation11 + $0x1] ss:$0 sm:$0xff]  ;;  %v4725_v20 = vld [vmem:[#allocation11 + $0x2] ss:$0 sm:$0xff] }
 0x130   : > { %v2570_v26 = vadd.f32 %v2538_v38, %v4653_v45  ;;  %v2571_v14 = vadd.f32 %v2539_v41, %v4655_v22  ;;  %v1210_v10 = vmul.f32 %v4651_v21, %v862_v60  ;;  %v828_v16 = vld [vmem:[#allocation2 + $0x1c9] sm:$0xff]  ;;  %v1140_v13 = vadd.f32 %v1108_v0, %v1071_v59  ;;  %6739 = vst [vmem:[#allocation53_spill] sm:$0xff] %v4725_v20  ;;  %v829_v11 = vld [vmem:[#allocation2 + $0x1d1] sm:$0xff] }
 0x131   : > { %v1287_v18 = vadd.f32 %v1255_v51, %v1218_v36  ;;  %v1288_v47 = vadd.f32 %v1256_v49, %v1219_v52  ;;  %v1211_v38 = vmul.f32 %v4651_v21, %v863_v1  ;;  %v1484_v41 = vmul.f32 %v4715_v39, %v764_v57 }
 0x132   : > { %v2602_v29 = vmul.f32 0.7978846, %v2570_v26  ;;  %v2603_v54 = vmul.f32 0.7978846, %v2571_v14  ;;  %v1141_v63 = vadd.f32 %v1109_v46, %v1072_v50  ;;  %v1485_v60 = vmul.f32 %v4715_v39, %v765_v61  ;;  %v926_v14 = vld [vmem:[#allocation3 + $0x1e9] sm:$0xff] }
 0x133   : > { %v6740_v51 = vunpack.c.l.bf16 %v4511_v35  ;;  %v1520_v59 = vmul.f32 %v6741_v40, %v4722_v31  ;;  %v1248_v0 = vadd.f32 %v4678_v15, %v1210_v10  ;;  %v6742_v36 = vunpack.c.l.bf16 %v4564_v28  ;;  %v4746_v46 = vld [vmem:[#allocation12] ss:$0 sm:$0xff]  ;;  %v860_v40 = vld [vmem:[#allocation3 + $0x1c7] sm:$0xff] }
 0x134   : > { %3640 = vtanh.f32 %v2602_v29  ;;  %v1584_v57 = vmul.f32 %v4725_v20, %v828_v16  ;;  %v1585_v26 = vmul.f32 %v4725_v20, %v829_v11  ;;  %v1249_v61 = vadd.f32 %v4678_v15, %v1211_v38  ;;  %6744 = vst [vmem:[#allocation54_spill] sm:$0xff] %v4746_v46 }
 0x135   : > { %v1519_v49 = vmul.f32 %v6740_v51, %v4722_v31  ;;  %v1285_v1 = vmul.f32 %v6742_v36, %v4680_v44  ;;  %3642 = vtanh.f32 %v2603_v54  ;;  %v1550_v52 = vadd.f32 %v1520_v59, %v1485_v60  ;;  %v927_v36 = vld [vmem:[#allocation3 + $0x1f1] sm:$0xff] }
 0x136   : > { %v6743_v35 = vunpack.c.h.bf16 %v4564_v28  ;;  %v2352_v10 = vadd.f32 %v2322_v58, %v2287_v12  ;;  %v2353_v51 = vadd.f32 %v2323_v32, %v2288_v25  ;;  %v4748_v54 = vld [vmem:[#allocation12 + $0x1] ss:$0 sm:$0xff]  ;;  %v1357_v60 = vadd.f32 %v1325_v23, %v1288_v47  ;;  %v924_v28 = vld [vmem:[#allocation3 + $0x1c9] sm:$0xff] }
 0x137   : > { %v1549_v50 = vadd.f32 %v1519_v49, %v1484_v41  ;;  %v1615_v16 = vadd.f32 %v1585_v26, %v1550_v52  ;;  %6745 = vst [vmem:[#allocation55_spill] sm:$0xff] %v4748_v54  ;;  %v1356_v41 = vadd.f32 %v1324_v24, %v1287_v18  ;;  %v1740_v11 = vmul.f32 %v4746_v46, %v860_v40  ;;  %v861_v32 = vld [vmem:[#allocation3 + $0x1cf] sm:$0xff] }
 0x138   : > { %v1286_v29 = vmul.f32 %v6743_v35, %v4680_v44  ;;  %v6746_v38 = vunpack.c.l.bf16 %v4561_v27  ;;  %v1317_v59 = vadd.f32 %v1285_v1, %v1248_v0  ;;  %v1354_v35 = vmul.f32 %v4696_v62, %v926_v14  ;;  %v925_v24 = vld [vmem:[#allocation3 + $0x1d1] sm:$0xff] }
 0x139   : > { %v1614_v56 = vadd.f32 %v1584_v57, %v1549_v50  ;;  %v4757_v58 = vadd.f32 %v1615_v16, %v1141_v63  ;;  %v1355_v57 = vmul.f32 %v4696_v62, %v927_v36  ;;  %v936_v18 = vmul.f32 %v4570_v37, %v4576_v42  ;;  %v4766_v1 = vld [vmem:[#allocation12 + $0x2] ss:$0 sm:$0xff] }
 0x13a   : > { %v1775_v49 = vmul.f32 %v6746_v38, %v4748_v54  ;;  %v1318_v25 = vadd.f32 %v1286_v29, %v1249_v61  ;;  %v1741_v23 = vmul.f32 %v4746_v46, %v861_v32  ;;  %v6747_v47 = vunpack.c.h.bf16 %v4561_v27 }
 0x13b   : > { %v4755_v12 = vadd.f32 %v1614_v56, %v1140_v13  ;;  %v2505_v63 = vmul.f32 %v4757_v58, %v4757_v58  ;;  %v2382_v13 = vadd.f32 %v2352_v10, %v1356_v41  ;;  %v1840_v52 = vmul.f32 %v4766_v1, %v924_v28 }
 0x13c   : > { %v1776_v0 = vmul.f32 %v6747_v47, %v4748_v54  ;;  %v1805_v50 = vadd.f32 %v1775_v49, %v1740_v11  ;;  %v937_v26 = vmul.f32 %v4570_v37, %v4578_v43  ;;  %v2383_v14 = vadd.f32 %v2353_v51, %v1357_v60 }
 0x13d   : > { %v2504_v56 = vmul.f32 %v4755_v12, %v4755_v12  ;;  %v4775_v61 = vadd.f32 %v1354_v35, %v1317_v59  ;;  %v2537_v29 = vmul.f32 %v2505_v63, %v4757_v58  ;;  %v4779_v36 = vadd.f32 %v1355_v57, %v1318_v25 }
 0x13e   : > { %v3641_v40 = vpop.eup %3640  ;;  %v1841_v16 = vmul.f32 %v4766_v1, %v925_v24  ;;  %v974_v10 = vadd.f32 %v4584_v48, %v936_v18  ;;  %v1011_v41 = vmul.f32 %v4479_v6, %v4586_v53  ;;  %v1806_v49 = vadd.f32 %v1776_v0, %v1741_v23 }
 0x13f   : > { %v2536_v27 = vmul.f32 %v2504_v56, %v4755_v12  ;;  %v3643_v11 = vpop.eup %3642  ;;  %v2666_v38 = vadd.f32 1.0, %v3641_v40  ;;  %v2569_v60 = vmul.f32 0.044715, %v2537_v29  ;;  %v4785_v59 = vadd.f32 %v1840_v52, %v1805_v50 }
 0x140   : > { %v2667_v28 = vadd.f32 1.0, %v3643_v11  ;;  %v975_v35 = vadd.f32 %v4584_v48, %v937_v26  ;;  %v1012_v32 = vmul.f32 %v4481_v7, %v4586_v53  ;;  %v1080_v24 = vmul.f32 %v4626_v19, %v4614_v8 }
 0x141   : > { %v2568_v51 = vmul.f32 0.044715, %v2536_v27  ;;  %v2698_v25 = vmul.f32 0.5, %v2666_v38  ;;  %v2601_v18 = vadd.f32 %v2569_v60, %v4757_v58  ;;  %v1043_v23 = vadd.f32 %v1011_v41, %v974_v10 }
 0x142   : > { %v2699_v47 = vmul.f32 0.5, %v2667_v28  ;;  %v1081_v0 = vmul.f32 %v4626_v19, %v4616_v9  ;;  %v1456_v56 = vmul.f32 %v4715_v39, %v4566_v33  ;;  %v1457_v26 = vmul.f32 %v4715_v39, %v4568_v34  ;;  %v4810_v34 = vld [vmem:[#allocation2 + $0x47] sm:$0xff] }
 0x143   : > { %v2600_v57 = vadd.f32 %v2568_v51, %v4755_v12  ;;  %v2730_v63 = vmul.f32 %v2698_v25, %v4653_v45  ;;  %v2633_v52 = vmul.f32 0.7978846, %v2601_v18  ;;  %v1044_v29 = vadd.f32 %v1012_v32, %v975_v35  ;;  %v4814_v51 = vld [vmem:[#allocation2 + $0x4f] sm:$0xff] }
 0x144   : > { %v2731_v27 = vmul.f32 %v2699_v47, %v4655_v22  ;;  %v1491_v40 = vmul.f32 %v4475_v4, %v4722_v31  ;;  %v1492_v10 = vmul.f32 %v4477_v5, %v4722_v31  ;;  %v1182_v33 = vmul.f32 %v4651_v21, %v4648_v17  ;;  %v6748_v32 = vld [vmem:[#allocation31_spill] sm:$0xff] }
 0x145   : > { %v2632_v50 = vmul.f32 0.7978846, %v2600_v57  ;;  %v2794_v41 = vmul.f32 %v2730_v63, %v2382_v13  ;;  %v1183_v45 = vmul.f32 %v4651_v21, %v4666_v30  ;;  %v1556_v4 = vmul.f32 %v4725_v20, %v4610_v2  ;;  %v4822_v57 = vld [vmem:[#allocation2 + $0x49] sm:$0xff]  ;;  %v4834_v47 = vld [vmem:[#allocation2 + $0x51] sm:$0xff] }
 0x146   : > { %v2795_v11 = vmul.f32 %v2731_v27, %v2383_v14  ;;  %v1521_v22 = vadd.f32 %v1491_v40, %v1456_v56  ;;  %v1871_v38 = vadd.f32 %v1841_v16, %v1806_v49  ;;  %v1112_v5 = vadd.f32 %v1080_v24, %v1043_v23  ;;  %v6749_v49 = vld [vmem:[#allocation43_spill] sm:$0xff]  ;;  %v6750_v24 = vld [vmem:[#allocation38_spill] sm:$0xff] }
 0x147   : > { %3644 = vtanh.f32 %v2632_v50  ;;  %v1522_v13 = vadd.f32 %v1492_v10, %v1457_v26  ;;  %v1557_v60 = vmul.f32 %v4725_v20, %v4612_v3  ;;  %v1113_v35 = vadd.f32 %v1081_v0, %v1044_v29  ;;  %6751 = vst [vmem:[#allocation43_spill] sm:$0xff] %v4834_v47  ;;  %v6752_v0 = vld [vmem:[#allocation44_spill] sm:$0xff]  ;;  %v6753_v50 = vld [vmem:[#allocation39_spill] sm:$0xff]  ;;  %v6756_v10 = vld [vmem:[#allocation37_spill] sm:$0xff] }
 0x148   : > { %3646 = vtanh.f32 %v2633_v52  ;;  %v3403_v28 = vpack.c.bf16 %v2795_v11, %v2794_v41  ;;  %v1257_v14 = vmul.f32 %v4526_v55, %v4680_v44  ;;  %v1258_v25 = vmul.f32 %v6748_v32, %v4680_v44  ;;  %v6754_v52 = vld [vmem:[#allocation26_spill] sm:$0xff]  ;;  %v6755_v29 = vld [vmem:[#allocation36_spill] sm:$0xff]  ;;  %v6758_v11 = vld [vmem:[#allocation49_spill] sm:$0xff] }
 0x149   : > { %v1220_v2 = vadd.f32 %v4678_v15, %v1182_v33  ;;  %v1221_v16 = vadd.f32 %v4678_v15, %v1183_v45  ;;  %v1712_v18 = vmul.f32 %v4746_v46, %v6749_v49  ;;  %v1969_v3 = vmul.f32 %v6750_v24, %v4810_v34  ;;  %v6757_v33 = vld [vmem:[#allocation27_spill] sm:$0xff]  ;;  %v6759_v49 = vld [vmem:[#allocation40_spill] sm:$0xff]  ;;  %v6760_v32 = vld [vmem:[#allocation50_spill] sm:$0xff] }
 0x14a   : > { %3404 = vst [vmem:[%s4831_s27] sm:$0xff] %v3403_v28   ;;  %v1586_v23 = vadd.f32 %v1556_v4, %v1521_v22  ;;  %v1713_v56 = vmul.f32 %v4746_v46, %v6752_v0  ;;  %v1970_v63 = vmul.f32 %v6750_v24, %v4814_v51  ;;  %v2004_v26 = vmul.f32 %v6754_v52, %v6753_v50  ;;  %v6761_v30 = vld [vmem:[#allocation51_spill] sm:$0xff] }
 0x14b   : > { %v1587_v27 = vadd.f32 %v1557_v60, %v1522_v13  ;;  %v1747_v40 = vmul.f32 %v6755_v29, %v4748_v54  ;;  %v1748_v41 = vmul.f32 %v6756_v10, %v4748_v54  ;;  %v2005_v45 = vmul.f32 %v6757_v33, %v6753_v50 }
 0x14c   : > { %v1326_v22 = vmul.f32 %v4696_v62, %v6758_v11  ;;  %v1616_v4 = vadd.f32 %v1586_v23, %v1112_v5  ;;  %v2034_v28 = vadd.f32 %v2004_v26, %v1969_v3  ;;  %v2069_v0 = vmul.f32 %v6759_v49, %v4822_v57  ;;  %v6762_v23 = vld [vmem:[#allocation52_spill] sm:$0xff] }
 0x14d   : > { %v1327_v13 = vmul.f32 %v4696_v62, %v6760_v32  ;;  %v1617_v60 = vadd.f32 %v1587_v27, %v1113_v35  ;;  %v2035_v55 = vadd.f32 %v2005_v45, %v1970_v63  ;;  %v2070_v29 = vmul.f32 %v6759_v49, %v4834_v47  ;;  %v4885_v45 = vld [vmem:[#allocation3 + $0x47] sm:$0xff] }
 0x14e   : > { %v1289_v10 = vadd.f32 %v1257_v14, %v1220_v2  ;;  %v1290_v54 = vadd.f32 %v1258_v25, %v1221_v16  ;;  %v1812_v50 = vmul.f32 %v4766_v1, %v6761_v30  ;;  %v2099_v46 = vadd.f32 %v2069_v0, %v2034_v28  ;;  %6763 = vst [vmem:[#allocation44_spill] sm:$0xff] %v4885_v45  ;;  %v6765_v28 = vld [vmem:[#allocation41_spill] sm:$0xff] }
 0x14f   : > { %v1777_v5 = vadd.f32 %v1747_v40, %v1712_v18  ;;  %v1778_v3 = vadd.f32 %v1748_v41, %v1713_v56  ;;  %v1813_v26 = vmul.f32 %v4766_v1, %v6762_v23  ;;  %v2100_v17 = vadd.f32 %v2070_v29, %v2035_v55  ;;  %v4899_v29 = vld [vmem:[#allocation3 + $0x51] sm:$0xff] }
 0x150   : > { %v1900_v35 = vadd.f32 %v4785_v59, %v4775_v61  ;;  %v4862_v27 = vadd.f32 %v2099_v46, %v1616_v4  ;;  %v938_v14 = vmul.f32 %v4570_v37, %v4810_v34  ;;  %v1901_v30 = vadd.f32 %v1871_v38, %v4779_v36 }
 0x151   : > { %v3645_v11 = vpop.eup %3644  ;;  %v4867_v2 = vadd.f32 %v2100_v17, %v1617_v60  ;;  %v939_v16 = vmul.f32 %v4570_v37, %v4814_v51  ;;  %v1358_v55 = vadd.f32 %v1326_v22, %v1289_v10  ;;  %v4871_v56 = vadd.f32 %v1327_v13, %v1290_v54  ;;  %v4897_v60 = vld [vmem:[#allocation3 + $0x49] sm:$0xff] }
 0x152   : > { %v3647_v24 = vpop.eup %3646  ;;  %v2696_v63 = vadd.f32 1.0, %v3645_v11  ;;  %v2476_v61 = vmul.f32 %v4862_v27, %v4862_v27  ;;  %v1842_v59 = vadd.f32 %v1812_v50, %v1777_v5  ;;  %v4875_v40 = vadd.f32 %v1813_v26, %v1778_v3  ;;  %v4887_v11 = vld [vmem:[#allocation3 + $0x4f] sm:$0xff]  ;;  %v6766_v5 = vld [vmem:[#allocation42_spill] sm:$0xff]  ;;  %v6768_v26 = vld [vmem:[#allocation33_spill] sm:$0xff] }
 0x153   : > { %v2697_v25 = vadd.f32 1.0, %v3647_v24  ;;  %v2477_v36 = vmul.f32 %v4867_v2, %v4867_v2  ;;  %v976_v24 = vadd.f32 %v4584_v48, %v938_v14  ;;  %v1013_v54 = vmul.f32 %v6754_v52, %v4586_v53  ;;  %6764 = vst [vmem:[#allocation26_spill] sm:$0xff] %v4887_v11  ;;  %v6767_v3 = vld [vmem:[#allocation32_spill] sm:$0xff] }
 0x154   : > { %v2728_v18 = vmul.f32 0.5, %v2696_v63  ;;  %v2508_v38 = vmul.f32 %v2476_v61, %v4862_v27  ;;  %v977_v22 = vadd.f32 %v4584_v48, %v939_v16  ;;  %v2224_v0 = vmul.f32 %v6765_v28, %v4885_v45  ;;  %v6769_v63 = vld [vmem:[#allocation47_spill] sm:$0xff] }
 0x155   : > { %v2729_v46 = vmul.f32 0.5, %v2697_v25  ;;  %v2509_v50 = vmul.f32 %v2477_v36, %v4867_v2  ;;  %v2225_v52 = vmul.f32 %v6765_v28, %v4887_v11  ;;  %v4901_v10 = vadd.f32 %v1842_v59, %v1358_v55 }
 0x156   : > { %v2760_v17 = vmul.f32 %v2728_v18, %v4755_v12  ;;  %v1014_v12 = vmul.f32 %v6757_v33, %v4586_v53  ;;  %v2540_v13 = vmul.f32 0.044715, %v2508_v38  ;;  %v2259_v23 = vmul.f32 %v6767_v3, %v6766_v5 }
 0x157   : > { %v2761_v41 = vmul.f32 %v2729_v46, %v4757_v58  ;;  %v2541_v33 = vmul.f32 0.044715, %v2509_v50  ;;  %v2324_v14 = vmul.f32 %v6769_v63, %v4897_v60  ;;  %v1045_v55 = vadd.f32 %v1013_v54, %v976_v24 }
 0x158   : > { %v2824_v4 = vmul.f32 %v2760_v17, %v1900_v35  ;;  %v2260_v35 = vmul.f32 %v6768_v26, %v6766_v5  ;;  %v2572_v25 = vadd.f32 %v2540_v13, %v4862_v27  ;;  %v1046_v61 = vadd.f32 %v1014_v12, %v977_v22  ;;  %v4930_v13 = vld [vmem:[#allocation2 + $0x67] sm:$0xff] }
 0x159   : > { %v2825_v58 = vmul.f32 %v2761_v41, %v1901_v30  ;;  %v2325_v30 = vmul.f32 %v6769_v63, %v4899_v29  ;;  %v2573_v18 = vadd.f32 %v2541_v33, %v4867_v2  ;;  %v1082_v59 = vmul.f32 %v4626_v19, %v4822_v57 }
 0x15a   : > { %v2604_v46 = vmul.f32 0.7978846, %v2572_v25  ;;  %v1083_v36 = vmul.f32 %v4626_v19, %v4834_v47  ;;  %v1184_v17 = vmul.f32 %v4651_v21, %v4885_v45  ;;  %v1185_v41 = vmul.f32 %v4651_v21, %v4887_v11  ;;  %v6780_v11 = vld [vmem:[#allocation31_spill] sm:$0xff] }
 0x15b   : > { %v3478_v16 = vpack.c.bf16 %v2825_v58, %v2824_v4  ;;  %v2605_v38 = vmul.f32 0.7978846, %v2573_v18  ;;  %v1458_v50 = vmul.f32 %v4715_v39, %v4576_v42  ;;  %v1459_v24 = vmul.f32 %v4715_v39, %v4578_v43  ;;  %v4932_v58 = vld [vmem:[#allocation2 + $0x6f] sm:$0xff] }
 0x15c   : > { %v2289_v54 = vadd.f32 %v2259_v23, %v2224_v0  ;;  %3648 = vtanh.f32 %v2604_v46  ;;  %v1493_v22 = vmul.f32 %v4479_v6, %v4722_v31  ;;  %v1494_v12 = vmul.f32 %v4481_v7, %v4722_v31  ;;  %v4946_v18 = vld [vmem:[#allocation2 + $0x71] sm:$0xff] }
 0x15d   : > { %3524 = vst [vmem:[%s4831_s27 + $0x78] sm:$0xff] %v3478_v16   ;;  %v2290_v4 = vadd.f32 %v2260_v35, %v2225_v52  ;;  %3650 = vtanh.f32 %v2605_v38  ;;  %v1114_v33 = vadd.f32 %v1082_v59, %v1045_v55  ;;  %v1115_v25 = vadd.f32 %v1083_v36, %v1046_v61  ;;  %v4944_v35 = vld [vmem:[#allocation2 + $0x69] sm:$0xff]  ;;  %6770 = vst [vmem:[#allocation36_spill] sm:$0xff] %v4946_v18  ;;  %v6772_v59 = vld [vmem:[#allocation45_spill] sm:$0xff] }
 0x15e   : > { %v1523_v42 = vadd.f32 %v1493_v22, %v1458_v50  ;;  %v1524_v16 = vadd.f32 %v1494_v12, %v1459_v24  ;;  %v1558_v43 = vmul.f32 %v4725_v20, %v4614_v8  ;;  %v1559_v0 = vmul.f32 %v4725_v20, %v4616_v9  ;;  %v6771_v8 = vld [vmem:[#allocation38_spill] sm:$0xff]  ;;  %v6775_v50 = vld [vmem:[#allocation39_spill] sm:$0xff]  ;;  %v6776_v24 = vld [vmem:[#allocation28_spill] sm:$0xff] }
 0x15f   : > { %v1222_v6 = vadd.f32 %v4678_v15, %v1184_v17  ;;  %v1223_v7 = vadd.f32 %v4678_v15, %v1185_v41  ;;  %v1259_v52 = vmul.f32 %v6767_v3, %v4680_v44  ;;  %v1260_v23 = vmul.f32 %v6768_v26, %v4680_v44  ;;  %v6773_v36 = vld [vmem:[#allocation54_spill] sm:$0xff]  ;;  %v6777_v12 = vld [vmem:[#allocation29_spill] sm:$0xff] }
 0x160   : > { %v1588_v55 = vadd.f32 %v1558_v43, %v1523_v42  ;;  %v1589_v61 = vadd.f32 %v1559_v0, %v1524_v16  ;;  %v1971_v46 = vmul.f32 %v6771_v8, %v4930_v13  ;;  %v1972_v9 = vmul.f32 %v6771_v8, %v4932_v58  ;;  %v6774_v38 = vld [vmem:[#allocation46_spill] sm:$0xff]  ;;  %v6778_v43 = vld [vmem:[#allocation55_spill] sm:$0xff] }
 0x161   : > { %v1714_v17 = vmul.f32 %v6773_v36, %v6772_v59  ;;  %v1715_v41 = vmul.f32 %v6773_v36, %v6774_v38  ;;  %v2006_v22 = vmul.f32 %v6776_v24, %v6775_v50  ;;  %v2007_v26 = vmul.f32 %v6777_v12, %v6775_v50  ;;  %v6779_v0 = vld [vmem:[#allocation30_spill] sm:$0xff] }
 0x162   : > { %v1618_v42 = vadd.f32 %v1588_v55, %v1114_v33  ;;  %v1619_v16 = vadd.f32 %v1589_v61, %v1115_v25  ;;  %v1749_v3 = vmul.f32 %v6779_v0, %v6778_v43  ;;  %v1750_v45 = vmul.f32 %v6780_v11, %v6778_v43  ;;  %v6781_v0 = vld [vmem:[#allocation49_spill] sm:$0xff] }
 0x163   : > { %v2036_v8 = vadd.f32 %v2006_v22, %v1971_v46  ;;  %v2037_v47 = vadd.f32 %v2007_v26, %v1972_v9  ;;  %v2071_v59 = vmul.f32 %v6759_v49, %v4944_v35  ;;  %v2072_v38 = vmul.f32 %v6759_v49, %v4946_v18 }
 0x164   : > { %v1873_v36 = vadd.f32 %v4875_v40, %v4871_v56  ;;  %v2354_v50 = vadd.f32 %v2324_v14, %v2289_v54  ;;  %v2355_v33 = vadd.f32 %v2325_v30, %v2290_v4  ;;  %v1291_v25 = vadd.f32 %v1259_v52, %v1222_v6 }
 0x165   : > { %v1328_v55 = vmul.f32 %v4696_v62, %v4897_v60  ;;  %v1329_v11 = vmul.f32 %v4696_v62, %v4899_v29  ;;  %v2101_v61 = vadd.f32 %v2071_v59, %v2036_v8  ;;  %v2102_v26 = vadd.f32 %v2072_v38, %v2037_v47 }
 0x166   : > { %v3649_v46 = vpop.eup %3648  ;;  %v1292_v9 = vadd.f32 %v1260_v23, %v1223_v7  ;;  %v1779_v22 = vadd.f32 %v1749_v3, %v1714_v17  ;;  %v1814_v49 = vmul.f32 %v4766_v1, %v6781_v0  ;;  %v1815_v56 = vmul.f32 %v4766_v1, %v6760_v32 }
 0x167   : > { %v3651_v40 = vpop.eup %3650  ;;  %v2668_v14 = vadd.f32 1.0, %v3649_v46  ;;  %v1780_v30 = vadd.f32 %v1750_v45, %v1715_v41  ;;  %v4978_v54 = vadd.f32 %v2101_v61, %v1618_v42  ;;  %v4980_v4 = vadd.f32 %v2102_v26, %v1619_v16 }
 0x168   : > { %v2384_v6 = vadd.f32 %v2354_v50, %v4901_v10  ;;  %v2385_v52 = vadd.f32 %v2355_v33, %v1873_v36  ;;  %v2669_v47 = vadd.f32 1.0, %v3651_v40  ;;  %v940_v3 = vmul.f32 %v4570_v37, %v4930_v13  ;;  %v4992_v36 = vld [vmem:[#allocation3 + $0x67] sm:$0xff] }
 0x169   : > { %v2700_v7 = vmul.f32 0.5, %v2668_v14  ;;  %v1360_v23 = vadd.f32 %v1328_v55, %v1291_v25  ;;  %v2478_v8 = vmul.f32 %v4978_v54, %v4978_v54  ;;  %v2479_v32 = vmul.f32 %v4980_v4, %v4980_v4  ;;  %6782 = vst [vmem:[#allocation37_spill] sm:$0xff] %v4992_v36  ;;  %v6783_v25 = vld [vmem:[#allocation34_spill] sm:$0xff] }
 0x16a   : > { %v2701_v45 = vmul.f32 0.5, %v2669_v47  ;;  %v1361_v17 = vadd.f32 %v1329_v11, %v1292_v9  ;;  %v1844_v41 = vadd.f32 %v1814_v49, %v1779_v22  ;;  %v941_v42 = vmul.f32 %v4570_v37, %v4932_v58  ;;  %v5004_v9 = vld [vmem:[#allocation3 + $0x6f] sm:$0xff] }
 0x16b   : > { %v2732_v10 = vmul.f32 %v2700_v7, %v4862_v27  ;;  %v1845_v50 = vadd.f32 %v1815_v56, %v1780_v30  ;;  %v2510_v16 = vmul.f32 %v2478_v8, %v4978_v54  ;;  %v2511_v59 = vmul.f32 %v2479_v32, %v4980_v4  ;;  %6784 = vst [vmem:[#allocation27_spill] sm:$0xff] %v5004_v9  ;;  %v6785_v56 = vld [vmem:[#allocation35_spill] sm:$0xff] }
 0x16c   : > { %v2733_v38 = vmul.f32 %v2701_v45, %v4867_v2  ;;  %v2226_v33 = vmul.f32 %v6765_v28, %v4992_v36  ;;  %v2261_v49 = vmul.f32 %v6783_v25, %v6766_v5  ;;  %v978_v55 = vadd.f32 %v4584_v48, %v940_v3 }
 0x16d   : > { %v2796_v11 = vmul.f32 %v2732_v10, %v2384_v6  ;;  %v2542_v61 = vmul.f32 0.044715, %v2510_v16  ;;  %v2543_v27 = vmul.f32 0.044715, %v2511_v59  ;;  %v1015_v26 = vmul.f32 %v6776_v24, %v4586_v53  ;;  %v3704_v10 = vld [vmem:[#allocation2 + $0x48] sm:$0xff]  ;;  %v3705_v16 = vld [vmem:[#allocation2 + $0x50] sm:$0xff] }
 0x16e   : > { %v2797_v46 = vmul.f32 %v2733_v38, %v2385_v52  ;;  %v979_v2 = vadd.f32 %v4584_v48, %v941_v42  ;;  %v1016_v22 = vmul.f32 %v6777_v12, %v4586_v53  ;;  %v2227_v0 = vmul.f32 %v6765_v28, %v5004_v9  ;;  %v5034_v38 = vld [vmem:[#allocation3 + $0x71] sm:$0xff] }
 0x16f   : > { %v2262_v40 = vmul.f32 %v6785_v56, %v6766_v5  ;;  %v2574_v14 = vadd.f32 %v2542_v61, %v4978_v54  ;;  %v2575_v30 = vadd.f32 %v2543_v27, %v4980_v4  ;;  %v5015_v6 = vadd.f32 %v1844_v41, %v1360_v23  ;;  %v5046_v61 = vld [vmem:[#allocation2 + $0x88] sm:$0xff] }
 0x170   : > { %v3408_v24 = vpack.c.bf16 %v2797_v46, %v2796_v11  ;;  %v5017_v52 = vadd.f32 %v1845_v50, %v1361_v17  ;;  %v2291_v47 = vadd.f32 %v2261_v49, %v2226_v33  ;;  %v1047_v8 = vadd.f32 %v1015_v26, %v978_v55  ;;  %v5028_v17 = vld [vmem:[#allocation3 + $0x69] sm:$0xff] }
 0x171   : > { %v2606_v3 = vmul.f32 0.7978846, %v2574_v14  ;;  %v2607_v7 = vmul.f32 0.7978846, %v2575_v30  ;;  %v1084_v12 = vmul.f32 %v4626_v19, %v4944_v35  ;;  %v1048_v32 = vadd.f32 %v1016_v22, %v979_v2  ;;  %v5044_v11 = vld [vmem:[#allocation2 + $0x8f] sm:$0xff] }
 0x172   : > { %3510 = vst [vmem:[%s4831_s27 + $0x8] sm:$0xff] %v3408_v24   ;;  %v1186_v45 = vmul.f32 %v4651_v21, %v4992_v36  ;;  %v1460_v42 = vmul.f32 %v4715_v39, %v4810_v34  ;;  %v1461_v23 = vmul.f32 %v4715_v39, %v4814_v51  ;;  %v1187_v41 = vmul.f32 %v4651_v21, %v5004_v9  ;;  %v5038_v51 = vld [vmem:[#allocation2 + $0x87] sm:$0xff]  ;;  %v5048_v2 = vld [vmem:[#allocation2 + $0x90] sm:$0xff] }
 0x173   : > { %3652 = vtanh.f32 %v2606_v3  ;;  %v1495_v50 = vmul.f32 %v3704_v10, %v4722_v31  ;;  %v1496_v59 = vmul.f32 %v3705_v16, %v4722_v31  ;;  %v2292_v33 = vadd.f32 %v2262_v40, %v2227_v0  ;;  %v5055_v30 = vld [vmem:[#allocation2 + $0x89] sm:$0xff] }
 0x174   : > { %v2326_v34 = vmul.f32 %v6769_v63, %v5028_v17  ;;  %3654 = vtanh.f32 %v2607_v7  ;;  %v1085_v49 = vmul.f32 %v4626_v19, %v4946_v18  ;;  %v2327_v55 = vmul.f32 %v6769_v63, %v5034_v38  ;;  %v6786_v7 = vld [vmem:[#allocation43_spill] sm:$0xff] }
 0x175   : > { %v1116_v27 = vadd.f32 %v1084_v12, %v1047_v8  ;;  %v1525_v26 = vadd.f32 %v1495_v50, %v1460_v42  ;;  %v1526_v46 = vadd.f32 %v1496_v59, %v1461_v23  ;;  %v1224_v0 = vadd.f32 %v4678_v15, %v1186_v45  ;;  %v6787_v12 = vld [vmem:[#allocation38_spill] sm:$0xff]  ;;  %v5064_v45 = vld [vmem:[#allocation2 + $0x91] sm:$0xff] }
 0x176   : > { %v1117_v22 = vadd.f32 %v1085_v49, %v1048_v32  ;;  %v1261_v40 = vmul.f32 %v6783_v25, %v4680_v44  ;;  %v1560_v14 = vmul.f32 %v4725_v20, %v4822_v57  ;;  %v1225_v24 = vadd.f32 %v4678_v15, %v1187_v41  ;;  %v6788_v25 = vld [vmem:[#allocation44_spill] sm:$0xff]  ;;  %v6789_v23 = vld [vmem:[#allocation54_spill] sm:$0xff]  ;;  %v6790_v41 = vld [vmem:[#allocation39_spill] sm:$0xff] }
 0x177   : > { %v1262_v3 = vmul.f32 %v6785_v56, %v4680_v44  ;;  %v1561_v8 = vmul.f32 %v4725_v20, %v6786_v7  ;;  %v1973_v32 = vmul.f32 %v6787_v12, %v5038_v51  ;;  %v1716_v10 = vmul.f32 %v6789_v23, %v6788_v25  ;;  %v6791_v56 = vld [vmem:[#allocation26_spill] sm:$0xff]  ;;  %v6792_v49 = vld [vmem:[#allocation32_spill] sm:$0xff] }
 0x178   : > { %v1590_v42 = vadd.f32 %v1560_v14, %v1525_v26  ;;  %v1974_v57 = vmul.f32 %v6787_v12, %v5044_v11  ;;  %v2008_v50 = vmul.f32 %v6790_v41, %v5046_v61  ;;  %v1717_v59 = vmul.f32 %v6789_v23, %v6791_v56  ;;  %v6793_v14 = vld [vmem:[#allocation33_spill] sm:$0xff]  ;;  %v6794_v12 = vld [vmem:[#allocation40_spill] sm:$0xff] }
 0x179   : > { %v1591_v16 = vadd.f32 %v1561_v8, %v1526_v46  ;;  %v1751_v7 = vmul.f32 %v6792_v49, %v6778_v43  ;;  %v2009_v9 = vmul.f32 %v6790_v41, %v5048_v2  ;;  %v1752_v25 = vmul.f32 %v6793_v14, %v6778_v43 }
 0x17a   : > { %v1620_v26 = vadd.f32 %v1590_v42, %v1116_v27  ;;  %v2038_v36 = vadd.f32 %v2008_v50, %v1973_v32  ;;  %v2073_v18 = vmul.f32 %v6794_v12, %v5055_v30  ;;  %v2356_v15 = vadd.f32 %v2326_v34, %v2291_v47 }
 0x17b   : > { %v1621_v20 = vadd.f32 %v1591_v16, %v1117_v22  ;;  %v2039_v46 = vadd.f32 %v2009_v9, %v1974_v57  ;;  %v2074_v8 = vmul.f32 %v6794_v12, %v5064_v45  ;;  %v1293_v56 = vadd.f32 %v1261_v40, %v1224_v0 }
 0x17c   : > { %v1330_v49 = vmul.f32 %v4696_v62, %v5028_v17  ;;  %v1331_v27 = vmul.f32 %v4696_v62, %v5034_v38  ;;  %v2103_v42 = vadd.f32 %v2073_v18, %v2038_v36  ;;  %v1294_v14 = vadd.f32 %v1262_v3, %v1225_v24 }
 0x17d   : > { %v3653_v41 = vpop.eup %3652  ;;  %v1816_v32 = vmul.f32 %v4766_v1, %v4897_v60  ;;  %v1817_v47 = vmul.f32 %v4766_v1, %v4899_v29  ;;  %v2104_v9 = vadd.f32 %v2074_v8, %v2039_v46  ;;  %v1781_v57 = vadd.f32 %v1751_v7, %v1716_v10 }
 0x17e   : > { %v3655_v34 = vpop.eup %3654  ;;  %v2670_v22 = vadd.f32 1.0, %v3653_v41  ;;  %v1782_v0 = vadd.f32 %v1752_v25, %v1717_v59  ;;  %v5092_v40 = vadd.f32 %v2103_v42, %v1620_v26  ;;  %v2357_v50 = vadd.f32 %v2327_v55, %v2292_v33 }
 0x17f   : > { %v2386_v16 = vadd.f32 %v2356_v15, %v5015_v6  ;;  %v2671_v12 = vadd.f32 1.0, %v3655_v34  ;;  %v5095_v18 = vadd.f32 %v2104_v9, %v1621_v20  ;;  %v1362_v24 = vadd.f32 %v1330_v49, %v1293_v56  ;;  %v5106_v20 = vld [vmem:[#allocation3 + $0x87] sm:$0xff]  ;;  %v5114_v49 = vld [vmem:[#allocation3 + $0x8f] sm:$0xff] }
 0x180   : > { %v2702_v36 = vmul.f32 0.5, %v2670_v22  ;;  %v2480_v60 = vmul.f32 %v5092_v40, %v5092_v40  ;;  %v942_v29 = vmul.f32 %v4570_v37, %v5038_v51  ;;  %v1363_v46 = vadd.f32 %v1331_v27, %v1294_v14 }
 0x181   : > { %v2703_v3 = vmul.f32 0.5, %v2671_v12  ;;  %v2481_v10 = vmul.f32 %v5095_v18, %v5095_v18  ;;  %v943_v33 = vmul.f32 %v4570_v37, %v5044_v11  ;;  %v1846_v6 = vadd.f32 %v1816_v32, %v1781_v57  ;;  %v5116_v37 = vld [vmem:[#allocation3 + $0x88] sm:$0xff]  ;;  %v5131_v57 = vld [vmem:[#allocation3 + $0x90] sm:$0xff] }
 0x182   : > { %v2734_v15 = vmul.f32 %v2702_v36, %v4978_v54  ;;  %v1847_v55 = vadd.f32 %v1817_v47, %v1782_v0  ;;  %v2512_v59 = vmul.f32 %v2480_v60, %v5092_v40  ;;  %v2387_v7 = vadd.f32 %v2357_v50, %v5017_v52 }
 0x183   : > { %v2735_v26 = vmul.f32 %v2703_v3, %v4980_v4  ;;  %v2228_v25 = vmul.f32 %v6765_v28, %v5106_v20  ;;  %v2513_v8 = vmul.f32 %v2481_v10, %v5095_v18  ;;  %v2263_v54 = vmul.f32 %v5116_v37, %v6766_v5  ;;  %v5145_v3 = vld [vmem:[#allocation3 + $0x89] sm:$0xff] }
 0x184   : > { %v2798_v56 = vmul.f32 %v2734_v15, %v2386_v16  ;;  %v2544_v27 = vmul.f32 0.044715, %v2512_v59  ;;  %v980_v42 = vadd.f32 %v4584_v48, %v942_v29  ;;  %v2229_v4 = vmul.f32 %v6765_v28, %v5114_v49  ;;  %v3708_v10 = vld [vmem:[#allocation2 + $0x68] sm:$0xff]  ;;  %v5152_v15 = vld [vmem:[#allocation3 + $0x91] sm:$0xff] }
 0x185   : > { %v2799_v41 = vmul.f32 %v2735_v26, %v2387_v7  ;;  %v2545_v52 = vmul.f32 0.044715, %v2513_v8  ;;  %v981_v14 = vadd.f32 %v4584_v48, %v943_v33  ;;  %v5124_v32 = vadd.f32 %v1846_v6, %v1362_v24  ;;  %v3709_v59 = vld [vmem:[#allocation2 + $0x70] sm:$0xff]  ;;  %v5165_v8 = vld [vmem:[#allocation2 + $0xa8] sm:$0xff] }
 0x186   : > { %v5126_v47 = vadd.f32 %v1847_v55, %v1363_v46  ;;  %v2576_v9 = vadd.f32 %v2544_v27, %v5092_v40  ;;  %v1017_v34 = vmul.f32 %v4586_v53, %v5046_v61  ;;  %v2264_v0 = vmul.f32 %v5131_v57, %v6766_v5  ;;  %v5156_v55 = vld [vmem:[#allocation2 + $0xa7] sm:$0xff] }
 0x187   : > { %v3413_v22 = vpack.c.bf16 %v2799_v41, %v2798_v56  ;;  %v2577_v28 = vadd.f32 %v2545_v52, %v5095_v18  ;;  %v1018_v48 = vmul.f32 %v4586_v53, %v5048_v2  ;;  %v2293_v50 = vadd.f32 %v2263_v54, %v2228_v25  ;;  %v5167_v56 = vld [vmem:[#allocation2 + $0xb0] sm:$0xff] }
 0x188   : > { %v2608_v16 = vmul.f32 0.7978846, %v2576_v9  ;;  %v1049_v12 = vadd.f32 %v1017_v34, %v980_v42  ;;  %v1086_v36 = vmul.f32 %v4626_v19, %v5055_v30  ;;  %v1188_v29 = vmul.f32 %v4651_v21, %v5106_v20  ;;  %v6795_v42 = vld [vmem:[#allocation53_spill] sm:$0xff]  ;;  %v5173_v41 = vld [vmem:[#allocation2 + $0xa9] sm:$0xff]  ;;  %v5179_v34 = vld [vmem:[#allocation11 + $0x6] ss:$0 sm:$0xff] }
 0x189   : > { %3511 = vst [vmem:[%s4831_s27 + $0x10] sm:$0xff] %v3413_v22   ;;  %v2609_v24 = vmul.f32 0.7978846, %v2577_v28  ;;  %v1050_v60 = vadd.f32 %v1018_v48, %v981_v14  ;;  %v1462_v5 = vmul.f32 %v4715_v39, %v4930_v13  ;;  %v1189_v53 = vmul.f32 %v4651_v21, %v5114_v49  ;;  %v6797_v14 = vld [vmem:[#allocation36_spill] sm:$0xff]  ;;  %6798 = vst [vmem:[#allocation50_spill] sm:$0xff] %v5179_v34  ;;  %v6799_v48 = vld [vmem:[#allocation37_spill] sm:$0xff] }
 0x18a   : > { %3656 = vtanh.f32 %v2608_v16  ;;  %v1463_v46 = vmul.f32 %v4715_v39, %v4932_v58  ;;  %v1497_v33 = vmul.f32 %v3708_v10, %v4722_v31  ;;  %v2328_v6 = vmul.f32 %v6769_v63, %v5145_v3  ;;  %v5163_v58 = vld [vmem:[#allocation2 + $0xaf] sm:$0xff] }
 0x18b   : > { %3658 = vtanh.f32 %v2609_v24  ;;  %v1087_v13 = vmul.f32 %v4626_v19, %v5064_v45  ;;  %v1498_v21 = vmul.f32 %v3709_v59, %v4722_v31  ;;  %v2294_v7 = vadd.f32 %v2264_v0, %v2229_v4  ;;  %v6796_v4 = vld [vmem:[#allocation48_spill] sm:$0xff]  ;;  %v6800_v24 = vld [vmem:[#allocation27_spill] sm:$0xff]  ;;  %v5201_v59 = vld [vmem:[#allocation11 + $0x8] ss:$0 sm:$0xff] }
 0x18c   : > { %v2329_v39 = vmul.f32 %v6769_v63, %v5152_v15  ;;  %v1118_v26 = vadd.f32 %v1086_v36, %v1049_v12  ;;  %v1527_v25 = vadd.f32 %v1497_v33, %v1462_v5  ;;  %v1263_v27 = vmul.f32 %v5116_v37, %v4680_v44  ;;  %v5183_v0 = vld [vmem:[#allocation2 + $0xb1] sm:$0xff]  ;;  %6802 = vst [vmem:[#allocation52_spill] sm:$0xff] %v5201_v59 }
 0x18d   : > { %v1119_v54 = vadd.f32 %v1087_v13, %v1050_v60  ;;  %v1528_v19 = vadd.f32 %v1498_v21, %v1463_v46  ;;  %v1562_v31 = vmul.f32 %v6795_v42, %v4944_v35  ;;  %v1226_v63 = vadd.f32 %v6796_v4, %v1188_v29  ;;  %v5193_v29 = vld [vmem:[#allocation11 + $0x7] ss:$0 sm:$0xff]  ;;  %v3712_v46 = vld [vmem:[#allocation3 + $0x68] sm:$0xff]  ;;  %v3713_v33 = vld [vmem:[#allocation3 + $0x70] sm:$0xff] }
 0x18e   : > { %v1227_v52 = vadd.f32 %v6796_v4, %v1189_v53  ;;  %v1563_v9 = vmul.f32 %v6795_v42, %v6797_v14  ;;  %v1975_v22 = vmul.f32 %v5179_v34, %v5156_v55  ;;  %v1264_v28 = vmul.f32 %v5131_v57, %v4680_v44  ;;  %6801 = vst [vmem:[#allocation51_spill] sm:$0xff] %v5193_v29 }
 0x18f   : > { %v1592_v35 = vadd.f32 %v1562_v31, %v1527_v25  ;;  %v1718_v16 = vmul.f32 %v6789_v23, %v6799_v48  ;;  %v1976_v12 = vmul.f32 %v5179_v34, %v5163_v58  ;;  %v1719_v60 = vmul.f32 %v6789_v23, %v6800_v24 }
 0x190   : > { %v1593_v36 = vadd.f32 %v1563_v9, %v1528_v19  ;;  %v2010_v5 = vmul.f32 %v5193_v29, %v5165_v8  ;;  %v2011_v53 = vmul.f32 %v5193_v29, %v5167_v56  ;;  %v1753_v10 = vmul.f32 %v3712_v46, %v6778_v43 }
 0x191   : > { %v1622_v44 = vadd.f32 %v1592_v35, %v1118_v26  ;;  %v1754_v13 = vmul.f32 %v3713_v33, %v6778_v43  ;;  %v2075_v23 = vmul.f32 %v5201_v59, %v5173_v41  ;;  %v2076_v42 = vmul.f32 %v5201_v59, %v5183_v0 }
 0x192   : > { %v1623_v21 = vadd.f32 %v1593_v36, %v1119_v54  ;;  %v2040_v25 = vadd.f32 %v2010_v5, %v1975_v22  ;;  %v2041_v19 = vadd.f32 %v2011_v53, %v1976_v12  ;;  %v2358_v31 = vadd.f32 %v2328_v6, %v2293_v50 }
 0x193   : > { %v2359_v4 = vadd.f32 %v2329_v39, %v2294_v7  ;;  %v1295_v26 = vadd.f32 %v1263_v27, %v1226_v63  ;;  %v1332_v14 = vmul.f32 %v4696_v62, %v5145_v3  ;;  %v1296_v35 = vadd.f32 %v1264_v28, %v1227_v52  ;;  %v5221_v28 = vld [vmem:[#allocation11 + $0x3] ss:$0 sm:$0xff] }
 0x194   : > { %v3657_v9 = vpop.eup %3656  ;;  %v1333_v43 = vmul.f32 %v4696_v62, %v5152_v15  ;;  %v2105_v48 = vadd.f32 %v2075_v23, %v2040_v25  ;;  %v2106_v24 = vadd.f32 %v2076_v42, %v2041_v19  ;;  %v1783_v22 = vadd.f32 %v1753_v10, %v1718_v16  ;;  %v5237_v10 = vld [vmem:[#allocation3 + $0xaf] sm:$0xff] }
 0x195   : > { %v3659_v46 = vpop.eup %3658  ;;  %v2672_v54 = vadd.f32 1.0, %v3657_v9  ;;  %v1818_v12 = vmul.f32 %v4766_v1, %v5028_v17  ;;  %v1819_v50 = vmul.f32 %v4766_v1, %v5034_v38  ;;  %v1784_v7 = vadd.f32 %v1754_v13, %v1719_v60  ;;  %6804 = vst [vmem:[#allocation42_spill] sm:$0xff] %v5237_v10  ;;  %v5243_v25 = vld [vmem:[#allocation12 + $0x6] ss:$0 sm:$0xff] }
 0x196   : > { %v2673_v6 = vadd.f32 1.0, %v3659_v46  ;;  %v5215_v39 = vadd.f32 %v2105_v48, %v1622_v44  ;;  %v5217_v27 = vadd.f32 %v2106_v24, %v1623_v21  ;;  %v2388_v63 = vadd.f32 %v2358_v31, %v5124_v32  ;;  %v5235_v44 = vld [vmem:[#allocation3 + $0xa7] sm:$0xff]  ;;  %v5259_v48 = vld [vmem:[#allocation12 + $0x7] ss:$0 sm:$0xff] }
 0x197   : > { %v2389_v62 = vadd.f32 %v2359_v4, %v5126_v47  ;;  %v2704_v52 = vmul.f32 0.5, %v2672_v54  ;;  %v944_v16 = vmul.f32 %v5221_v28, %v5156_v55  ;;  %v945_v36 = vmul.f32 %v5221_v28, %v5163_v58  ;;  %6803 = vst [vmem:[#allocation41_spill] sm:$0xff] %v5235_v44  ;;  %v5252_v4 = vld [vmem:[#allocation3 + $0xa8] sm:$0xff]  ;;  %v5265_v54 = vld [vmem:[#allocation11 + $0x4] ss:$0 sm:$0xff] }
 0x198   : > { %v2705_v17 = vmul.f32 0.5, %v2673_v6  ;;  %v2482_v1 = vmul.f32 %v5215_v39, %v5215_v39  ;;  %v2483_v38 = vmul.f32 %v5217_v27, %v5217_v27  ;;  %v1364_v60 = vadd.f32 %v1332_v14, %v1295_v26  ;;  %6805 = vst [vmem:[#allocation47_spill] sm:$0xff] %v5252_v4  ;;  %v5254_v26 = vld [vmem:[#allocation3 + $0xb0] sm:$0xff] }
 0x199   : > { %v2736_v32 = vmul.f32 %v2704_v52, %v5092_v40  ;;  %v5232_v47 = vadd.f32 %v1333_v43, %v1296_v35  ;;  %v1848_v5 = vadd.f32 %v1818_v12, %v1783_v22  ;;  %v5239_v33 = vadd.f32 %v1819_v50, %v1784_v7  ;;  %6806 = vst [vmem:[#allocation45_spill] sm:$0xff] %v5254_v26  ;;  %v5269_v50 = vld [vmem:[#allocation3 + $0xa9] sm:$0xff]  ;;  %v5271_v6 = vld [vmem:[#allocation3 + $0xb1] sm:$0xff] }
 0x19a   : > { %v2737_v53 = vmul.f32 %v2705_v17, %v5095_v18  ;;  %v2514_v13 = vmul.f32 %v2482_v1, %v5215_v39  ;;  %v2515_v23 = vmul.f32 %v2483_v38, %v5217_v27  ;;  %v2230_v40 = vmul.f32 %v5243_v25, %v5235_v44  ;;  %v5249_v18 = vld [vmem:[#allocation14] ss:$0 sm:$0xff]  ;;  %v5277_v52 = vld [vmem:[#allocation12 + $0x8] ss:$0 sm:$0xff]  ;;  %v5283_v38 = vld [vmem:[#allocation11 + $0x5] ss:$0 sm:$0xff] }
 0x19b   : > { %v2800_v21 = vmul.f32 %v2736_v32, %v2388_v63  ;;  %v2231_v19 = vmul.f32 %v5243_v25, %v5237_v10  ;;  %v982_v42 = vadd.f32 %v5249_v18, %v944_v16  ;;  %v983_v35 = vadd.f32 %v5249_v18, %v945_v36 }
 0x19c   : > { %v2801_v31 = vmul.f32 %v2737_v53, %v2389_v62  ;;  %v2546_v14 = vmul.f32 0.044715, %v2514_v13  ;;  %v2547_v9 = vmul.f32 0.044715, %v2515_v23  ;;  %v5257_v43 = vadd.f32 %v1848_v5, %v1364_v60  ;;  %v5288_v53 = vld [vmem:[#allocation11] ss:$0 sm:$0xff] }
 0x19d   : > { %v2265_v24 = vmul.f32 %v5259_v48, %v5252_v4  ;;  %v2266_v46 = vmul.f32 %v5259_v48, %v5254_v26  ;;  %v1019_v22 = vmul.f32 %v5265_v54, %v5165_v8  ;;  %v1020_v62 = vmul.f32 %v5265_v54, %v5167_v56  ;;  %v5292_v23 = vld [vmem:[#allocation12 + $0x3] ss:$0 sm:$0xff] }
 0x19e   : > { %v3418_v12 = vpack.c.bf16 %v2801_v31, %v2800_v21  ;;  %v2578_v7 = vadd.f32 %v2546_v14, %v5215_v39  ;;  %v2579_v63 = vadd.f32 %v2547_v9, %v5217_v27  ;;  %v2330_v16 = vmul.f32 %v5277_v52, %v5269_v50  ;;  %v5300_v14 = vld [vmem:[#allocation11 + $0x1] ss:$0 sm:$0xff] }
 0x19f   : > { %v2331_v17 = vmul.f32 %v5277_v52, %v5271_v6  ;;  %v1051_v1 = vadd.f32 %v1019_v22, %v982_v42  ;;  %v1088_v36 = vmul.f32 %v5283_v38, %v5173_v41  ;;  %v1052_v5 = vadd.f32 %v1020_v62, %v983_v35 }
 0x1a0   : > { %3512 = vst [vmem:[%s4831_s27 + $0x18] sm:$0xff] %v3418_v12   ;;  %v2610_v32 = vmul.f32 0.7978846, %v2578_v7  ;;  %v2611_v60 = vmul.f32 0.7978846, %v2579_v63  ;;  %v1464_v13 = vmul.f32 %v5288_v53, %v5038_v51  ;;  %v1190_v21 = vmul.f32 %v5292_v23, %v5235_v44  ;;  %v5308_v7 = vld [vmem:[#allocation2 + $0xc7] sm:$0xff] }
 0x1a1   : > { %v1191_v42 = vmul.f32 %v5292_v23, %v5237_v10  ;;  %v1465_v31 = vmul.f32 %v5288_v53, %v5044_v11  ;;  %v1499_v9 = vmul.f32 %v5300_v14, %v5046_v61  ;;  %v2295_v35 = vadd.f32 %v2265_v24, %v2230_v40  ;;  %v5310_v63 = vld [vmem:[#allocation2 + $0xcf] sm:$0xff]  ;;  %v5316_v24 = vld [vmem:[#allocation11 + $0x2] ss:$0 sm:$0xff] }
 0x1a2   : > { %3660 = vtanh.f32 %v2610_v32  ;;  %v1089_v51 = vmul.f32 %v5283_v38, %v5183_v0  ;;  %v1500_v22 = vmul.f32 %v5300_v14, %v5048_v2  ;;  %v2296_v12 = vadd.f32 %v2266_v46, %v2231_v19  ;;  %v5312_v10 = vld [vmem:[#allocation2 + $0xc8] sm:$0xff]  ;;  %v5314_v44 = vld [vmem:[#allocation2 + $0xd0] sm:$0xff]  ;;  %6807 = vst [vmem:[#allocation46_spill] sm:$0xff] %v5316_v24  ;;  %v5322_v19 = vld [vmem:[#allocation15] ss:$0 sm:$0xff] }
 0x1a3   : > { %3662 = vtanh.f32 %v2611_v60  ;;  %v1120_v11 = vadd.f32 %v1088_v36, %v1051_v1  ;;  %v1529_v62 = vadd.f32 %v1499_v9, %v1464_v13  ;;  %v1564_v32 = vmul.f32 %v5316_v24, %v5055_v30  ;;  %6808 = vst [vmem:[#allocation28_spill] sm:$0xff] %v5322_v19  ;;  %v5326_v36 = vld [vmem:[#allocation12 + $0x4] ss:$0 sm:$0xff]  ;;  %v5332_v13 = vld [vmem:[#allocation2 + $0xc9] sm:$0xff] }
 0x1a4   : > { %v1121_v61 = vadd.f32 %v1089_v51, %v1052_v5  ;;  %v1530_v40 = vadd.f32 %v1500_v22, %v1465_v31  ;;  %v1565_v2 = vmul.f32 %v5316_v24, %v5064_v45  ;;  %v1228_v46 = vadd.f32 %v5322_v19, %v1190_v21  ;;  %6809 = vst [vmem:[#allocation29_spill] sm:$0xff] %v5326_v36  ;;  %v5334_v30 = vld [vmem:[#allocation2 + $0xd1] sm:$0xff] }
 0x1a5   : > { %v1229_v1 = vadd.f32 %v5322_v19, %v1191_v42  ;;  %v1265_v60 = vmul.f32 %v5326_v36, %v5252_v4  ;;  %v1266_v5 = vmul.f32 %v5326_v36, %v5254_v26  ;;  %6810 = vst [vmem:[#allocation55_spill] sm:$0xff] %v5334_v30  ;;  %v1594_v31 = vadd.f32 %v1564_v32, %v1529_v62  ;;  %v5340_v42 = vld [vmem:[#allocation12] ss:$0 sm:$0xff] }
 0x1a6   : > { %v1595_v45 = vadd.f32 %v1565_v2, %v1530_v40  ;;  %v1977_v9 = vmul.f32 %v5179_v34, %v5308_v7  ;;  %v1978_v21 = vmul.f32 %v5179_v34, %v5310_v63  ;;  %6811 = vst [vmem:[#allocation30_spill] sm:$0xff] %v5340_v42  ;;  %v1720_v51 = vmul.f32 %v5340_v42, %v5106_v20  ;;  %v5350_v2 = vld [vmem:[#allocation12 + $0x1] ss:$0 sm:$0xff] }
 0x1a7   : > { %v1721_v22 = vmul.f32 %v5340_v42, %v5114_v49  ;;  %v2012_v26 = vmul.f32 %v5193_v29, %v5312_v10  ;;  %v2013_v62 = vmul.f32 %v5193_v29, %v5314_v44  ;;  %v1624_v40 = vadd.f32 %v1594_v31, %v1120_v11  ;;  %6812 = vst [vmem:[#allocation31_spill] sm:$0xff] %v5350_v2 }
 0x1a8   : > { %v1625_v32 = vadd.f32 %v1595_v45, %v1121_v61  ;;  %v1755_v4 = vmul.f32 %v5350_v2, %v5116_v37  ;;  %v1756_v34 = vmul.f32 %v5350_v2, %v5131_v57  ;;  %v2077_v49 = vmul.f32 %v5201_v59, %v5332_v13  ;;  %v5362_v45 = vld [vmem:[#allocation12 + $0x5] ss:$0 sm:$0xff] }
 0x1a9   : > { %v2042_v20 = vadd.f32 %v2012_v26, %v1977_v9  ;;  %v2043_v36 = vadd.f32 %v2013_v62, %v1978_v21  ;;  %v2078_v42 = vmul.f32 %v5201_v59, %v5334_v30  ;;  %v1879_v11 = vadd.f32 %v5239_v33, %v5232_v47  ;;  %v5368_v59 = vld [vmem:[#allocation12 + $0x2] ss:$0 sm:$0xff] }
 0x1aa   : > { %v2360_v61 = vadd.f32 %v2330_v16, %v2295_v35  ;;  %v2361_v31 = vadd.f32 %v2331_v17, %v2296_v12  ;;  %v1334_v37 = vmul.f32 %v5362_v45, %v5269_v50  ;;  %v1297_v29 = vadd.f32 %v1265_v60, %v1228_v46 }
 0x1ab   : > { %v1335_v57 = vmul.f32 %v5362_v45, %v5271_v6  ;;  %v2107_v26 = vadd.f32 %v2077_v49, %v2042_v20  ;;  %v2108_v9 = vadd.f32 %v2078_v42, %v2043_v36  ;;  %v1298_v62 = vadd.f32 %v1266_v5, %v1229_v1 }
 0x1ac   : > { %v3661_v21 = vpop.eup %3660  ;;  %v1785_v2 = vadd.f32 %v1755_v4, %v1720_v51  ;;  %v1820_v47 = vmul.f32 %v5368_v59, %v5145_v3  ;;  %v1821_v33 = vmul.f32 %v5368_v59, %v5152_v15  ;;  %v1786_v35 = vadd.f32 %v1756_v34, %v1721_v22 }
 0x1ad   : > { %v3663_v16 = vpop.eup %3662  ;;  %v2674_v17 = vadd.f32 1.0, %v3661_v21  ;;  %v5374_v12 = vadd.f32 %v2107_v26, %v1624_v40  ;;  %v5376_v46 = vadd.f32 %v2108_v9, %v1625_v32  ;;  %v2390_v36 = vadd.f32 %v2360_v61, %v5257_v43  ;;  %v5390_v32 = vld [vmem:[#allocation3 + $0xc7] sm:$0xff] }
 0x1ae   : > { %v2675_v60 = vadd.f32 1.0, %v3663_v16  ;;  %v946_v4 = vmul.f32 %v5221_v28, %v5308_v7  ;;  %v947_v1 = vmul.f32 %v5221_v28, %v5310_v63  ;;  %v2391_v3 = vadd.f32 %v2361_v31, %v1879_v11  ;;  %6813 = vst [vmem:[#allocation49_spill] sm:$0xff] %v5390_v32  ;;  %v5397_v31 = vld [vmem:[#allocation3 + $0xc8] sm:$0xff] }
 0x1af   : > { %v2706_v5 = vmul.f32 0.5, %v2674_v17  ;;  %v2484_v15 = vmul.f32 %v5374_v12, %v5374_v12  ;;  %v2485_v34 = vmul.f32 %v5376_v46, %v5376_v46  ;;  %v1366_v51 = vadd.f32 %v1334_v37, %v1297_v29  ;;  %6814 = vst [vmem:[#allocation34_spill] sm:$0xff] %v5397_v31  ;;  %v5415_v17 = vld [vmem:[#allocation3 + $0xc9] sm:$0xff] }
 0x1b0   : > { %v2707_v42 = vmul.f32 0.5, %v2675_v60  ;;  %v5387_v22 = vadd.f32 %v1335_v57, %v1298_v62  ;;  %v1850_v43 = vadd.f32 %v1820_v47, %v1785_v2  ;;  %v5392_v20 = vadd.f32 %v1821_v33, %v1786_v35  ;;  %v5405_v62 = vld [vmem:[#allocation3 + $0xcf] sm:$0xff]  ;;  %6817 = vst [vmem:[#allocation38_spill] sm:$0xff] %v5415_v17 }
 0x1b1   : > { %v2738_v40 = vmul.f32 %v2706_v5, %v5215_v39  ;;  %v2516_v49 = vmul.f32 %v2484_v15, %v5374_v12  ;;  %v2517_v11 = vmul.f32 %v2485_v34, %v5376_v46  ;;  %v2232_v29 = vmul.f32 %v5243_v25, %v5390_v32  ;;  %6815 = vst [vmem:[#allocation35_spill] sm:$0xff] %v5405_v62  ;;  %v5407_v47 = vld [vmem:[#allocation3 + $0xd0] sm:$0xff] }
 0x1b2   : > { %v2739_v61 = vmul.f32 %v2707_v42, %v5217_v27  ;;  %v984_v37 = vadd.f32 %v5249_v18, %v946_v4  ;;  %v985_v2 = vadd.f32 %v5249_v18, %v947_v1  ;;  %v2267_v57 = vmul.f32 %v5259_v48, %v5397_v31  ;;  %6816 = vst [vmem:[#allocation43_spill] sm:$0xff] %v5407_v47 }
 0x1b3   : > { %v2802_v39 = vmul.f32 %v2738_v40, %v2390_v36  ;;  %v2548_v26 = vmul.f32 0.044715, %v2516_v49  ;;  %v2549_v9 = vmul.f32 0.044715, %v2517_v11  ;;  %v5409_v27 = vadd.f32 %v1850_v43, %v1366_v51 }
 0x1b4   : > { %v2803_v21 = vmul.f32 %v2739_v61, %v2391_v3  ;;  %v1021_v33 = vmul.f32 %v5265_v54, %v5312_v10  ;;  %v1022_v16 = vmul.f32 %v5265_v54, %v5314_v44  ;;  %v2233_v35 = vmul.f32 %v5243_v25, %v5405_v62 }
 0x1b5   : > { %v2268_v36 = vmul.f32 %v5259_v48, %v5407_v47  ;;  %v2580_v60 = vadd.f32 %v2548_v26, %v5374_v12  ;;  %v2581_v4 = vadd.f32 %v2549_v9, %v5376_v46  ;;  %v2332_v3 = vmul.f32 %v5277_v52, %v5415_v17 }
 0x1b6   : > { %v3423_v1 = vpack.c.bf16 %v2803_v21, %v2802_v39  ;;  %v1053_v5 = vadd.f32 %v1021_v33, %v984_v37  ;;  %v1054_v15 = vadd.f32 %v1022_v16, %v985_v2  ;;  %v2297_v34 = vadd.f32 %v2267_v57, %v2232_v29  ;;  %v5440_v39 = vld [vmem:[#allocation2 + $0xe7] sm:$0xff]  ;;  %v5442_v57 = vld [vmem:[#allocation2 + $0xef] sm:$0xff] }
 0x1b7   : > { %v2612_v42 = vmul.f32 0.7978846, %v2580_v60  ;;  %v2613_v51 = vmul.f32 0.7978846, %v2581_v4  ;;  %v1090_v43 = vmul.f32 %v5283_v38, %v5332_v13  ;;  %v1091_v40 = vmul.f32 %v5283_v38, %v5334_v30  ;;  %v5446_v21 = vld [vmem:[#allocation3 + $0xd1] sm:$0xff] }
 0x1b8   : > { %3513 = vst [vmem:[%s4831_s27 + $0x20] sm:$0xff] %v3423_v1   ;;  %v1192_v49 = vmul.f32 %v5292_v23, %v5390_v32  ;;  %v1466_v11 = vmul.f32 %v5288_v53, %v5156_v55  ;;  %v1467_v61 = vmul.f32 %v5288_v53, %v5163_v58  ;;  %v2298_v37 = vadd.f32 %v2268_v36, %v2233_v35  ;;  %v5448_v58 = vld [vmem:[#allocation2 + $0xe8] sm:$0xff]  ;;  %v5450_v33 = vld [vmem:[#allocation2 + $0xf0] sm:$0xff]  ;;  %v6818_v1 = vld [vmem:[#allocation29_spill] sm:$0xff] }
 0x1b9   : > { %3664 = vtanh.f32 %v2612_v42  ;;  %v1501_v29 = vmul.f32 %v5300_v14, %v5165_v8  ;;  %v1502_v2 = vmul.f32 %v5300_v14, %v5167_v56  ;;  %v1122_v26 = vadd.f32 %v1090_v43, %v1053_v5  ;;  %v5463_v42 = vld [vmem:[#allocation2 + $0xf1] sm:$0xff] }
 0x1ba   : > { %3666 = vtanh.f32 %v2613_v51  ;;  %v1123_v9 = vadd.f32 %v1091_v40, %v1054_v15  ;;  %v1193_v55 = vmul.f32 %v5292_v23, %v5405_v62  ;;  %v1566_v56 = vmul.f32 %v5316_v24, %v5173_v41  ;;  %v5461_v15 = vld [vmem:[#allocation2 + $0xe9] sm:$0xff]  ;;  %6820 = vst [vmem:[#allocation54_spill] sm:$0xff] %v5463_v42 }
 0x1bb   : > { %v1531_v8 = vadd.f32 %v1501_v29, %v1466_v11  ;;  %v1532_v16 = vadd.f32 %v1502_v2, %v1467_v61  ;;  %v1567_v35 = vmul.f32 %v5316_v24, %v5183_v0  ;;  %v2333_v36 = vmul.f32 %v5277_v52, %v5446_v21  ;;  %6819 = vst [vmem:[#allocation44_spill] sm:$0xff] %v5461_v15  ;;  %v6821_v41 = vld [vmem:[#allocation50_spill] sm:$0xff] }
 0x1bc   : > { %v2362_v60 = vadd.f32 %v2332_v3, %v2297_v34  ;;  %v1230_v4 = vadd.f32 %v5322_v19, %v1192_v49  ;;  %v1267_v5 = vmul.f32 %v6818_v1, %v5397_v31  ;;  %v1979_v40 = vmul.f32 %v6821_v41, %v5440_v39  ;;  %v6822_v34 = vld [vmem:[#allocation51_spill] sm:$0xff] }
 0x1bd   : > { %v1596_v51 = vadd.f32 %v1566_v56, %v1531_v8  ;;  %v1597_v43 = vadd.f32 %v1567_v35, %v1532_v16  ;;  %v1980_v0 = vmul.f32 %v6821_v41, %v5442_v57  ;;  %v1231_v11 = vadd.f32 %v5322_v19, %v1193_v55  ;;  %v6823_v8 = vld [vmem:[#allocation41_spill] sm:$0xff]  ;;  %v6824_v16 = vld [vmem:[#allocation30_spill] sm:$0xff]  ;;  %v6825_v35 = vld [vmem:[#allocation47_spill] sm:$0xff] }
 0x1be   : > { %v1268_v3 = vmul.f32 %v6818_v1, %v5407_v47  ;;  %v2014_v49 = vmul.f32 %v6822_v34, %v5448_v58  ;;  %v2015_v61 = vmul.f32 %v6822_v34, %v5450_v33  ;;  %v1722_v56 = vmul.f32 %v6824_v16, %v6823_v8  ;;  %v6826_v31 = vld [vmem:[#allocation31_spill] sm:$0xff]  ;;  %v6827_v55 = vld [vmem:[#allocation52_spill] sm:$0xff] }
 0x1bf   : > { %v1626_v29 = vadd.f32 %v1596_v51, %v1122_v26  ;;  %v1627_v2 = vadd.f32 %v1597_v43, %v1123_v9  ;;  %v1757_v62 = vmul.f32 %v6826_v31, %v6825_v35  ;;  %v2079_v30 = vmul.f32 %v6827_v55, %v5461_v15  ;;  %v6828_v26 = vld [vmem:[#allocation42_spill] sm:$0xff]  ;;  %v6829_v51 = vld [vmem:[#allocation45_spill] sm:$0xff] }
 0x1c0   : > { %v2044_v32 = vadd.f32 %v2014_v49, %v1979_v40  ;;  %v2045_v41 = vadd.f32 %v2015_v61, %v1980_v0  ;;  %v2080_v47 = vmul.f32 %v6827_v55, %v5463_v42  ;;  %v1881_v24 = vadd.f32 %v5392_v20, %v5387_v22 }
 0x1c1   : > { %v2363_v34 = vadd.f32 %v2333_v36, %v2298_v37  ;;  %v1723_v9 = vmul.f32 %v6824_v16, %v6828_v26  ;;  %v1758_v43 = vmul.f32 %v6826_v31, %v6829_v51  ;;  %v2392_v8 = vadd.f32 %v2362_v60, %v5409_v27 }
 0x1c2   : > { %v1336_v40 = vmul.f32 %v5362_v45, %v5415_v17  ;;  %v2109_v0 = vadd.f32 %v2079_v30, %v2044_v32  ;;  %v2110_v49 = vadd.f32 %v2080_v47, %v2045_v41  ;;  %v1299_v35 = vadd.f32 %v1267_v5, %v1230_v4 }
 0x1c3   : > { %v3665_v61 = vpop.eup %3664  ;;  %v1300_v55 = vadd.f32 %v1268_v3, %v1231_v11  ;;  %v1337_v22 = vmul.f32 %v5362_v45, %v5446_v21  ;;  %v1822_v20 = vmul.f32 %v5368_v59, %v5269_v50  ;;  %v1787_v26 = vadd.f32 %v1757_v62, %v1722_v56 }
 0x1c4   : > { %v3667_v37 = vpop.eup %3666  ;;  %v2676_v36 = vadd.f32 1.0, %v3665_v61  ;;  %v5497_v51 = vadd.f32 %v2109_v0, %v1626_v29  ;;  %v5499_v27 = vadd.f32 %v2110_v49, %v1627_v2  ;;  %v2393_v60 = vadd.f32 %v2363_v34, %v1881_v24  ;;  %v5512_v34 = vld [vmem:[#allocation3 + $0xe7] sm:$0xff]  ;;  %v5525_v0 = vld [vmem:[#allocation3 + $0xf0] sm:$0xff] }
 0x1c5   : > { %v2677_v17 = vadd.f32 1.0, %v3667_v37  ;;  %v1788_v30 = vadd.f32 %v1758_v43, %v1723_v9  ;;  %v1823_v32 = vmul.f32 %v5368_v59, %v5271_v6  ;;  %v948_v62 = vmul.f32 %v5221_v28, %v5440_v39  ;;  %6830 = vst [vmem:[#allocation39_spill] sm:$0xff] %v5512_v34  ;;  %v5514_v6 = vld [vmem:[#allocation3 + $0xe8] sm:$0xff]  ;;  %6833 = vst [vmem:[#allocation33_spill] sm:$0xff] %v5525_v0 }
 0x1c6   : > { %v2708_v47 = vmul.f32 0.5, %v2676_v36  ;;  %v2486_v4 = vmul.f32 %v5497_v51, %v5497_v51  ;;  %v2487_v50 = vmul.f32 %v5499_v27, %v5499_v27  ;;  %v1368_v41 = vadd.f32 %v1336_v40, %v1299_v35  ;;  %6831 = vst [vmem:[#allocation26_spill] sm:$0xff] %v5514_v6 }
 0x1c7   : > { %v2709_v5 = vmul.f32 0.5, %v2677_v17  ;;  %v1369_v11 = vadd.f32 %v1337_v22, %v1300_v55  ;;  %v949_v24 = vmul.f32 %v5221_v28, %v5442_v57  ;;  %v1852_v29 = vadd.f32 %v1822_v20, %v1787_v26 }
 0x1c8   : > { %v2740_v3 = vmul.f32 %v2708_v47, %v5374_v12  ;;  %v2518_v2 = vmul.f32 %v2486_v4, %v5497_v51  ;;  %v2519_v56 = vmul.f32 %v2487_v50, %v5499_v27  ;;  %v1853_v43 = vadd.f32 %v1823_v32, %v1788_v30  ;;  %v5523_v12 = vld [vmem:[#allocation3 + $0xef] sm:$0xff] }
 0x1c9   : > { %v2741_v9 = vmul.f32 %v2709_v5, %v5376_v46  ;;  %v2234_v17 = vmul.f32 %v5243_v25, %v5512_v34  ;;  %v2269_v55 = vmul.f32 %v5259_v48, %v5514_v6  ;;  %6832 = vst [vmem:[#allocation32_spill] sm:$0xff] %v5523_v12  ;;  %v986_v35 = vadd.f32 %v5249_v18, %v948_v62 }
 0x1ca   : > { %v2804_v40 = vmul.f32 %v2740_v3, %v2392_v8  ;;  %v2550_v49 = vmul.f32 0.044715, %v2518_v2  ;;  %v2551_v61 = vmul.f32 0.044715, %v2519_v56  ;;  %v2235_v46 = vmul.f32 %v5243_v25, %v5523_v12  ;;  %v5552_v2 = vld [vmem:[#allocation3 + $0xe9] sm:$0xff] }
 0x1cb   : > { %v2805_v22 = vmul.f32 %v2741_v9, %v2393_v60  ;;  %v2270_v20 = vmul.f32 %v5259_v48, %v5525_v0  ;;  %v987_v37 = vadd.f32 %v5249_v18, %v949_v24  ;;  %v5533_v36 = vadd.f32 %v1852_v29, %v1368_v41  ;;  %6834 = vst [vmem:[#allocation40_spill] sm:$0xff] %v5552_v2 }
 0x1cc   : > { %v2582_v8 = vadd.f32 %v2550_v49, %v5497_v51  ;;  %v2583_v26 = vadd.f32 %v2551_v61, %v5499_v27  ;;  %v1023_v30 = vmul.f32 %v5265_v54, %v5448_v58  ;;  %v5539_v60 = vadd.f32 %v1853_v43, %v1369_v11  ;;  %v5570_v61 = vld [vmem:[#allocation2 + $0x10f] sm:$0xff] }
 0x1cd   : > { %v3428_v32 = vpack.c.bf16 %v2805_v22, %v2804_v40  ;;  %v2299_v47 = vadd.f32 %v2269_v55, %v2234_v17  ;;  %v1024_v4 = vmul.f32 %v5265_v54, %v5450_v33  ;;  %v1092_v41 = vmul.f32 %v5283_v38, %v5461_v15  ;;  %v5560_v17 = vld [vmem:[#allocation3 + $0xf1] sm:$0xff] }
 0x1ce   : > { %v2614_v50 = vmul.f32 0.7978846, %v2582_v8  ;;  %v2615_v62 = vmul.f32 0.7978846, %v2583_v26  ;;  %v1055_v5 = vadd.f32 %v1023_v30, %v986_v35  ;;  %v1194_v3 = vmul.f32 %v5292_v23, %v5512_v34  ;;  %6835 = vst [vmem:[#allocation53_spill] sm:$0xff] %v5560_v17  ;;  %v6836_v26 = vld [vmem:[#allocation46_spill] sm:$0xff] }
 0x1cf   : > { %3514 = vst [vmem:[%s4831_s27 + $0x28] sm:$0xff] %v3428_v32   ;;  %v1056_v24 = vadd.f32 %v1024_v4, %v987_v37  ;;  %v1468_v29 = vmul.f32 %v5288_v53, %v5308_v7  ;;  %v1469_v11 = vmul.f32 %v5288_v53, %v5310_v63  ;;  %v1195_v56 = vmul.f32 %v5292_v23, %v5523_v12  ;;  %v5564_v63 = vld [vmem:[#allocation2 + $0x107] sm:$0xff] }
 0x1d0   : > { %3668 = vtanh.f32 %v2614_v50  ;;  %v1503_v9 = vmul.f32 %v5300_v14, %v5312_v10  ;;  %v1504_v43 = vmul.f32 %v5300_v14, %v5314_v44  ;;  %v2300_v55 = vadd.f32 %v2270_v20, %v2235_v46  ;;  %v5572_v10 = vld [vmem:[#allocation2 + $0x108] sm:$0xff]  ;;  %v5574_v46 = vld [vmem:[#allocation2 + $0x110] sm:$0xff] }
 0x1d1   : > { %v2334_v7 = vmul.f32 %v5277_v52, %v5552_v2  ;;  %3670 = vtanh.f32 %v2615_v62  ;;  %v1093_v40 = vmul.f32 %v5283_v38, %v5463_v42  ;;  %v2335_v49 = vmul.f32 %v5277_v52, %v5560_v17  ;;  %v5581_v32 = vld [vmem:[#allocation2 + $0x109] sm:$0xff] }
 0x1d2   : > { %v1124_v44 = vadd.f32 %v1092_v41, %v1055_v5  ;;  %v1533_v35 = vadd.f32 %v1503_v9, %v1468_v29  ;;  %v1534_v22 = vadd.f32 %v1504_v43, %v1469_v11  ;;  %v1232_v37 = vadd.f32 %v5322_v19, %v1194_v3  ;;  %v6837_v62 = vld [vmem:[#allocation55_spill] sm:$0xff]  ;;  %v6838_v41 = vld [vmem:[#allocation50_spill] sm:$0xff]  ;;  %v6840_v11 = vld [vmem:[#allocation49_spill] sm:$0xff] }
 0x1d3   : > { %v1125_v20 = vadd.f32 %v1093_v40, %v1056_v24  ;;  %v1269_v8 = vmul.f32 %v6818_v1, %v5514_v6  ;;  %v1568_v30 = vmul.f32 %v6836_v26, %v5332_v13  ;;  %v1233_v4 = vadd.f32 %v5322_v19, %v1195_v56  ;;  %v5590_v3 = vld [vmem:[#allocation2 + $0x111] sm:$0xff] }
 0x1d4   : > { %v1270_v50 = vmul.f32 %v6818_v1, %v5525_v0  ;;  %v1569_v5 = vmul.f32 %v6836_v26, %v6837_v62  ;;  %v1981_v24 = vmul.f32 %v6838_v41, %v5564_v63  ;;  %6839 = vst [vmem:[#allocation48_spill] sm:$0xff] %v5590_v3  ;;  %v1724_v9 = vmul.f32 %v6824_v16, %v6840_v11  ;;  %v6841_v56 = vld [vmem:[#allocation51_spill] sm:$0xff]  ;;  %v6843_v62 = vld [vmem:[#allocation34_spill] sm:$0xff] }
 0x1d5   : > { %v1598_v29 = vadd.f32 %v1568_v30, %v1533_v35  ;;  %v1982_v13 = vmul.f32 %v6838_v41, %v5570_v61  ;;  %v2016_v43 = vmul.f32 %v6841_v56, %v5572_v10  ;;  %v6842_v0 = vld [vmem:[#allocation35_spill] sm:$0xff]  ;;  %v1759_v12 = vmul.f32 %v6826_v31, %v6843_v62  ;;  %v6845_v41 = vld [vmem:[#allocation52_spill] sm:$0xff] }
 0x1d6   : > { %v1599_v40 = vadd.f32 %v1569_v5, %v1534_v22  ;;  %v1725_v6 = vmul.f32 %v6824_v16, %v6842_v0  ;;  %v2017_v34 = vmul.f32 %v6841_v56, %v5574_v46  ;;  %v6844_v30 = vld [vmem:[#allocation43_spill] sm:$0xff]  ;;  %v2081_v19 = vmul.f32 %v6845_v41, %v5581_v32 }
 0x1d7   : > { %v1628_v35 = vadd.f32 %v1598_v29, %v1124_v44  ;;  %v1760_v11 = vmul.f32 %v6826_v31, %v6844_v30  ;;  %v2046_v42 = vadd.f32 %v2016_v43, %v1981_v24  ;;  %v2364_v26 = vadd.f32 %v2334_v7, %v2299_v47  ;;  %v6846_v24 = vld [vmem:[#allocation38_spill] sm:$0xff] }
 0x1d8   : > { %v1629_v15 = vadd.f32 %v1599_v40, %v1125_v20  ;;  %v2047_v22 = vadd.f32 %v2017_v34, %v1982_v13  ;;  %v2082_v0 = vmul.f32 %v6845_v41, %v5590_v3  ;;  %v1301_v5 = vadd.f32 %v1269_v8, %v1232_v37 }
 0x1d9   : > { %v1338_v62 = vmul.f32 %v5362_v45, %v5552_v2  ;;  %v1339_v44 = vmul.f32 %v5362_v45, %v5560_v17  ;;  %v2111_v29 = vadd.f32 %v2081_v19, %v2046_v42  ;;  %v1302_v30 = vadd.f32 %v1270_v50, %v1233_v4 }
 0x1da   : > { %v3669_v56 = vpop.eup %3668  ;;  %v1824_v43 = vmul.f32 %v5368_v59, %v6846_v24  ;;  %v1825_v47 = vmul.f32 %v5368_v59, %v5446_v21  ;;  %v2112_v34 = vadd.f32 %v2082_v0, %v2047_v22  ;;  %v1789_v13 = vadd.f32 %v1759_v12, %v1724_v9 }
 0x1db   : > { %v3671_v7 = vpop.eup %3670  ;;  %v2678_v20 = vadd.f32 1.0, %v3669_v56  ;;  %v1790_v37 = vadd.f32 %v1760_v11, %v1725_v6  ;;  %v5618_v8 = vadd.f32 %v2111_v29, %v1628_v35  ;;  %v2365_v40 = vadd.f32 %v2335_v49, %v2300_v55 }
 0x1dc   : > { %v2394_v2 = vadd.f32 %v2364_v26, %v5533_v36  ;;  %v2679_v17 = vadd.f32 1.0, %v3671_v7  ;;  %v5621_v19 = vadd.f32 %v2112_v34, %v1629_v15  ;;  %v1370_v4 = vadd.f32 %v1338_v62, %v1301_v5  ;;  %v5632_v15 = vld [vmem:[#allocation3 + $0x107] sm:$0xff]  ;;  %v5642_v62 = vld [vmem:[#allocation3 + $0x10f] sm:$0xff] }
 0x1dd   : > { %v2710_v42 = vmul.f32 0.5, %v2678_v20  ;;  %v2488_v50 = vmul.f32 %v5618_v8, %v5618_v8  ;;  %v950_v21 = vmul.f32 %v5221_v28, %v5564_v63  ;;  %v1371_v56 = vadd.f32 %v1339_v44, %v1302_v30  ;;  %6847 = vst [vmem:[#allocation36_spill] sm:$0xff] %v5632_v15  ;;  %6849 = vst [vmem:[#allocation27_spill] sm:$0xff] %v5642_v62 }
 0x1de   : > { %v2711_v22 = vmul.f32 0.5, %v2679_v17  ;;  %v2489_v6 = vmul.f32 %v5621_v19, %v5621_v19  ;;  %v951_v12 = vmul.f32 %v5221_v28, %v5570_v61  ;;  %v1854_v55 = vadd.f32 %v1824_v43, %v1789_v13  ;;  %v5637_v17 = vld [vmem:[#allocation3 + $0x108] sm:$0xff]  ;;  %v5650_v43 = vld [vmem:[#allocation3 + $0x110] sm:$0xff] }
 0x1df   : > { %v2742_v36 = vmul.f32 %v2710_v42, %v5497_v51  ;;  %v1855_v49 = vadd.f32 %v1825_v47, %v1790_v37  ;;  %v2520_v26 = vmul.f32 %v2488_v50, %v5618_v8  ;;  %v2395_v9 = vadd.f32 %v2365_v40, %v5539_v60  ;;  %6848 = vst [vmem:[#allocation37_spill] sm:$0xff] %v5637_v17 }
 0x1e0   : > { %v2743_v35 = vmul.f32 %v2711_v22, %v5499_v27  ;;  %v2236_v11 = vmul.f32 %v5243_v25, %v5632_v15  ;;  %v2521_v0 = vmul.f32 %v2489_v6, %v5621_v19  ;;  %v2271_v51 = vmul.f32 %v5259_v48, %v5637_v17  ;;  %6850 = vst [vmem:[#allocation41_spill] sm:$0xff] %v5650_v43 }
 0x1e1   : > { %v2806_v5 = vmul.f32 %v2742_v36, %v2394_v2  ;;  %v2552_v44 = vmul.f32 0.044715, %v2520_v26  ;;  %v988_v29 = vadd.f32 %v5249_v18, %v950_v21  ;;  %v2237_v27 = vmul.f32 %v5243_v25, %v5642_v62  ;;  %v5671_v36 = vld [vmem:[#allocation3 + $0x109] sm:$0xff] }
 0x1e2   : > { %v2807_v30 = vmul.f32 %v2743_v35, %v2395_v9  ;;  %v2553_v60 = vmul.f32 0.044715, %v2521_v0  ;;  %v989_v24 = vadd.f32 %v5249_v18, %v951_v12  ;;  %v5652_v47 = vadd.f32 %v1854_v55, %v1370_v4  ;;  %v5679_v9 = vld [vmem:[#allocation3 + $0x111] sm:$0xff] }
 0x1e3   : > { %v5654_v2 = vadd.f32 %v1855_v49, %v1371_v56  ;;  %v2584_v34 = vadd.f32 %v2552_v44, %v5618_v8  ;;  %v1025_v7 = vmul.f32 %v5265_v54, %v5572_v10  ;;  %v2272_v13 = vmul.f32 %v5259_v48, %v5650_v43  ;;  %6851 = vst [vmem:[#allocation47_spill] sm:$0xff] %v5679_v9 }
 0x1e4   : > { %v3433_v20 = vpack.c.bf16 %v2807_v30, %v2806_v5  ;;  %v2585_v37 = vadd.f32 %v2553_v60, %v5621_v19  ;;  %v1026_v40 = vmul.f32 %v5265_v54, %v5574_v46  ;;  %v2301_v42 = vadd.f32 %v2271_v51, %v2236_v11  ;;  %v5683_v11 = vld [vmem:[#allocation2 + $0x127] sm:$0xff]  ;;  %v5691_v51 = vld [vmem:[#allocation2 + $0x12f] sm:$0xff] }
 0x1e5   : > { %v2616_v50 = vmul.f32 0.7978846, %v2584_v34  ;;  %v1057_v4 = vadd.f32 %v1025_v7, %v988_v29  ;;  %v1094_v21 = vmul.f32 %v5283_v38, %v5581_v32  ;;  %v1196_v6 = vmul.f32 %v5292_v23, %v5632_v15  ;;  %v5693_v29 = vld [vmem:[#allocation2 + $0x128] sm:$0xff]  ;;  %v5695_v30 = vld [vmem:[#allocation2 + $0x130] sm:$0xff] }
 0x1e6   : > { %3515 = vst [vmem:[%s4831_s27 + $0x30] sm:$0xff] %v3433_v20   ;;  %v2617_v22 = vmul.f32 0.7978846, %v2585_v37  ;;  %v1058_v56 = vadd.f32 %v1026_v40, %v989_v24  ;;  %v1470_v12 = vmul.f32 %v5288_v53, %v5440_v39  ;;  %v1197_v55 = vmul.f32 %v5292_v23, %v5642_v62  ;;  %v6852_v7 = vld [vmem:[#allocation44_spill] sm:$0xff]  ;;  %v6853_v20 = vld [vmem:[#allocation46_spill] sm:$0xff] }
 0x1e7   : > { %3672 = vtanh.f32 %v2616_v50  ;;  %v1471_v49 = vmul.f32 %v5288_v53, %v5442_v57  ;;  %v1505_v26 = vmul.f32 %v5300_v14, %v5448_v58  ;;  %v2336_v35 = vmul.f32 %v5277_v52, %v5671_v36  ;;  %v6855_v50 = vld [vmem:[#allocation54_spill] sm:$0xff] }
 0x1e8   : > { %3674 = vtanh.f32 %v2617_v22  ;;  %v1095_v39 = vmul.f32 %v5283_v38, %v5590_v3  ;;  %v1506_v0 = vmul.f32 %v5300_v14, %v5450_v33  ;;  %v2302_v5 = vadd.f32 %v2272_v13, %v2237_v27  ;;  %v5701_v27 = vld [vmem:[#allocation2 + $0x129] sm:$0xff]  ;;  %v6854_v13 = vld [vmem:[#allocation28_spill] sm:$0xff] }
 0x1e9   : > { %v2337_v57 = vmul.f32 %v5277_v52, %v5679_v9  ;;  %v1126_v58 = vadd.f32 %v1094_v21, %v1057_v4  ;;  %v1535_v44 = vadd.f32 %v1505_v26, %v1470_v12  ;;  %v1271_v24 = vmul.f32 %v6818_v1, %v5637_v17  ;;  %v6856_v21 = vld [vmem:[#allocation50_spill] sm:$0xff]  ;;  %v6857_v26 = vld [vmem:[#allocation39_spill] sm:$0xff] }
 0x1ea   : > { %v1127_v60 = vadd.f32 %v1095_v39, %v1058_v56  ;;  %v1536_v34 = vadd.f32 %v1506_v0, %v1471_v49  ;;  %v1570_v33 = vmul.f32 %v6853_v20, %v6852_v7  ;;  %v1234_v37 = vadd.f32 %v6854_v13, %v1196_v6  ;;  %v5709_v56 = vld [vmem:[#allocation2 + $0x131] sm:$0xff] }
 0x1eb   : > { %v1235_v40 = vadd.f32 %v6854_v13, %v1197_v55  ;;  %v1571_v4 = vmul.f32 %v6853_v20, %v6855_v50  ;;  %v1983_v22 = vmul.f32 %v6856_v21, %v5683_v11  ;;  %v1272_v12 = vmul.f32 %v6818_v1, %v5650_v43  ;;  %v6858_v55 = vld [vmem:[#allocation32_spill] sm:$0xff]  ;;  %v6859_v50 = vld [vmem:[#allocation51_spill] sm:$0xff]  ;;  %v6860_v13 = vld [vmem:[#allocation26_spill] sm:$0xff] }
 0x1ec   : > { %v1600_v49 = vadd.f32 %v1570_v33, %v1535_v44  ;;  %v1726_v39 = vmul.f32 %v6824_v16, %v6857_v26  ;;  %v1984_v6 = vmul.f32 %v6856_v21, %v5691_v51  ;;  %v1727_v7 = vmul.f32 %v6824_v16, %v6858_v55  ;;  %v6861_v33 = vld [vmem:[#allocation33_spill] sm:$0xff] }
 0x1ed   : > { %v1601_v0 = vadd.f32 %v1571_v4, %v1536_v34  ;;  %v2018_v62 = vmul.f32 %v6859_v50, %v5693_v29  ;;  %v2019_v17 = vmul.f32 %v6859_v50, %v5695_v30  ;;  %v1761_v44 = vmul.f32 %v6826_v31, %v6860_v13 }
 0x1ee   : > { %v1630_v15 = vadd.f32 %v1600_v49, %v1126_v58  ;;  %v1762_v26 = vmul.f32 %v6826_v31, %v6861_v33  ;;  %v2083_v21 = vmul.f32 %v6845_v41, %v5701_v27  ;;  %v2084_v55 = vmul.f32 %v6845_v41, %v5709_v56  ;;  %v6862_v33 = vld [vmem:[#allocation40_spill] sm:$0xff]  ;;  %v6863_v41 = vld [vmem:[#allocation53_spill] sm:$0xff] }
 0x1ef   : > { %v1631_v34 = vadd.f32 %v1601_v0, %v1127_v60  ;;  %v2048_v4 = vadd.f32 %v2018_v62, %v1983_v22  ;;  %v2049_v43 = vadd.f32 %v2019_v17, %v1984_v6  ;;  %v2366_v16 = vadd.f32 %v2336_v35, %v2301_v42 }
 0x1f0   : > { %v1303_v1 = vadd.f32 %v1271_v24, %v1234_v37  ;;  %v1340_v58 = vmul.f32 %v5362_v45, %v5671_v36  ;;  %v1341_v13 = vmul.f32 %v5362_v45, %v5679_v9  ;;  %v1304_v50 = vadd.f32 %v1272_v12, %v1235_v40 }
 0x1f1   : > { %v3673_v49 = vpop.eup %3672  ;;  %v1826_v31 = vmul.f32 %v5368_v59, %v6862_v33  ;;  %v2113_v3 = vadd.f32 %v2083_v21, %v2048_v4  ;;  %v2114_v60 = vadd.f32 %v2084_v55, %v2049_v43  ;;  %v1791_v22 = vadd.f32 %v1761_v44, %v1726_v39  ;;  %v5755_v44 = vld [vmem:[#allocation3 + $0x127] sm:$0xff] }
 0x1f2   : > { %v3675_v62 = vpop.eup %3674  ;;  %v2680_v17 = vadd.f32 1.0, %v3673_v49  ;;  %v1792_v6 = vadd.f32 %v1762_v26, %v1727_v7  ;;  %v1827_v42 = vmul.f32 %v5368_v59, %v6863_v41  ;;  %v2367_v35 = vadd.f32 %v2337_v57, %v2302_v5 }
 0x1f3   : > { %v2681_v24 = vadd.f32 1.0, %v3675_v62  ;;  %v5739_v37 = vadd.f32 %v2113_v3, %v1630_v15  ;;  %v5741_v0 = vadd.f32 %v2114_v60, %v1631_v34  ;;  %v2396_v40 = vadd.f32 %v2366_v16, %v5652_v47  ;;  %v5773_v62 = vld [vmem:[#allocation3 + $0x128] sm:$0xff] }
 0x1f4   : > { %v2712_v12 = vmul.f32 0.5, %v2680_v17  ;;  %v1372_v9 = vadd.f32 %v1340_v58, %v1303_v1  ;;  %v952_v43 = vmul.f32 %v5221_v28, %v5683_v11  ;;  %v953_v3 = vmul.f32 %v5221_v28, %v5691_v51  ;;  %v5762_v58 = vld [vmem:[#allocation3 + $0x12f] sm:$0xff] }
 0x1f5   : > { %v2713_v21 = vmul.f32 0.5, %v2681_v24  ;;  %v2490_v39 = vmul.f32 %v5739_v37, %v5739_v37  ;;  %v2491_v7 = vmul.f32 %v5741_v0, %v5741_v0  ;;  %v1373_v5 = vadd.f32 %v1341_v13, %v1304_v50  ;;  %v5775_v17 = vld [vmem:[#allocation3 + $0x130] sm:$0xff] }
 0x1f6   : > { %v2744_v15 = vmul.f32 %v2712_v12, %v5618_v8  ;;  %v1856_v57 = vadd.f32 %v1826_v31, %v1791_v22  ;;  %v1857_v16 = vadd.f32 %v1827_v42, %v1792_v6  ;;  %v2397_v1 = vadd.f32 %v2367_v35, %v5654_v2  ;;  %v5777_v22 = vld [vmem:[#allocation3 + $0x129] sm:$0xff] }
 0x1f7   : > { %v2745_v47 = vmul.f32 %v2713_v21, %v5621_v19  ;;  %v2522_v26 = vmul.f32 %v2490_v39, %v5739_v37  ;;  %v2523_v34 = vmul.f32 %v2491_v7, %v5741_v0  ;;  %v2238_v55 = vmul.f32 %v5243_v25, %v5755_v44  ;;  %v5792_v21 = vld [vmem:[#allocation3 + $0x131] sm:$0xff] }
 0x1f8   : > { %v2808_v4 = vmul.f32 %v2744_v15, %v2396_v40  ;;  %v990_v28 = vadd.f32 %v5249_v18, %v952_v43  ;;  %v991_v2 = vadd.f32 %v5249_v18, %v953_v3  ;;  %v5765_v19 = vadd.f32 %v1856_v57, %v1372_v9  ;;  %v5810_v57 = vld [vmem:[#allocation2 + $0x14f] sm:$0xff] }
 0x1f9   : > { %v2809_v8 = vmul.f32 %v2745_v47, %v2397_v1  ;;  %v2554_v31 = vmul.f32 0.044715, %v2522_v26  ;;  %v2555_v13 = vmul.f32 0.044715, %v2523_v34  ;;  %v5767_v49 = vadd.f32 %v1857_v16, %v1373_v5  ;;  %v5808_v5 = vld [vmem:[#allocation2 + $0x147] sm:$0xff] }
 0x1fa   : > { %v2239_v50 = vmul.f32 %v5243_v25, %v5762_v58  ;;  %v1027_v33 = vmul.f32 %v5265_v54, %v5693_v29  ;;  %v1028_v6 = vmul.f32 %v5265_v54, %v5695_v30  ;;  %v2273_v25 = vmul.f32 %v5259_v48, %v5773_v62 }
 0x1fb   : > { %v3438_v60 = vpack.c.bf16 %v2809_v8, %v2808_v4  ;;  %v2586_v18 = vadd.f32 %v2554_v31, %v5739_v37  ;;  %v2587_v9 = vadd.f32 %v2555_v13, %v5741_v0  ;;  %v2274_v41 = vmul.f32 %v5259_v48, %v5775_v17  ;;  %v6865_v4 = vld [vmem:[#allocation28_spill] sm:$0xff]  ;;  %v6866_v8 = vld [vmem:[#allocation29_spill] sm:$0xff]  ;;  %v5825_v31 = vld [vmem:[#allocation2 + $0x149] sm:$0xff] }
 0x1fc   : > { %v2338_v42 = vmul.f32 %v5277_v52, %v5777_v22  ;;  %v1059_v35 = vadd.f32 %v1027_v33, %v990_v28  ;;  %v1060_v12 = vadd.f32 %v1028_v6, %v991_v2  ;;  %v1472_v43 = vmul.f32 %v5288_v53, %v5564_v63  ;;  %v5827_v13 = vld [vmem:[#allocation2 + $0x151] sm:$0xff] }
 0x1fd   : > { %3516 = vst [vmem:[%s4831_s27 + $0x38] sm:$0xff] %v3438_v60   ;;  %v2618_v24 = vmul.f32 0.7978846, %v2586_v18  ;;  %v2619_v40 = vmul.f32 0.7978846, %v2587_v9  ;;  %v1096_v54 = vmul.f32 %v5283_v38, %v5701_v27  ;;  %v1198_v39 = vmul.f32 %v5292_v23, %v5755_v44 }
 0x1fe   : > { %v1473_v48 = vmul.f32 %v5288_v53, %v5570_v61  ;;  %v1507_v7 = vmul.f32 %v5300_v14, %v5572_v10  ;;  %v2339_v3 = vmul.f32 %v5277_v52, %v5792_v21  ;;  %v1097_v63 = vmul.f32 %v5283_v38, %v5709_v56  ;;  %v5814_v10 = vld [vmem:[#allocation2 + $0x148] sm:$0xff]  ;;  %v5816_v52 = vld [vmem:[#allocation2 + $0x150] sm:$0xff]  ;;  %v5829_v60 = vld [vmem:[#allocation11 + $0x6] ss:$0 sm:$0xff] }
 0x1ff   : > { %3676 = vtanh.f32 %v2618_v24  ;;  %v1508_v15 = vmul.f32 %v5300_v14, %v5574_v46  ;;  %v1128_v16 = vadd.f32 %v1096_v54, %v1059_v35  ;;  %v1199_v53 = vmul.f32 %v5292_v23, %v5762_v58  ;;  %v6864_v14 = vld [vmem:[#allocation48_spill] sm:$0xff]  ;;  %6867 = vst [vmem:[#allocation42_spill] sm:$0xff] %v5829_v60  ;;  %v5838_v18 = vld [vmem:[#allocation11 + $0x7] ss:$0 sm:$0xff] }
 0x200   : > { %3678 = vtanh.f32 %v2619_v40  ;;  %v1537_v61 = vadd.f32 %v1507_v7, %v1472_v43  ;;  %v1129_v1 = vadd.f32 %v1097_v63, %v1060_v12  ;;  %v1572_v38 = vmul.f32 %v6853_v20, %v5581_v32  ;;  %6868 = vst [vmem:[#allocation45_spill] sm:$0xff] %v5838_v18  ;;  %v6869_v35 = vld [vmem:[#allocation36_spill] sm:$0xff]  ;;  %v6870_v24 = vld [vmem:[#allocation30_spill] sm:$0xff]  ;;  %v6871_v12 = vld [vmem:[#allocation37_spill] sm:$0xff] }
 0x201   : > { %v1538_v47 = vadd.f32 %v1508_v15, %v1473_v48  ;;  %v1573_v46 = vmul.f32 %v6853_v20, %v6864_v14  ;;  %v2303_v26 = vadd.f32 %v2273_v25, %v2238_v55  ;;  %v2304_v34 = vadd.f32 %v2274_v41, %v2239_v50  ;;  %v6872_v43 = vld [vmem:[#allocation31_spill] sm:$0xff]  ;;  %v5848_v7 = vld [vmem:[#allocation11 + $0x8] ss:$0 sm:$0xff] }
 0x202   : > { %v1236_v28 = vadd.f32 %v6865_v4, %v1198_v39  ;;  %v1273_v23 = vmul.f32 %v6866_v8, %v5773_v62  ;;  %v1602_v2 = vadd.f32 %v1572_v38, %v1537_v61  ;;  %v1985_v32 = vmul.f32 %v5829_v60, %v5808_v5  ;;  %6873 = vst [vmem:[#allocation55_spill] sm:$0xff] %v5848_v7 }
 0x203   : > { %v1603_v33 = vadd.f32 %v1573_v46, %v1538_v47  ;;  %v1986_v20 = vmul.f32 %v5829_v60, %v5810_v57  ;;  %v1237_v55 = vadd.f32 %v6865_v4, %v1199_v53  ;;  %v1274_v50 = vmul.f32 %v6866_v8, %v5775_v17  ;;  %v6875_v47 = vld [vmem:[#allocation41_spill] sm:$0xff] }
 0x204   : > { %v2020_v9 = vmul.f32 %v5838_v18, %v5814_v10  ;;  %v2021_v6 = vmul.f32 %v5838_v18, %v5816_v52  ;;  %v1632_v25 = vadd.f32 %v1602_v2, %v1128_v16  ;;  %v1728_v40 = vmul.f32 %v6870_v24, %v6869_v35  ;;  %v6874_v16 = vld [vmem:[#allocation27_spill] sm:$0xff] }
 0x205   : > { %v1633_v41 = vadd.f32 %v1603_v33, %v1129_v1  ;;  %v1763_v54 = vmul.f32 %v6872_v43, %v6871_v12  ;;  %v2085_v63 = vmul.f32 %v5848_v7, %v5825_v31  ;;  %v2086_v15 = vmul.f32 %v5848_v7, %v5827_v13  ;;  %v6876_v12 = vld [vmem:[#allocation47_spill] sm:$0xff] }
 0x206   : > { %v2050_v39 = vadd.f32 %v2020_v9, %v1985_v32  ;;  %v2051_v48 = vadd.f32 %v2021_v6, %v1986_v20  ;;  %v2368_v53 = vadd.f32 %v2338_v42, %v2303_v26  ;;  %v2369_v61 = vadd.f32 %v2339_v3, %v2304_v34  ;;  %v5868_v6 = vld [vmem:[#allocation11 + $0x3] ss:$0 sm:$0xff] }
 0x207   : > { %v1729_v1 = vmul.f32 %v6870_v24, %v6874_v16  ;;  %v1764_v38 = vmul.f32 %v6872_v43, %v6875_v47  ;;  %v1342_v14 = vmul.f32 %v5362_v45, %v5777_v22  ;;  %v1343_v46 = vmul.f32 %v5362_v45, %v5792_v21  ;;  %v5892_v47 = vld [vmem:[#allocation3 + $0x148] sm:$0xff] }
 0x208   : > { %v2115_v4 = vadd.f32 %v2085_v63, %v2050_v39  ;;  %v2116_v8 = vadd.f32 %v2086_v15, %v2051_v48  ;;  %v1305_v33 = vadd.f32 %v1273_v23, %v1236_v28  ;;  %v1306_v32 = vadd.f32 %v1274_v50, %v1237_v55  ;;  %v5885_v63 = vld [vmem:[#allocation14] ss:$0 sm:$0xff]  ;;  %6878 = vst [vmem:[#allocation35_spill] sm:$0xff] %v5892_v47 }
 0x209   : > { %v3677_v2 = vpop.eup %3676  ;;  %v1793_v20 = vadd.f32 %v1763_v54, %v1728_v40  ;;  %v1828_v42 = vmul.f32 %v5368_v59, %v5671_v36  ;;  %v954_v45 = vmul.f32 %v5868_v6, %v5808_v5  ;;  %v1794_v24 = vadd.f32 %v1764_v38, %v1729_v1 }
 0x20a   : > { %v3679_v3 = vpop.eup %3678  ;;  %v2682_v26 = vadd.f32 1.0, %v3677_v2  ;;  %v5864_v34 = vadd.f32 %v2115_v4, %v1632_v25  ;;  %v5866_v9 = vadd.f32 %v2116_v8, %v1633_v41  ;;  %v1829_v28 = vmul.f32 %v5368_v59, %v6876_v12  ;;  %v5898_v2 = vld [vmem:[#allocation12 + $0x6] ss:$0 sm:$0xff]  ;;  %v5916_v12 = vld [vmem:[#allocation3 + $0x149] sm:$0xff] }
 0x20b   : > { %v2683_v35 = vadd.f32 1.0, %v3679_v3  ;;  %v955_v23 = vmul.f32 %v5868_v6, %v5810_v57  ;;  %v2398_v36 = vadd.f32 %v2368_v53, %v5765_v19  ;;  %v2399_v41 = vadd.f32 %v2369_v61, %v5767_v49  ;;  %v5890_v61 = vld [vmem:[#allocation3 + $0x147] sm:$0xff] }
 0x20c   : > { %v2714_v55 = vmul.f32 0.5, %v2682_v26  ;;  %v2492_v50 = vmul.f32 %v5864_v34, %v5864_v34  ;;  %v2493_v25 = vmul.f32 %v5866_v9, %v5866_v9  ;;  %v1374_v43 = vadd.f32 %v1342_v14, %v1305_v33  ;;  %6877 = vst [vmem:[#allocation49_spill] sm:$0xff] %v5890_v61  ;;  %v5894_v14 = vld [vmem:[#allocation11 + $0x4] ss:$0 sm:$0xff] }
 0x20d   : > { %v2715_v40 = vmul.f32 0.5, %v2683_v35  ;;  %v1858_v54 = vadd.f32 %v1828_v42, %v1793_v20  ;;  %v992_v19 = vadd.f32 %v5885_v63, %v954_v45  ;;  %v1375_v53 = vadd.f32 %v1343_v46, %v1306_v32  ;;  %v5902_v46 = vld [vmem:[#allocation12 + $0x7] ss:$0 sm:$0xff]  ;;  %v5908_v20 = vld [vmem:[#allocation3 + $0x14f] sm:$0xff] }
 0x20e   : > { %v2746_v39 = vmul.f32 %v2714_v55, %v5739_v37  ;;  %v2524_v59 = vmul.f32 %v2492_v50, %v5864_v34  ;;  %v2525_v48 = vmul.f32 %v2493_v25, %v5866_v9  ;;  %v1859_v16 = vadd.f32 %v1829_v28, %v1794_v24  ;;  %6879 = vst [vmem:[#allocation34_spill] sm:$0xff] %v5908_v20  ;;  %v5910_v42 = vld [vmem:[#allocation3 + $0x150] sm:$0xff]  ;;  %v5922_v55 = vld [vmem:[#allocation12 + $0x8] ss:$0 sm:$0xff] }
 0x20f   : > { %v2747_v15 = vmul.f32 %v2715_v40, %v5741_v0  ;;  %v993_v1 = vadd.f32 %v5885_v63, %v955_v23  ;;  %v1029_v4 = vmul.f32 %v5894_v14, %v5814_v10  ;;  %v2240_v0 = vmul.f32 %v5898_v2, %v5890_v61  ;;  %6880 = vst [vmem:[#allocation43_spill] sm:$0xff] %v5910_v42  ;;  %v5926_v40 = vld [vmem:[#allocation11 + $0x5] ss:$0 sm:$0xff] }
 0x210   : > { %v2810_v49 = vmul.f32 %v2746_v39, %v2398_v36  ;;  %v2556_v37 = vmul.f32 0.044715, %v2524_v59  ;;  %v2557_v38 = vmul.f32 0.044715, %v2525_v48  ;;  %v2275_v33 = vmul.f32 %v5902_v46, %v5892_v47  ;;  %6881 = vst [vmem:[#allocation52_spill] sm:$0xff] %v5922_v55 }
 0x211   : > { %v2811_v8 = vmul.f32 %v2747_v15, %v2399_v41  ;;  %v1030_v32 = vmul.f32 %v5894_v14, %v5816_v52  ;;  %v5912_v3 = vadd.f32 %v1858_v54, %v1374_v43  ;;  %v1061_v35 = vadd.f32 %v1029_v4, %v992_v19  ;;  %v5933_v59 = vld [vmem:[#allocation11] ss:$0 sm:$0xff]  ;;  %v5947_v4 = vld [vmem:[#allocation2 + $0x16f] sm:$0xff] }
 0x212   : > { %v2588_v26 = vadd.f32 %v2556_v37, %v5864_v34  ;;  %v2589_v45 = vadd.f32 %v2557_v38, %v5866_v9  ;;  %v2241_v28 = vmul.f32 %v5898_v2, %v5908_v20  ;;  %v2276_v23 = vmul.f32 %v5902_v46, %v5910_v42  ;;  %v5945_v38 = vld [vmem:[#allocation2 + $0x167] sm:$0xff] }
 0x213   : > { %v3443_v24 = vpack.c.bf16 %v2811_v8, %v2810_v49  ;;  %v1062_v36 = vadd.f32 %v1030_v32, %v993_v1  ;;  %v2340_v50 = vmul.f32 %v5922_v55, %v5916_v12  ;;  %v1098_v43 = vmul.f32 %v5926_v40, %v5825_v31  ;;  %v5939_v1 = vld [vmem:[#allocation11 + $0x1] ss:$0 sm:$0xff]  ;;  %v5959_v32 = vld [vmem:[#allocation2 + $0x170] sm:$0xff] }
 0x214   : > { %v2620_v25 = vmul.f32 0.7978846, %v2588_v26  ;;  %v2621_v41 = vmul.f32 0.7978846, %v2589_v45  ;;  %v2305_v54 = vadd.f32 %v2275_v33, %v2240_v0  ;;  %v1099_v39 = vmul.f32 %v5926_v40, %v5827_v13  ;;  %v5955_v33 = vld [vmem:[#allocation3 + $0x151] sm:$0xff] }
 0x215   : > { %3517 = vst [vmem:[%s4831_s27 + $0x40] sm:$0xff] %v3443_v24   ;;  %v1474_v48 = vmul.f32 %v5933_v59, %v5683_v11  ;;  %v1475_v19 = vmul.f32 %v5933_v59, %v5691_v51  ;;  %v1130_v15 = vadd.f32 %v1098_v43, %v1061_v35  ;;  %v1509_v49 = vmul.f32 %v5939_v1, %v5693_v29  ;;  %v5949_v11 = vld [vmem:[#allocation12 + $0x3] ss:$0 sm:$0xff]  ;;  %v5957_v29 = vld [vmem:[#allocation2 + $0x168] sm:$0xff]  ;;  %v5961_v45 = vld [vmem:[#allocation11 + $0x2] ss:$0 sm:$0xff] }
 0x216   : > { %3680 = vtanh.f32 %v2620_v25  ;;  %v1510_v37 = vmul.f32 %v5939_v1, %v5695_v30  ;;  %v1131_v8 = vadd.f32 %v1099_v39, %v1062_v36  ;;  %6882 = vst [vmem:[#allocation38_spill] sm:$0xff] %v5949_v11  ;;  %v1200_v51 = vmul.f32 %v5949_v11, %v5890_v61  ;;  %6883 = vst [vmem:[#allocation44_spill] sm:$0xff] %v5961_v45  ;;  %v5969_v39 = vld [vmem:[#allocation2 + $0x169] sm:$0xff] }
 0x217   : > { %3682 = vtanh.f32 %v2621_v41  ;;  %v1201_v0 = vmul.f32 %v5949_v11, %v5908_v20  ;;  %v1539_v30 = vadd.f32 %v1509_v49, %v1474_v48  ;;  %v1574_v35 = vmul.f32 %v5961_v45, %v5701_v27  ;;  %v5971_v20 = vld [vmem:[#allocation2 + $0x171] sm:$0xff]  ;;  %v5995_v61 = vld [vmem:[#allocation12] ss:$0 sm:$0xff] }
 0x218   : > { %v1540_v26 = vadd.f32 %v1510_v37, %v1475_v19  ;;  %v1575_v24 = vmul.f32 %v5961_v45, %v5709_v56  ;;  %v1889_v36 = vadd.f32 %v1859_v16, %v1375_v53  ;;  %v2306_v25 = vadd.f32 %v2276_v23, %v2241_v28  ;;  %6884 = vst [vmem:[#allocation46_spill] sm:$0xff] %v5971_v20  ;;  %v5977_v37 = vld [vmem:[#allocation15] ss:$0 sm:$0xff]  ;;  %v5980_v53 = vld [vmem:[#allocation12 + $0x4] ss:$0 sm:$0xff] }
 0x219   : > { %v2341_v41 = vmul.f32 %v5922_v55, %v5955_v33  ;;  %v2370_v43 = vadd.f32 %v2340_v50, %v2305_v54  ;;  %v1604_v48 = vadd.f32 %v1574_v35, %v1539_v30  ;;  %v1987_v49 = vmul.f32 %v5829_v60, %v5945_v38  ;;  %6885 = vst [vmem:[#allocation54_spill] sm:$0xff] %v5977_v37 }
 0x21a   : > { %v1605_v19 = vadd.f32 %v1575_v24, %v1540_v26  ;;  %v1988_v27 = vmul.f32 %v5829_v60, %v5947_v4  ;;  %v1238_v56 = vadd.f32 %v5977_v37, %v1200_v51  ;;  %v1275_v16 = vmul.f32 %v5980_v53, %v5892_v47  ;;  %6886 = vst [vmem:[#allocation50_spill] sm:$0xff] %v5995_v61  ;;  %v6014_v60 = vld [vmem:[#allocation12 + $0x2] ss:$0 sm:$0xff] }
 0x21b   : > { %v2022_v28 = vmul.f32 %v5838_v18, %v5957_v29  ;;  %v2023_v23 = vmul.f32 %v5838_v18, %v5959_v32  ;;  %v1239_v50 = vadd.f32 %v5977_v37, %v1201_v0  ;;  %v1276_v54 = vmul.f32 %v5980_v53, %v5910_v42  ;;  %v6001_v37 = vld [vmem:[#allocation12 + $0x1] ss:$0 sm:$0xff] }
 0x21c   : > { %v1634_v30 = vadd.f32 %v1604_v48, %v1130_v15  ;;  %v1635_v26 = vadd.f32 %v1605_v19, %v1131_v8  ;;  %v2087_v24 = vmul.f32 %v5848_v7, %v5969_v39  ;;  %v2088_v47 = vmul.f32 %v5848_v7, %v5971_v20 }
 0x21d   : > { %v2052_v35 = vadd.f32 %v2022_v28, %v1987_v49  ;;  %v2053_v51 = vadd.f32 %v2023_v23, %v1988_v27  ;;  %v1730_v18 = vmul.f32 %v5995_v61, %v5755_v44  ;;  %v1731_v0 = vmul.f32 %v5995_v61, %v5762_v58  ;;  %v6008_v44 = vld [vmem:[#allocation12 + $0x5] ss:$0 sm:$0xff] }
 0x21e   : > { %v1765_v15 = vmul.f32 %v6001_v37, %v5773_v62  ;;  %v1766_v8 = vmul.f32 %v6001_v37, %v5775_v17  ;;  %v2371_v48 = vadd.f32 %v2341_v41, %v2306_v25  ;;  %v2400_v19 = vadd.f32 %v2370_v43, %v5912_v3 }
 0x21f   : > { %v2117_v49 = vadd.f32 %v2087_v24, %v2052_v35  ;;  %v2118_v27 = vadd.f32 %v2088_v47, %v2053_v51  ;;  %v1307_v23 = vadd.f32 %v1275_v16, %v1238_v56  ;;  %v1308_v42 = vadd.f32 %v1276_v54, %v1239_v50  ;;  %v6031_v24 = vld [vmem:[#allocation3 + $0x167] sm:$0xff] }
 0x220   : > { %v3681_v28 = vpop.eup %3680  ;;  %v1344_v58 = vmul.f32 %v6008_v44, %v5916_v12  ;;  %v1345_v7 = vmul.f32 %v6008_v44, %v5955_v33  ;;  %v1830_v17 = vmul.f32 %v6014_v60, %v5777_v22  ;;  %v1795_v41 = vadd.f32 %v1765_v15, %v1730_v18  ;;  %6887 = vst [vmem:[#allocation39_spill] sm:$0xff] %v6031_v24  ;;  %v6038_v15 = vld [vmem:[#allocation3 + $0x168] sm:$0xff] }
 0x221   : > { %v3683_v62 = vpop.eup %3682  ;;  %v2684_v61 = vadd.f32 1.0, %v3681_v28  ;;  %v6018_v3 = vadd.f32 %v2117_v49, %v1634_v30  ;;  %v6020_v47 = vadd.f32 %v2118_v27, %v1635_v26  ;;  %v1796_v43 = vadd.f32 %v1766_v8, %v1731_v0  ;;  %6888 = vst [vmem:[#allocation32_spill] sm:$0xff] %v6038_v15 }
 0x222   : > { %v2685_v25 = vadd.f32 1.0, %v3683_v62  ;;  %v1831_v56 = vmul.f32 %v6014_v60, %v5792_v21  ;;  %v2401_v16 = vadd.f32 %v2371_v48, %v1889_v36  ;;  %v1376_v22 = vadd.f32 %v1344_v58, %v1307_v23  ;;  %v6046_v58 = vld [vmem:[#allocation3 + $0x170] sm:$0xff] }
 0x223   : > { %v2716_v50 = vmul.f32 0.5, %v2684_v61  ;;  %v2494_v54 = vmul.f32 %v6018_v3, %v6018_v3  ;;  %v2495_v35 = vmul.f32 %v6020_v47, %v6020_v47  ;;  %v1377_v30 = vadd.f32 %v1345_v7, %v1308_v42  ;;  %6890 = vst [vmem:[#allocation26_spill] sm:$0xff] %v6046_v58 }
 0x224   : > { %v2717_v51 = vmul.f32 0.5, %v2685_v25  ;;  %v956_v26 = vmul.f32 %v5868_v6, %v5945_v38  ;;  %v957_v36 = vmul.f32 %v5868_v6, %v5947_v4  ;;  %v1860_v8 = vadd.f32 %v1830_v17, %v1795_v41 }
 0x225   : > { %v2748_v18 = vmul.f32 %v2716_v50, %v5864_v34  ;;  %v2526_v21 = vmul.f32 %v2494_v54, %v6018_v3  ;;  %v2527_v61 = vmul.f32 %v2495_v35, %v6020_v47  ;;  %v1861_v7 = vadd.f32 %v1831_v56, %v1796_v43  ;;  %v6042_v34 = vld [vmem:[#allocation3 + $0x16f] sm:$0xff] }
 0x226   : > { %v2749_v0 = vmul.f32 %v2717_v51, %v5866_v9  ;;  %v2242_v42 = vmul.f32 %v5898_v2, %v6031_v24  ;;  %6889 = vst [vmem:[#allocation51_spill] sm:$0xff] %v6042_v34  ;;  %v2277_v49 = vmul.f32 %v5902_v46, %v6038_v15  ;;  %v2243_v9 = vmul.f32 %v5898_v2, %v6042_v34  ;;  %v6060_v54 = vld [vmem:[#allocation3 + $0x169] sm:$0xff] }
 0x227   : > { %v2812_v48 = vmul.f32 %v2748_v18, %v2400_v19  ;;  %v2558_v27 = vmul.f32 0.044715, %v2526_v21  ;;  %v2559_v28 = vmul.f32 0.044715, %v2527_v61  ;;  %v994_v62 = vadd.f32 %v5885_v63, %v956_v26 }
 0x228   : > { %v2813_v23 = vmul.f32 %v2749_v0, %v2401_v16  ;;  %v2278_v17 = vmul.f32 %v5902_v46, %v6046_v58  ;;  %v995_v41 = vadd.f32 %v5885_v63, %v957_v36  ;;  %v1890_v56 = vadd.f32 %v1860_v8, %v1376_v22 }
 0x229   : > { %v2590_v19 = vadd.f32 %v2558_v27, %v6018_v3  ;;  %v2591_v25 = vadd.f32 %v2559_v28, %v6020_v47  ;;  %v6056_v16 = vadd.f32 %v1861_v7, %v1377_v30  ;;  %v1031_v50 = vmul.f32 %v5894_v14, %v5957_v29  ;;  %v6085_v27 = vld [vmem:[#allocation2 + $0x188] sm:$0xff] }
 0x22a   : > { %v3448_v43 = vpack.c.bf16 %v2813_v23, %v2812_v48  ;;  %v2307_v35 = vadd.f32 %v2277_v49, %v2242_v42  ;;  %v1032_v18 = vmul.f32 %v5894_v14, %v5959_v32  ;;  %v2342_v21 = vmul.f32 %v5922_v55, %v6060_v54  ;;  %v6075_v42 = vld [vmem:[#allocation2 + $0x187] sm:$0xff]  ;;  %v6081_v49 = vld [vmem:[#allocation3 + $0x171] sm:$0xff] }
 0x22b   : > { %v2622_v51 = vmul.f32 0.7978846, %v2590_v19  ;;  %v2623_v26 = vmul.f32 0.7978846, %v2591_v25  ;;  %v1063_v61 = vadd.f32 %v1031_v50, %v994_v62  ;;  %v1476_v22 = vmul.f32 %v5933_v59, %v5808_v5 }
 0x22c   : > { %3518 = vst [vmem:[%s4831_s27 + $0x48] sm:$0xff] %v3448_v43   ;;  %v1477_v30 = vmul.f32 %v5933_v59, %v5810_v57  ;;  %v1064_v36 = vadd.f32 %v1032_v18, %v995_v41  ;;  %v1511_v0 = vmul.f32 %v5939_v1, %v5814_v10  ;;  %v1512_v8 = vmul.f32 %v5939_v1, %v5816_v52  ;;  %v6083_v57 = vld [vmem:[#allocation2 + $0x18f] sm:$0xff] }
 0x22d   : > { %3684 = vtanh.f32 %v2622_v51  ;;  %v2308_v7 = vadd.f32 %v2278_v17, %v2243_v9  ;;  %v1100_v48 = vmul.f32 %v5926_v40, %v5969_v39  ;;  %v1202_v5 = vmul.f32 %v5949_v11, %v6031_v24  ;;  %v6093_v17 = vld [vmem:[#allocation2 + $0x190] sm:$0xff] }
 0x22e   : > { %3686 = vtanh.f32 %v2623_v26  ;;  %v1101_v10 = vmul.f32 %v5926_v40, %v5971_v20  ;;  %v1203_v52 = vmul.f32 %v5949_v11, %v6042_v34  ;;  %v1541_v28 = vadd.f32 %v1511_v0, %v1476_v22  ;;  %v6097_v41 = vld [vmem:[#allocation2 + $0x189] sm:$0xff]  ;;  %v6105_v22 = vld [vmem:[#allocation2 + $0x191] sm:$0xff]  ;;  %v6895_v34 = vld [vmem:[#allocation49_spill] sm:$0xff] }
 0x22f   : > { %v1542_v23 = vadd.f32 %v1512_v8, %v1477_v30  ;;  %v2343_v9 = vmul.f32 %v5922_v55, %v6081_v49  ;;  %v2372_v62 = vadd.f32 %v2342_v21, %v2307_v35  ;;  %v1132_v19 = vadd.f32 %v1100_v48, %v1063_v61  ;;  %v6891_v26 = vld [vmem:[#allocation42_spill] sm:$0xff]  ;;  %6892 = vst [vmem:[#allocation33_spill] sm:$0xff] %v6105_v22  ;;  %v6894_v30 = vld [vmem:[#allocation45_spill] sm:$0xff]  ;;  %v6898_v20 = vld [vmem:[#allocation35_spill] sm:$0xff] }
 0x230   : > { %v1576_v25 = vmul.f32 %v5961_v45, %v5825_v31  ;;  %v1133_v43 = vadd.f32 %v1101_v10, %v1064_v36  ;;  %v1277_v50 = vmul.f32 %v5980_v53, %v6038_v15  ;;  %v1577_v51 = vmul.f32 %v5961_v45, %v5827_v13  ;;  %v6893_v35 = vld [vmem:[#allocation54_spill] sm:$0xff] }
 0x231   : > { %v1989_v18 = vmul.f32 %v6891_v26, %v6075_v42  ;;  %v1240_v21 = vadd.f32 %v6893_v35, %v1202_v5  ;;  %v1990_v31 = vmul.f32 %v6891_v26, %v6083_v57  ;;  %v2024_v36 = vmul.f32 %v6894_v30, %v6085_v27  ;;  %v6896_v15 = vld [vmem:[#allocation50_spill] sm:$0xff] }
 0x232   : > { %v1606_v61 = vadd.f32 %v1576_v25, %v1541_v28  ;;  %v1241_v0 = vadd.f32 %v6893_v35, %v1203_v52  ;;  %v1278_v8 = vmul.f32 %v5980_v53, %v6046_v58  ;;  %v1607_v13 = vadd.f32 %v1577_v51, %v1542_v23  ;;  %v6897_v25 = vld [vmem:[#allocation55_spill] sm:$0xff]  ;;  %v6899_v51 = vld [vmem:[#allocation34_spill] sm:$0xff] }
 0x233   : > { %v2025_v48 = vmul.f32 %v6894_v30, %v6093_v17  ;;  %v1732_v5 = vmul.f32 %v6896_v15, %v6895_v34  ;;  %v2054_v28 = vadd.f32 %v2024_v36, %v1989_v18  ;;  %v2089_v24 = vmul.f32 %v6897_v25, %v6097_v41 }
 0x234   : > { %v1636_v10 = vadd.f32 %v1606_v61, %v1132_v19  ;;  %v1637_v26 = vadd.f32 %v1607_v13, %v1133_v43  ;;  %v1767_v45 = vmul.f32 %v6001_v37, %v6898_v20  ;;  %v2090_v58 = vmul.f32 %v6897_v25, %v6105_v22  ;;  %v6900_v19 = vld [vmem:[#allocation43_spill] sm:$0xff] }
 0x235   : > { %v2055_v52 = vadd.f32 %v2025_v48, %v1990_v31  ;;  %v2373_v23 = vadd.f32 %v2343_v9, %v2308_v7  ;;  %v1733_v30 = vmul.f32 %v6896_v15, %v6899_v51  ;;  %v1768_v61 = vmul.f32 %v6001_v37, %v6900_v19 }
 0x236   : > { %v2119_v34 = vadd.f32 %v2089_v24, %v2054_v28  ;;  %v2402_v36 = vadd.f32 %v2372_v62, %v1890_v56  ;;  %v1309_v35 = vadd.f32 %v1277_v50, %v1240_v21  ;;  %v1346_v43 = vmul.f32 %v6008_v44, %v6060_v54 }
 0x237   : > { %v3685_v18 = vpop.eup %3684  ;;  %v2120_v13 = vadd.f32 %v2090_v58, %v2055_v52  ;;  %v1310_v48 = vadd.f32 %v1278_v8, %v1241_v0  ;;  %v1347_v7 = vmul.f32 %v6008_v44, %v6081_v49  ;;  %v1797_v15 = vadd.f32 %v1767_v45, %v1732_v5  ;;  %v6153_v5 = vld [vmem:[#allocation3 + $0x187] sm:$0xff] }
 0x238   : > { %v3687_v20 = vpop.eup %3686  ;;  %v2686_v31 = vadd.f32 1.0, %v3685_v18  ;;  %v6133_v9 = vadd.f32 %v2119_v34, %v1636_v10  ;;  %v1832_v24 = vmul.f32 %v6014_v60, %v5916_v12  ;;  %v1798_v62 = vadd.f32 %v1768_v61, %v1733_v30  ;;  %6901 = vst [vmem:[#allocation40_spill] sm:$0xff] %v6153_v5  ;;  %v6156_v61 = vld [vmem:[#allocation3 + $0x188] sm:$0xff] }
 0x239   : > { %v2687_v51 = vadd.f32 1.0, %v3687_v20  ;;  %v6137_v28 = vadd.f32 %v2120_v13, %v1637_v26  ;;  %v1833_v58 = vmul.f32 %v6014_v60, %v5955_v33  ;;  %v2403_v21 = vadd.f32 %v2373_v23, %v6056_v16  ;;  %6902 = vst [vmem:[#allocation53_spill] sm:$0xff] %v6156_v61 }
 0x23a   : > { %v2718_v56 = vmul.f32 0.5, %v2686_v31  ;;  %v2496_v50 = vmul.f32 %v6133_v9, %v6133_v9  ;;  %v958_v45 = vmul.f32 %v5868_v6, %v6075_v42  ;;  %v1378_v26 = vadd.f32 %v1346_v43, %v1309_v35  ;;  %v6160_v43 = vld [vmem:[#allocation3 + $0x18f] sm:$0xff] }
 0x23b   : > { %v2719_v0 = vmul.f32 0.5, %v2687_v51  ;;  %v2497_v8 = vmul.f32 %v6137_v28, %v6137_v28  ;;  %v959_v33 = vmul.f32 %v5868_v6, %v6083_v57  ;;  %v1379_v16 = vadd.f32 %v1347_v7, %v1310_v48  ;;  %6903 = vst [vmem:[#allocation48_spill] sm:$0xff] %v6160_v43  ;;  %v6169_v7 = vld [vmem:[#allocation3 + $0x190] sm:$0xff] }
 0x23c   : > { %v2750_v12 = vmul.f32 %v2718_v56, %v6018_v3  ;;  %v2528_v30 = vmul.f32 %v2496_v50, %v6133_v9  ;;  %v1862_v52 = vadd.f32 %v1832_v24, %v1797_v15  ;;  %v1863_v34 = vadd.f32 %v1833_v58, %v1798_v62  ;;  %6904 = vst [vmem:[#allocation28_spill] sm:$0xff] %v6169_v7 }
 0x23d   : > { %v2751_v10 = vmul.f32 %v2719_v0, %v6020_v47  ;;  %v2529_v23 = vmul.f32 %v2497_v8, %v6137_v28  ;;  %v2244_v3 = vmul.f32 %v5898_v2, %v6153_v5  ;;  %v2279_v47 = vmul.f32 %v5902_v46, %v6156_v61 }
 0x23e   : > { %v2814_v19 = vmul.f32 %v2750_v12, %v2402_v36  ;;  %v2560_v35 = vmul.f32 0.044715, %v2528_v30  ;;  %v996_v15 = vadd.f32 %v5885_v63, %v958_v45  ;;  %v2245_v36 = vmul.f32 %v5898_v2, %v6160_v43 }
 0x23f   : > { %v2815_v18 = vmul.f32 %v2751_v10, %v2403_v21  ;;  %v2561_v13 = vmul.f32 0.044715, %v2529_v23  ;;  %v997_v31 = vadd.f32 %v5885_v63, %v959_v33  ;;  %v1892_v51 = vadd.f32 %v1862_v52, %v1378_v26  ;;  %v6183_v26 = vld [vmem:[#allocation3 + $0x189] sm:$0xff] }
 0x240   : > { %v2592_v20 = vadd.f32 %v2560_v35, %v6133_v9  ;;  %v1033_v56 = vmul.f32 %v5894_v14, %v6085_v27  ;;  %v6174_v62 = vadd.f32 %v1863_v34, %v1379_v16  ;;  %v2280_v58 = vmul.f32 %v5902_v46, %v6169_v7  ;;  %v6189_v16 = vld [vmem:[#allocation3 + $0x191] sm:$0xff]  ;;  %v6193_v23 = vld [vmem:[#allocation2 + $0x1a7] sm:$0xff] }
 0x241   : > { %v3453_v48 = vpack.c.bf16 %v2815_v18, %v2814_v19  ;;  %v2593_v24 = vadd.f32 %v2561_v13, %v6137_v28  ;;  %v1034_v21 = vmul.f32 %v5894_v14, %v6093_v17  ;;  %v2309_v0 = vadd.f32 %v2279_v47, %v2244_v3  ;;  %v6201_v34 = vld [vmem:[#allocation2 + $0x1af] sm:$0xff] }
 0x242   : > { %v2624_v50 = vmul.f32 0.7978846, %v2592_v20  ;;  %v1065_v45 = vadd.f32 %v1033_v56, %v996_v15  ;;  %v1478_v12 = vmul.f32 %v5933_v59, %v5945_v38  ;;  %v1479_v33 = vmul.f32 %v5933_v59, %v5947_v4  ;;  %v6207_v18 = vld [vmem:[#allocation2 + $0x1a8] sm:$0xff]  ;;  %v6209_v47 = vld [vmem:[#allocation2 + $0x1b0] sm:$0xff] }
 0x243   : > { %3519 = vst [vmem:[%s4831_s27 + $0x50] sm:$0xff] %v3453_v48   ;;  %v2625_v8 = vmul.f32 0.7978846, %v2593_v24  ;;  %v1066_v30 = vadd.f32 %v1034_v21, %v997_v31  ;;  %v1513_v10 = vmul.f32 %v5939_v1, %v5957_v29  ;;  %v2344_v52 = vmul.f32 %v5922_v55, %v6183_v26  ;;  %v6905_v20 = vld [vmem:[#allocation44_spill] sm:$0xff]  ;;  %v6215_v24 = vld [vmem:[#allocation2 + $0x1a9] sm:$0xff] }
 0x244   : > { %3688 = vtanh.f32 %v2624_v50  ;;  %v1102_v38 = vmul.f32 %v5926_v40, %v6097_v41  ;;  %v1514_v19 = vmul.f32 %v5939_v1, %v5959_v32  ;;  %v2345_v4 = vmul.f32 %v5922_v55, %v6189_v16  ;;  %v6906_v50 = vld [vmem:[#allocation46_spill] sm:$0xff] }
 0x245   : > { %3690 = vtanh.f32 %v2625_v8  ;;  %v1103_v29 = vmul.f32 %v5926_v40, %v6105_v22  ;;  %v1204_v3 = vmul.f32 %v5949_v11, %v6153_v5  ;;  %v1543_v35 = vadd.f32 %v1513_v10, %v1478_v12  ;;  %v6907_v8 = vld [vmem:[#allocation42_spill] sm:$0xff]  ;;  %v6221_v5 = vld [vmem:[#allocation2 + $0x1b1] sm:$0xff] }
 0x246   : > { %v1134_v13 = vadd.f32 %v1102_v38, %v1065_v45  ;;  %v1205_v32 = vmul.f32 %v5949_v11, %v6160_v43  ;;  %v1544_v15 = vadd.f32 %v1514_v19, %v1479_v33  ;;  %v1578_v31 = vmul.f32 %v6905_v20, %v5969_v39  ;;  %6908 = vst [vmem:[#allocation29_spill] sm:$0xff] %v6221_v5  ;;  %v6911_v11 = vld [vmem:[#allocation39_spill] sm:$0xff]  ;;  %v6913_v22 = vld [vmem:[#allocation32_spill] sm:$0xff] }
 0x247   : > { %v2310_v48 = vadd.f32 %v2280_v58, %v2245_v36  ;;  %v1135_v56 = vadd.f32 %v1103_v29, %v1066_v30  ;;  %v1579_v21 = vmul.f32 %v6905_v20, %v6906_v50  ;;  %v1991_v12 = vmul.f32 %v6907_v8, %v6193_v23  ;;  %v6909_v36 = vld [vmem:[#allocation54_spill] sm:$0xff]  ;;  %v6910_v30 = vld [vmem:[#allocation45_spill] sm:$0xff] }
 0x248   : > { %v2374_v10 = vadd.f32 %v2344_v52, %v2309_v0  ;;  %v1279_v45 = vmul.f32 %v5980_v53, %v6156_v61  ;;  %v1608_v33 = vadd.f32 %v1578_v31, %v1543_v35  ;;  %v1992_v39 = vmul.f32 %v6907_v8, %v6201_v34  ;;  %v6912_v8 = vld [vmem:[#allocation50_spill] sm:$0xff] }
 0x249   : > { %v1242_v58 = vadd.f32 %v6909_v36, %v1204_v3  ;;  %v1609_v38 = vadd.f32 %v1579_v21, %v1544_v15  ;;  %v2026_v19 = vmul.f32 %v6910_v30, %v6207_v18  ;;  %v2027_v29 = vmul.f32 %v6910_v30, %v6209_v47 }
 0x24a   : > { %v1243_v0 = vadd.f32 %v6909_v36, %v1205_v32  ;;  %v1280_v52 = vmul.f32 %v5980_v53, %v6169_v7  ;;  %v1638_v50 = vadd.f32 %v1608_v33, %v1134_v13  ;;  %v2091_v35 = vmul.f32 %v6897_v25, %v6215_v24 }
 0x24b   : > { %v1639_v31 = vadd.f32 %v1609_v38, %v1135_v56  ;;  %v2056_v43 = vadd.f32 %v2026_v19, %v1991_v12  ;;  %v2057_v61 = vadd.f32 %v2027_v29, %v1992_v39  ;;  %v2092_v3 = vmul.f32 %v6897_v25, %v6221_v5 }
 0x24c   : > { %v2375_v15 = vadd.f32 %v2345_v4, %v2310_v48  ;;  %v2404_v21 = vadd.f32 %v2374_v10, %v1892_v51  ;;  %v1734_v30 = vmul.f32 %v6912_v8, %v6911_v11  ;;  %v1769_v32 = vmul.f32 %v6001_v37, %v6913_v22  ;;  %v6914_v4 = vld [vmem:[#allocation51_spill] sm:$0xff]  ;;  %v6915_v48 = vld [vmem:[#allocation26_spill] sm:$0xff] }
 0x24d   : > { %v1311_v7 = vadd.f32 %v1279_v45, %v1242_v58  ;;  %v1348_v13 = vmul.f32 %v6008_v44, %v6183_v26  ;;  %v2121_v33 = vadd.f32 %v2091_v35, %v2056_v43  ;;  %v2122_v56 = vadd.f32 %v2092_v3, %v2057_v61 }
 0x24e   : > { %v3689_v36 = vpop.eup %3688  ;;  %v1349_v38 = vmul.f32 %v6008_v44, %v6189_v16  ;;  %v1735_v51 = vmul.f32 %v6912_v8, %v6914_v4  ;;  %v1770_v11 = vmul.f32 %v6001_v37, %v6915_v48  ;;  %v1312_v22 = vadd.f32 %v1280_v52, %v1243_v0 }
 0x24f   : > { %v3691_v12 = vpop.eup %3690  ;;  %v2688_v39 = vadd.f32 1.0, %v3689_v36  ;;  %v6251_v19 = vadd.f32 %v2121_v33, %v1638_v50  ;;  %v6253_v45 = vadd.f32 %v2122_v56, %v1639_v31  ;;  %v1799_v43 = vadd.f32 %v1769_v32, %v1734_v30 }
 0x250   : > { %v2689_v10 = vadd.f32 1.0, %v3691_v12  ;;  %v1834_v61 = vmul.f32 %v6014_v60, %v6060_v54  ;;  %v960_v36 = vmul.f32 %v5868_v6, %v6193_v23  ;;  %v961_v0 = vmul.f32 %v5868_v6, %v6201_v34 }
 0x251   : > { %v2720_v58 = vmul.f32 0.5, %v2688_v39  ;;  %v2498_v35 = vmul.f32 %v6251_v19, %v6251_v19  ;;  %v2499_v3 = vmul.f32 %v6253_v45, %v6253_v45  ;;  %v2405_v52 = vadd.f32 %v2375_v15, %v6174_v62  ;;  %v6273_v62 = vld [vmem:[#allocation3 + $0x1a7] sm:$0xff] }
 0x252   : > { %v2721_v29 = vmul.f32 0.5, %v2689_v10  ;;  %v1800_v50 = vadd.f32 %v1770_v11, %v1735_v51  ;;  %v1835_v54 = vmul.f32 %v6014_v60, %v6081_v49  ;;  %v1380_v32 = vadd.f32 %v1348_v13, %v1311_v7  ;;  %6916 = vst [vmem:[#allocation36_spill] sm:$0xff] %v6273_v62  ;;  %v6284_v11 = vld [vmem:[#allocation3 + $0x1af] sm:$0xff] }
 0x253   : > { %v2752_v30 = vmul.f32 %v2720_v58, %v6133_v9  ;;  %v2530_v33 = vmul.f32 %v2498_v35, %v6251_v19  ;;  %v2531_v56 = vmul.f32 %v2499_v3, %v6253_v45  ;;  %v1381_v39 = vadd.f32 %v1349_v38, %v1312_v22  ;;  %v6275_v9 = vld [vmem:[#allocation3 + $0x1a8] sm:$0xff]  ;;  %6917 = vst [vmem:[#allocation30_spill] sm:$0xff] %v6284_v11  ;;  %v6286_v22 = vld [vmem:[#allocation3 + $0x1b0] sm:$0xff] }
 0x254   : > { %v2753_v31 = vmul.f32 %v2721_v29, %v6137_v28  ;;  %v1864_v4 = vadd.f32 %v1834_v61, %v1799_v43  ;;  %v998_v48 = vadd.f32 %v5885_v63, %v960_v36  ;;  %v999_v49 = vadd.f32 %v5885_v63, %v961_v0  ;;  %v6288_v58 = vld [vmem:[#allocation3 + $0x1a9] sm:$0xff] }
 0x255   : > { %v2816_v12 = vmul.f32 %v2752_v30, %v2404_v21  ;;  %v2562_v15 = vmul.f32 0.044715, %v2530_v33  ;;  %v2563_v51 = vmul.f32 0.044715, %v2531_v56  ;;  %v1865_v28 = vadd.f32 %v1835_v54, %v1800_v50 }
 0x256   : > { %v2817_v10 = vmul.f32 %v2753_v31, %v2405_v52  ;;  %v2246_v7 = vmul.f32 %v5898_v2, %v6273_v62  ;;  %v2281_v21 = vmul.f32 %v5902_v46, %v6275_v9  ;;  %v1035_v13 = vmul.f32 %v5894_v14, %v6207_v18  ;;  %v6301_v52 = vld [vmem:[#allocation3 + $0x1b1] sm:$0xff] }
 0x257   : > { %v2594_v43 = vadd.f32 %v2562_v15, %v6251_v19  ;;  %v2595_v61 = vadd.f32 %v2563_v51, %v6253_v45  ;;  %v1036_v36 = vmul.f32 %v5894_v14, %v6209_v47  ;;  %v2247_v29 = vmul.f32 %v5898_v2, %v6284_v11 }
 0x258   : > { %v3458_v38 = vpack.c.bf16 %v2817_v10, %v2816_v12  ;;  %v2282_v35 = vmul.f32 %v5902_v46, %v6286_v22  ;;  %v2346_v3 = vmul.f32 %v5922_v55, %v6288_v58  ;;  %v1067_v0 = vadd.f32 %v1035_v13, %v998_v48 }
 0x259   : > { %v2626_v30 = vmul.f32 0.7978846, %v2594_v43  ;;  %v2627_v50 = vmul.f32 0.7978846, %v2595_v61  ;;  %v1068_v54 = vadd.f32 %v1036_v36, %v999_v49  ;;  %v1480_v31 = vmul.f32 %v5933_v59, %v6075_v42  ;;  %v6918_v61 = vld [vmem:[#allocation33_spill] sm:$0xff]  ;;  %v3752_v36 = vld [vmem:[#allocation2 + $0x1c7] sm:$0xff] }
 0x25a   : > { %3520 = vst [vmem:[%s4831_s27 + $0x58] sm:$0xff] %v3458_v38   ;;  %v2347_v33 = vmul.f32 %v5922_v55, %v6301_v52  ;;  %v1104_v56 = vmul.f32 %v5926_v40, %v6215_v24  ;;  %v1481_v12 = vmul.f32 %v5933_v59, %v6083_v57  ;;  %v1515_v48 = vmul.f32 %v5939_v1, %v6085_v27 }
 0x25b   : > { %v2311_v10 = vadd.f32 %v2281_v21, %v2246_v7  ;;  %3692 = vtanh.f32 %v2626_v30  ;;  %v1105_v15 = vmul.f32 %v5926_v40, %v6221_v5  ;;  %v1516_v42 = vmul.f32 %v5939_v1, %v6093_v17  ;;  %v6919_v30 = vld [vmem:[#allocation42_spill] sm:$0xff]  ;;  %v3753_v5 = vld [vmem:[#allocation2 + $0x1cf] sm:$0xff] }
 0x25c   : > { %v2312_v51 = vadd.f32 %v2282_v35, %v2247_v29  ;;  %3694 = vtanh.f32 %v2627_v50  ;;  %v1136_v49 = vadd.f32 %v1104_v56, %v1067_v0  ;;  %v1545_v13 = vadd.f32 %v1515_v48, %v1480_v31  ;;  %v3754_v0 = vld [vmem:[#allocation2 + $0x1c8] sm:$0xff]  ;;  %v6920_v50 = vld [vmem:[#allocation45_spill] sm:$0xff]  ;;  %v3755_v31 = vld [vmem:[#allocation2 + $0x1d0] sm:$0xff] }
 0x25d   : > { %v1137_v38 = vadd.f32 %v1105_v15, %v1068_v54  ;;  %v1546_v43 = vadd.f32 %v1516_v42, %v1481_v12  ;;  %v1580_v57 = vmul.f32 %v6905_v20, %v6097_v41  ;;  %v1581_v27 = vmul.f32 %v6905_v20, %v6918_v61  ;;  %v6329_v61 = vld [vmem:[#allocation2 + $0x1d1] sm:$0xff] }
 0x25e   : > { %v1993_v55 = vmul.f32 %v3752_v36, %v6919_v30  ;;  %v1994_v17 = vmul.f32 %v3753_v5, %v6919_v30  ;;  %v1894_v29 = vadd.f32 %v1864_v4, %v1380_v32  ;;  %v1895_v35 = vadd.f32 %v1865_v28, %v1381_v39  ;;  %v6921_v39 = vld [vmem:[#allocation38_spill] sm:$0xff] }
 0x25f   : > { %v1610_v7 = vadd.f32 %v1580_v57, %v1545_v13  ;;  %v1611_v21 = vadd.f32 %v1581_v27, %v1546_v43  ;;  %v2028_v54 = vmul.f32 %v3754_v0, %v6920_v50  ;;  %v2029_v56 = vmul.f32 %v3755_v31, %v6920_v50  ;;  %v6325_v43 = vld [vmem:[#allocation2 + $0x1c9] sm:$0xff] }
 0x260   : > { %v2376_v41 = vadd.f32 %v2346_v3, %v2311_v10  ;;  %v2377_v12 = vadd.f32 %v2347_v33, %v2312_v51  ;;  %v2093_v57 = vmul.f32 %v6325_v43, %v6897_v25  ;;  %v2094_v32 = vmul.f32 %v6329_v61, %v6897_v25 }
 0x261   : > { %v1640_v48 = vadd.f32 %v1610_v7, %v1136_v49  ;;  %v1641_v15 = vadd.f32 %v1611_v21, %v1137_v38  ;;  %v2058_v42 = vadd.f32 %v2028_v54, %v1993_v55  ;;  %v2059_v13 = vadd.f32 %v2029_v56, %v1994_v17  ;;  %v6922_v17 = vld [vmem:[#allocation54_spill] sm:$0xff] }
 0x262   : > { %v1206_v4 = vmul.f32 %v6921_v39, %v6273_v62  ;;  %v1207_v28 = vmul.f32 %v6921_v39, %v6284_v11  ;;  %v2406_v10 = vadd.f32 %v2376_v41, %v1894_v29  ;;  %v2407_v49 = vadd.f32 %v2377_v12, %v1895_v35 }
 0x263   : > { %v2123_v3 = vadd.f32 %v2093_v57, %v2058_v42  ;;  %v2124_v33 = vadd.f32 %v2094_v32, %v2059_v13  ;;  %v1281_v62 = vmul.f32 %v5980_v53, %v6275_v9  ;;  %v962_v35 = vmul.f32 %v3752_v36, %v5868_v6 }
 0x264   : > { %v1244_v54 = vadd.f32 %v6922_v17, %v1206_v4  ;;  %v1245_v56 = vadd.f32 %v6922_v17, %v1207_v28  ;;  %v1282_v12 = vmul.f32 %v5980_v53, %v6286_v22  ;;  %v6358_v57 = vmul.f32 %v6008_v44, %v6301_v52 }
 0x265   : > { %v3693_v55 = vpop.eup %3692  ;;  %v6337_v27 = vadd.f32 %v2123_v3, %v1640_v48  ;;  %v6339_v7 = vadd.f32 %v2124_v33, %v1641_v15  ;;  %v1350_v48 = vmul.f32 %v6008_v44, %v6288_v58  ;;  %v963_v15 = vmul.f32 %v3753_v5, %v5868_v6  ;;  %v6923_v3 = vld [vmem:[#allocation40_spill] sm:$0xff] }
 0x266   : > { %v3695_v51 = vpop.eup %3694  ;;  %v2690_v38 = vadd.f32 1.0, %v3693_v55  ;;  %v1313_v28 = vadd.f32 %v1281_v62, %v1244_v54  ;;  %v1736_v33 = vmul.f32 %v6912_v8, %v6923_v3  ;;  %v6924_v55 = vld [vmem:[#allocation53_spill] sm:$0xff]  ;;  %v6925_v62 = vld [vmem:[#allocation48_spill] sm:$0xff]  ;;  %v1482_v3 = vmul.f32 %v5933_v59, %v6193_v23  ;;  %v3758_v23 = vld [vmem:[#allocation3 + $0x1c7] sm:$0xff] }
 0x267   : > { %v2691_v21 = vadd.f32 1.0, %v3695_v51  ;;  %v2500_v42 = vmul.f32 %v6337_v27, %v6337_v27  ;;  %v2501_v29 = vmul.f32 %v6339_v7, %v6339_v7  ;;  %v1771_v51 = vmul.f32 %v6001_v37, %v6924_v55 }
 0x268   : > { %v2722_v11 = vmul.f32 0.5, %v2690_v38  ;;  %v1737_v54 = vmul.f32 %v6912_v8, %v6925_v62  ;;  %v1483_v55 = vmul.f32 %v5933_v59, %v6201_v34  ;;  %v6395_v59 = vld [vmem:[#allocation3 + $0x1c8] sm:$0xff] }
 0x269   : > { %v2723_v41 = vmul.f32 0.5, %v2691_v21  ;;  %v2532_v32 = vmul.f32 %v2500_v42, %v6337_v27  ;;  %v2533_v4 = vmul.f32 %v2501_v29, %v6339_v7  ;;  %v1001_v21 = vadd.f32 %v5885_v63, %v963_v15  ;;  %v6926_v29 = vld [vmem:[#allocation28_spill] sm:$0xff] }
 0x26a   : > { %v2754_v13 = vmul.f32 %v2722_v11, %v6251_v19  ;;  %v1000_v11 = vadd.f32 %v5885_v63, %v962_v35  ;;  %v1037_v42 = vmul.f32 %v3754_v0, %v5894_v14  ;;  %v1314_v35 = vadd.f32 %v1282_v12, %v1245_v56 }
 0x26b   : > { %v2755_v36 = vmul.f32 %v2723_v41, %v6253_v45  ;;  %v2564_v5 = vmul.f32 0.044715, %v2532_v32  ;;  %v2565_v19 = vmul.f32 0.044715, %v2533_v4  ;;  %v1038_v45 = vmul.f32 %v3755_v31, %v5894_v14 }
 0x26c   : > { %v2818_v6 = vmul.f32 %v2754_v13, %v2406_v10  ;;  %v1772_v41 = vmul.f32 %v6001_v37, %v6926_v29  ;;  %v1836_v63 = vmul.f32 %v6014_v60, %v6183_v26  ;;  %v1382_v15 = vadd.f32 %v1350_v48, %v1313_v28  ;;  %v3764_v29 = vld [vmem:[#allocation2 + $0x1e8] sm:$0xff] }
 0x26d   : > { %v2819_v38 = vmul.f32 %v2755_v36, %v2407_v49  ;;  %v2596_v10 = vadd.f32 %v2564_v5, %v6337_v27  ;;  %v2597_v13 = vadd.f32 %v2565_v19, %v6339_v7  ;;  %v1801_v49 = vadd.f32 %v1771_v51, %v1736_v33  ;;  %v6927_v5 = vld [vmem:[#allocation29_spill] sm:$0xff]  ;;  %v3760_v19 = vld [vmem:[#allocation3 + $0x1cf] sm:$0xff] }
 0x26e   : > { %v1837_v14 = vmul.f32 %v6014_v60, %v6189_v16  ;;  %v1069_v4 = vadd.f32 %v1037_v42, %v1000_v11  ;;  %v1070_v36 = vadd.f32 %v1038_v45, %v1001_v21  ;;  %v1802_v56 = vadd.f32 %v1772_v41, %v1737_v54  ;;  %v3763_v42 = vld [vmem:[#allocation2 + $0x1ef] sm:$0xff] }
 0x26f   : > { %v3463_v32 = vpack.c.bf16 %v2819_v38, %v2818_v6  ;;  %v2628_v0 = vmul.f32 0.7978846, %v2596_v10  ;;  %v2629_v31 = vmul.f32 0.7978846, %v2597_v13  ;;  %v1517_v26 = vmul.f32 %v5939_v1, %v6207_v18  ;;  %v3762_v38 = vld [vmem:[#allocation2 + $0x1e7] sm:$0xff]  ;;  %v3765_v41 = vld [vmem:[#allocation2 + $0x1f0] sm:$0xff] }
 0x270   : > { %v1518_v12 = vmul.f32 %v5939_v1, %v6209_v47  ;;  %v1866_v16 = vadd.f32 %v1836_v63, %v1801_v49  ;;  %v1106_v48 = vmul.f32 %v6325_v43, %v5926_v40  ;;  %v1107_v28 = vmul.f32 %v6329_v61, %v5926_v40  ;;  %v3761_v61 = vld [vmem:[#allocation3 + $0x1d0] sm:$0xff] }
 0x271   : > { %3521 = vst [vmem:[%s4831_s27 + $0x60] sm:$0xff] %v3463_v32   ;;  %3696 = vtanh.f32 %v2628_v0  ;;  %v2248_v33 = vmul.f32 %v3758_v23, %v5898_v2  ;;  %v2283_v34 = vmul.f32 %v6395_v59, %v5902_v46  ;;  %v1547_v18 = vadd.f32 %v1517_v26, %v1482_v3  ;;  %v3766_v13 = vld [vmem:[#allocation3 + $0x1c9] sm:$0xff]  ;;  %v3768_v63 = vld [vmem:[#allocation2 + $0x1f1] sm:$0xff] }
 0x272   : > { %3698 = vtanh.f32 %v2629_v31  ;;  %v1548_v51 = vadd.f32 %v1518_v12, %v1483_v55  ;;  %v1138_v6 = vadd.f32 %v1106_v48, %v1069_v4  ;;  %v1139_v1 = vadd.f32 %v1107_v28, %v1070_v36  ;;  %v3767_v49 = vld [vmem:[#allocation2 + $0x1e9] sm:$0xff]  ;;  %v3769_v12 = vld [vmem:[#allocation3 + $0x1d1] sm:$0xff] }
 0x273   : > { %v1582_v47 = vmul.f32 %v6905_v20, %v6215_v24  ;;  %v1583_v43 = vmul.f32 %v6905_v20, %v6927_v5  ;;  %v2249_v40 = vmul.f32 %v3760_v19, %v5898_v2  ;;  %v2284_v11 = vmul.f32 %v3761_v61, %v5902_v46  ;;  %v6928_v2 = vld [vmem:[#allocation52_spill] sm:$0xff] }
 0x274   : > { %v1995_v21 = vmul.f32 %v3762_v38, %v6919_v30  ;;  %v1996_v45 = vmul.f32 %v3763_v42, %v6919_v30  ;;  %v2030_v24 = vmul.f32 %v3764_v29, %v6920_v50  ;;  %v2031_v20 = vmul.f32 %v3765_v41, %v6920_v50 }
 0x275   : > { %v1612_v62 = vadd.f32 %v1582_v47, %v1547_v18  ;;  %v1613_v54 = vadd.f32 %v1583_v43, %v1548_v51  ;;  %v2313_v10 = vadd.f32 %v2283_v34, %v2248_v33  ;;  %v2348_v32 = vmul.f32 %v3766_v13, %v6928_v2 }
 0x276   : > { %v2095_v46 = vmul.f32 %v3767_v49, %v6897_v25  ;;  %v2096_v0 = vmul.f32 %v3768_v63, %v6897_v25  ;;  %v2060_v4 = vadd.f32 %v2030_v24, %v1995_v21  ;;  %v2061_v36 = vadd.f32 %v2031_v20, %v1996_v45  ;;  %v6930_v63 = vld [vmem:[#allocation30_spill] sm:$0xff] }
 0x277   : > { %v1642_v31 = vadd.f32 %v1612_v62, %v1138_v6  ;;  %v1643_v30 = vadd.f32 %v1613_v54, %v1139_v1  ;;  %v1383_v3 = vadd.f32 %v6358_v57, %v1314_v35  ;;  %v1867_v55 = vadd.f32 %v1837_v14, %v1802_v56 }
 0x278   : > { %v2314_v26 = vadd.f32 %v2284_v11, %v2249_v40  ;;  %v2349_v50 = vmul.f32 %v3769_v12, %v6928_v2  ;;  %v2125_v48 = vadd.f32 %v2095_v46, %v2060_v4  ;;  %v2126_v28 = vadd.f32 %v2096_v0, %v2061_v36  ;;  %v3770_v36 = vld [vmem:[#allocation12 + $0x6] ss:$0 sm:$0xff] }
 0x279   : > { %v1896_v34 = vadd.f32 %v1866_v16, %v1382_v15  ;;  %v2378_v51 = vadd.f32 %v2348_v32, %v2313_v10  ;;  %v1897_v6 = vadd.f32 %v1867_v55, %v1383_v3  ;;  %v1208_v42 = vmul.f32 %v3758_v23, %v6921_v39  ;;  %v3772_v55 = vld [vmem:[#allocation3 + $0x1e8] sm:$0xff] }
 0x27a   : > { %v6414_v5 = vadd.f32 %v2125_v48, %v1642_v31  ;;  %v6416_v25 = vadd.f32 %v2126_v28, %v1643_v30  ;;  %v2379_v1 = vadd.f32 %v2349_v50, %v2314_v26  ;;  %v1209_v62 = vmul.f32 %v3760_v19, %v6921_v39  ;;  %v6929_v39 = vld [vmem:[#allocation36_spill] sm:$0xff] }
 0x27b   : > { %v3697_v33 = vpop.eup %3696  ;;  %v2408_v40 = vadd.f32 %v2378_v51, %v1896_v34  ;;  %v1246_v10 = vadd.f32 %v6922_v17, %v1208_v42  ;;  %v1283_v2 = vmul.f32 %v6395_v59, %v5980_v53  ;;  %v1284_v23 = vmul.f32 %v3761_v61, %v5980_v53  ;;  %v3775_v28 = vld [vmem:[#allocation3 + $0x1f0] sm:$0xff]  ;;  %v3776_v34 = vld [vmem:[#allocation12 + $0x8] ss:$0 sm:$0xff] }
 0x27c   : > { %v3699_v18 = vpop.eup %3698  ;;  %v2692_v47 = vadd.f32 1.0, %v3697_v33  ;;  %v2502_v35 = vmul.f32 %v6414_v5, %v6414_v5  ;;  %v2503_v14 = vmul.f32 %v6416_v25, %v6416_v25  ;;  %v2409_v38 = vadd.f32 %v2379_v1, %v1897_v6  ;;  %v3778_v1 = vld [vmem:[#allocation3 + $0x1f1] sm:$0xff] }
 0x27d   : > { %v2693_v43 = vadd.f32 1.0, %v3699_v18  ;;  %v1738_v19 = vmul.f32 %v6912_v8, %v6929_v39  ;;  %v1773_v46 = vmul.f32 %v6001_v37, %v6275_v9  ;;  %v1739_v0 = vmul.f32 %v6912_v8, %v6930_v63  ;;  %v3771_v9 = vld [vmem:[#allocation3 + $0x1e7] sm:$0xff]  ;;  %v3773_v8 = vld [vmem:[#allocation12 + $0x7] ss:$0 sm:$0xff] }
 0x27e   : > { %v2724_v57 = vmul.f32 0.5, %v2692_v47  ;;  %v2534_v16 = vmul.f32 %v2502_v35, %v6414_v5  ;;  %v2535_v11 = vmul.f32 %v2503_v14, %v6416_v25  ;;  %v1774_v31 = vmul.f32 %v6001_v37, %v6286_v22  ;;  %v3774_v22 = vld [vmem:[#allocation3 + $0x1ef] sm:$0xff] }
 0x27f   : > { %v2725_v56 = vmul.f32 0.5, %v2693_v43  ;;  %v1352_v53 = vmul.f32 %v3766_v13, %v6008_v44  ;;  %v1353_v61 = vmul.f32 %v3769_v12, %v6008_v44  ;;  %v1803_v30 = vadd.f32 %v1773_v46, %v1738_v19  ;;  %v3777_v18 = vld [vmem:[#allocation3 + $0x1e9] sm:$0xff] }
 0x280   : > { %v2756_v15 = vmul.f32 %v2724_v57, %v6337_v27  ;;  %v2566_v54 = vmul.f32 0.044715, %v2534_v16  ;;  %v2567_v29 = vmul.f32 0.044715, %v2535_v11  ;;  %v1838_v4 = vmul.f32 %v6014_v60, %v6288_v58 }
 0x281   : > { %v2757_v21 = vmul.f32 %v2725_v56, %v6339_v7  ;;  %v1247_v7 = vadd.f32 %v6922_v17, %v1209_v62  ;;  %v1315_v17 = vadd.f32 %v1283_v2, %v1246_v10  ;;  %v2250_v3 = vmul.f32 %v3771_v9, %v3770_v36 }
 0x282   : > { %v2820_v45 = vmul.f32 %v2756_v15, %v2408_v40  ;;  %v2598_v41 = vadd.f32 %v2566_v54, %v6414_v5  ;;  %v2599_v27 = vadd.f32 %v2567_v29, %v6416_v25  ;;  %v2285_v26 = vmul.f32 %v3773_v8, %v3772_v55 }
 0x283   : > { %v2821_v24 = vmul.f32 %v2757_v21, %v2409_v38  ;;  %v1316_v59 = vadd.f32 %v1284_v23, %v1247_v7  ;;  %v1804_v50 = vadd.f32 %v1774_v31, %v1739_v0  ;;  %v1839_v37 = vmul.f32 %v6014_v60, %v6301_v52 }
 0x284   : > { %v2630_v32 = vmul.f32 0.7978846, %v2598_v41  ;;  %v2631_v49 = vmul.f32 0.7978846, %v2599_v27  ;;  %v2251_v48 = vmul.f32 %v3774_v22, %v3770_v36  ;;  %v2286_v13 = vmul.f32 %v3775_v28, %v3773_v8 }
 0x285   : > { %v3468_v20 = vpack.c.bf16 %v2821_v24, %v2820_v45  ;;  %v1384_v33 = vadd.f32 %v1352_v53, %v1315_v17  ;;  %v1868_v44 = vadd.f32 %v1838_v4, %v1803_v30  ;;  %v2315_v12 = vadd.f32 %v2285_v26, %v2250_v3 }
 0x286   : > { %3700 = vtanh.f32 %v2630_v32  ;;  %v2350_v58 = vmul.f32 %v3777_v18, %v3776_v34  ;;  %v1385_v51 = vadd.f32 %v1353_v61, %v1316_v59  ;;  %v1869_v47 = vadd.f32 %v1839_v37, %v1804_v50 }
 0x287   : > { %3522 = vst [vmem:[%s4831_s27 + $0x68] sm:$0xff] %v3468_v20   ;;  %3702 = vtanh.f32 %v2631_v49  ;;  %v2316_v6 = vadd.f32 %v2286_v13, %v2251_v48  ;;  %v2351_v43 = vmul.f32 %v3778_v1, %v3776_v34  ;;  %v1898_v60 = vadd.f32 %v1868_v44, %v1384_v33 }
 0x288   : > { %v2380_v52 = vadd.f32 %v2350_v58, %v2315_v12  ;;  %v1899_v56 = vadd.f32 %v1869_v47, %v1385_v51 }
 0x289   : > { %v2381_v40 = vadd.f32 %v2351_v43, %v2316_v6 }
 0x28a   : > { %v2410_v38 = vadd.f32 %v2380_v52, %v1898_v60 }
 0x28b   : > { %v2411_v42 = vadd.f32 %v2381_v40, %v1899_v56 }
 0x290   : > { %v3701_v57 = vpop.eup %3700 }
 0x291   : > { %v3703_v35 = vpop.eup %3702  ;;  %v2694_v14 = vadd.f32 1.0, %v3701_v57 }
 0x292   : > { %v2695_v15 = vadd.f32 1.0, %v3703_v35 }
 0x293   : > { %v2726_v16 = vmul.f32 0.5, %v2694_v14 }
 0x294   : > { %v2727_v11 = vmul.f32 0.5, %v2695_v15 }
 0x295   : > { %v2758_v21 = vmul.f32 %v2726_v16, %v6414_v5 }
 0x296   : > { %v2759_v45 = vmul.f32 %v2727_v11, %v6416_v25 }
 0x297   : > { %v2822_v62 = vmul.f32 %v2758_v21, %v2410_v38 }
 0x298   : > { %v2823_v54 = vmul.f32 %v2759_v45, %v2411_v42 }
 0x29a   : > { %v3473_v29 = vpack.c.bf16 %v2823_v54, %v2822_v62 }
 0x29c   : > { %3523 = vst [vmem:[%s4831_s27 + $0x70] sm:$0xff] %v3473_v29  }
 0x29d   : > { %3965 = shalt.err (!%p3962_p8)
}
 0x29e   : > { %s3966_s0 = scalar_lea.hbm %s6457_s19, 2048  ;;  %s3970_s17 = scalar_lea.hbm %s6515_s6, 4096 }
 0x29f   : > { %p3967_p7 = scmp.ne.s32.totalorder %s6457_s19, %s3966_s0  ;;  %p3971_p2 = scmp.lt.u32.totalorder %s6457_s19, %s6515_s6 }
 0x2a0   : > { %p3972_p13 = scmp.lt.u32.totalorder %s3970_s17, %s3966_s0  ;;  %p3974_p1 = scmp.lt.u32.totalorder %s3966_s0, %s6457_s19 }
 0x2a1   : > { %p3968_p9 = pnand %p3967_p7, %p4273_p5 }
 0x2a2   : > { %p3973_p6 = por %p3972_p13, %p3971_p2 }
 0x2a3   : > { %p3969_p0 = pneg %p3968_p9 }
 0x2a4   : > { %p3975_p4 = por %p3974_p1, %p3973_p6 }
 0x2a6   : > { %p3976_p10 = pnand %p3975_p4, %p3969_p0 }
 0x2a8   : > { %3979 = shalt.err (!%p3976_p10)
}
 0x2a9   : > { %s4064_s9 = smov 64   ;;  %s4065_s2 = smov 4  }
 0x2aa   : > { %3545 = dma.vmem_to_hbm [thread:$0]  (%p4273_p5), %s6459_s13, 2048, %s6457_s19, %s2987_s12, %s4064_s9, %s4064_s9, %s4065_s2  }
 0x2ab PF: > { %s6931_s4 = sld [smem:[#allocation24_spill]]  ;;  %s6932_s7 = sld [smem:[#allocation25_spill]] }
 0x2ac   : > { %p6934_p11 = scmp.ge.s32.totalorder %s4050_s26, 2 }
 0x2b1   : > { %s3016_s27 = sand.u32 1, %s6931_s4   ;;  %p6933_p3 = scmp.ne.s32.totalorder %s6932_s7, 0 }
 0x2b2   : > { %s3017_s29 = scalar_lea.sflag [#allocation8], %s3016_s27 }
 0x2b3   : > { %p3568_p12 = pnand %p6934_p11, %p6933_p3 }
 0x2b5   : > { %4025 = dma.done.wait (!%p3568_p12), %s3017_s29, 2048  }
 0x2b6   : > { %4027 = vsyncadd (!%p3568_p12), %s3017_s29, 4294965248  ;;  %s27_s26 = sadd.s32 1, %s4050_s26   ;;  %s6935_s21 = smov %s4034_s22 }
 0x2b7   : > { %p24_p8 = scmp.ge.s32.totalorder %s27_s26, 4   ;;  %s6936_s22 = smov %s4038_s23 }
 0x2b8   : > { %s6937_s23 = smov %s4284_s28  ;;  %s6938_s24 = smov %s4046_s25 }
 0x2b9   : > { %s6939_s25 = smov %s6941_s20  ;;  %26 = sbr.rel (!%p24_p8) target bundleno = 16 (0x10), region = 124 }
 0x2c0   :  { %3022 = vsyncpa [#allocation7], 1 }
 0x2c1   :  { %3024 = vsyncpa [#allocation7 + $0x1], 1 }
 0x2c2   :  { %3025 = vsyncpa [#allocation10], 1 }
 0x2c3   :  { %3027 = vsyncpa [#allocation10 + $0x1], 1 }
 0x2c4   :  { %3028 = vsyncpa [#allocation13], 1 }
 0x2c5   :  { %3029 = vsyncpa [#allocation16], 1 }
 0x2c6   :  { %3030 = vsyncpa [#allocation8], 1 }
 0x2c7   :  { %3032 = vsyncpa [#allocation8 + $0x1], 1 }

</bundles_post_ra>
